<compile_context>
chip_gen: v6e
topology: v6e:2x2x1
jax: 0.10.0
libtpu: 0.0.40
codegen_flags: <defaults>
</compile_context>

<pallas_src>
import functools

import jax
import jax.numpy as jnp
from jax.experimental import pallas as pl
from jax.experimental.pallas import tpu as pltpu

# ---------------- model hyper-parameters (small, synthetic) ----------------
B = 8                # images per graph (= number of graph nodes)
C_IN = 3             # image channels
H = W = 16           # spatial size
FEATURE_DIM = 128    # stub backbone feature dim (efficientnet_b3 would be 1536)
HIDDEN = 256         # GNN hidden_channels (as in the module)
NUM_CLASSES = 8
BN_EPS = 1e-5
KNN_K = 7
K_PATCH = 9 * C_IN   # im2col patch length for a 3x3 conv


# ============================ fused Pallas kernel ===========================

def fused_model_kernel(patches_ref, conv_w_ref, g1w_ref, g2w_ref, g3w_ref,
                       w1a_ref, w1b_ref, w2_ref, bias_ref, out_ref,
                       *, adaptive_k):
    f32 = jnp.float32
    bf16 = jnp.bfloat16

    n = out_ref.shape[0]                      # graph nodes (= images per batch)
    rows = patches_ref.shape[0]               # B*HW/2 packed im2col rows
    fdim = conv_w_ref.shape[1] // 2           # backbone feature dim
    rows_per_img = rows // n                  # HW/2
    hw = 2 * rows_per_img
    hid = g1w_ref.shape[1]
    dmid = w1a_ref.shape[1]
    ncls = out_ref.shape[1]

    # ---- bias bank: static lane slices (all offsets multiples of 128) ----
    o = 0
    conv_b = bias_ref[:, o:o + 2 * fdim]; o += 2 * fdim
    cnn_scale = bias_ref[:, o:o + fdim];  o += fdim
    cnn_shift = bias_ref[:, o:o + fdim];  o += fdim
    g1b = bias_ref[:, o:o + hid];         o += hid
    g2b = bias_ref[:, o:o + hid];         o += hid
    g3b = bias_ref[:, o:o + hid];         o += hid
    b1 = bias_ref[:, o:o + dmid];         o += dmid
    b2 = bias_ref[:, o:o + ncls]

    # ---- CNN stem: packed 3x3 conv (im2col matmul) -> bias -> ReLU -> GAP ----
    act = jnp.dot(patches_ref[...], conv_w_ref[...],
                  preferred_element_type=f32)                  # [rows, 2*fdim]
    act = jnp.maximum(act + conv_b, 0.0)
    # Global average pool: sum each image's rows (clean sublane split), then
    # fold the two packed pixel halves.
    s = jnp.sum(act.reshape(n, rows_per_img, 2 * fdim), axis=1)    # [n, 2*fdim]
    feat = (s[:, :fdim] + s[:, fdim:]) * (1.0 / hw)                # [n, fdim]
    # BatchNorm1d eval (running mean=0, var=1): affine epilogue on one vreg.
    feat = feat * cnn_scale + cnn_shift

    # ---- adaptive kNN graph -> dense GCN propagation matrix ----
    if adaptive_k >= n - 1:
        # Complete graph (true for the shipped B=8, k=7): gcn_norm of A+I with
        # all-ones adjacency is exactly 1/n everywhere -> skip the whole block.
        a_prop = jnp.full((n, n), 1.0 / n, f32)
    else:
        ri = jax.lax.broadcasted_iota(jnp.int32, (n, n), 0)
        ci = jax.lax.broadcasted_iota(jnp.int32, (n, n), 1)
        eye = jnp.where(ri == ci, jnp.float32(1.0), jnp.float32(0.0))
        noteye = 1.0 - eye
        # Squared pairwise distances (monotone in dist -> no sqrt needed).
        sq_row = jnp.sum(feat * feat, axis=1, keepdims=True)        # [n,1]
        sq_col = jnp.sum(sq_row * eye, axis=0, keepdims=True)       # [1,n]
        gram = jax.lax.dot_general(feat, feat, (((1,), (1,)), ((), ())),
                                   preferred_element_type=f32)      # [n,n]
        d2 = jnp.maximum(sq_row + sq_col - 2.0 * gram, 0.0)         # symmetric
        # (adaptive_k+1)-th smallest per row via a single min-extraction chain.
        big = jnp.float32(3.0e38)
        cur = d2
        thr = jnp.zeros((n, 1), f32)
        for _ in range(adaptive_k + 1):                              # static unroll
            thr = jnp.min(cur, axis=1, keepdims=True)
            cur = jnp.where(cur <= thr, big, cur)
        # d2 is symmetric -> column thresholds equal row thresholds; get the
        # [1,n] layout with an eye-mask reduce (off the serial chain).
        thr_c = jnp.sum(thr * eye, axis=0, keepdims=True)            # [1,n]
        one = jnp.float32(1.0)
        zero = jnp.float32(0.0)
        A_hat = jnp.where(d2 <= thr, one, zero) * noteye + eye       # A + I
        A_hat_T = jnp.where(d2 <= thr_c, one, zero) * noteye + eye   # (A + I)^T
        # PyG gcn_norm with in-degree: deg[t] = sum_s A_hat[s, t].
        deg_row = jnp.sum(A_hat_T, axis=1, keepdims=True)            # [n,1]
        deg_col = jnp.sum(A_hat, axis=0, keepdims=True)              # [1,n]
        a_prop = A_hat_T * jax.lax.rsqrt(deg_row) * jax.lax.rsqrt(deg_col)

    ap = a_prop.astype(bf16)   # 1/n is exact in bf16 at the shipped shapes

    # ---- 3x (GCNConv + folded BatchNorm), ReLU on the first two ----
    x = feat
    h = jnp.dot(x.astype(bf16), g1w_ref[...], preferred_element_type=f32)
    x = jnp.maximum(jnp.dot(ap, h.astype(bf16), preferred_element_type=f32) + g1b, 0.0)

    h = jnp.dot(x.astype(bf16), g2w_ref[...], preferred_element_type=f32)
    x = jnp.maximum(jnp.dot(ap, h.astype(bf16), preferred_element_type=f32) + g2b, 0.0)

    h = jnp.dot(x.astype(bf16), g3w_ref[...], preferred_element_type=f32)
    x3 = jnp.dot(ap, h.astype(bf16), preferred_element_type=f32) + g3b

    # ---- classifier: Linear -> ReLU -> (Dropout = id) -> Linear ----
    # concat([x3, feat]) @ W1  ==  x3 @ W1a + feat @ W1b   (W1 row-split)
    h1 = (jnp.dot(x3.astype(bf16), w1a_ref[...], preferred_element_type=f32)
          + jnp.dot(feat.astype(bf16), w1b_ref[...], preferred_element_type=f32)
          + b1)
    h1 = jnp.maximum(h1, 0.0)
    out_ref[...] = (jnp.dot(h1.astype(bf16), w2_ref[...], preferred_element_type=f32)
                    + b2)


# ============================ params & wrapper ==============================

def init_params(key):
    """Raw parameters mirroring the PyTorch module structure (random stub weights)."""
    ks = jax.random.split(key, 16)
    s = 0.02
    p = {}
    p["conv_w"] = s * jax.random.normal(ks[0], (K_PATCH, FEATURE_DIM), jnp.float32)
    p["conv_b"] = s * jax.random.normal(ks[1], (1, FEATURE_DIM), jnp.float32)
    p["cnn_bn_g"] = 1.0 + 0.1 * jax.random.normal(ks[2], (1, FEATURE_DIM), jnp.float32)
    p["cnn_bn_b"] = 0.1 * jax.random.normal(ks[3], (1, FEATURE_DIM), jnp.float32)

    dims = [(FEATURE_DIM, HIDDEN), (HIDDEN, HIDDEN), (HIDDEN, HIDDEN)]
    for i, (din, dout) in enumerate(dims, start=1):
        kk = jax.random.split(ks[3 + i], 4)
        p[f"gcn{i}_w"] = s * jax.random.normal(kk[0], (din, dout), jnp.float32)
        p[f"gcn{i}_b"] = s * jax.random.normal(kk[1], (1, dout), jnp.float32)
        p[f"bn{i}_g"] = 1.0 + 0.1 * jax.random.normal(kk[2], (1, dout), jnp.float32)
        p[f"bn{i}_b"] = 0.1 * jax.random.normal(kk[3], (1, dout), jnp.float32)

    dmid = HIDDEN // 2
    p["cls_w1"] = s * jax.random.normal(ks[8], (HIDDEN + FEATURE_DIM, dmid), jnp.float32)
    p["cls_b1"] = s * jax.random.normal(ks[9], (1, dmid), jnp.float32)
    p["cls_w2"] = s * jax.random.normal(ks[10], (dmid, NUM_CLASSES), jnp.float32)
    p["cls_b2"] = s * jax.random.normal(ks[11], (1, NUM_CLASSES), jnp.float32)
    return p


def prepare_params(p):
    """Fold eval-mode BN into weights/biases, build the packed conv weight, the
    coalesced bias bank, split cls_w1, and cast MXU operands to bf16.
    NOTE: BN folding assumes running_mean=0 / running_var=1 (fresh module)."""
    f32 = jnp.float32

    def bn_scale(gamma):  # running_var = 1, running_mean = 0
        return gamma * jax.lax.rsqrt(jnp.float32(1.0 + BN_EPS))

    # Block-diagonal conv weight: 2 output pixels per im2col row.
    wbd = jnp.zeros((2 * K_PATCH, 2 * FEATURE_DIM), f32)
    wbd = wbd.at[:K_PATCH, :FEATURE_DIM].set(p["conv_w"])
    wbd = wbd.at[K_PATCH:, FEATURE_DIM:].set(p["conv_w"])

    prep = {"conv_w": wbd.astype(jnp.bfloat16)}

    biases = [
        jnp.concatenate([p["conv_b"], p["conv_b"]], axis=1),   # 2*FEATURE_DIM
        bn_scale(p["cnn_bn_g"]),                               # FEATURE_DIM
        p["cnn_bn_b"],                                         # FEATURE_DIM
    ]
    for i in (1, 2, 3):
        s = bn_scale(p[f"bn{i}_g"])
        prep[f"g{i}w"] = (p[f"gcn{i}_w"] * s).astype(jnp.bfloat16)
        biases.append(p[f"gcn{i}_b"] * s + p[f"bn{i}_b"])      # HIDDEN each
    prep["w1a"] = p["cls_w1"][:HIDDEN].astype(jnp.bfloat16)
    prep["w1b"] = p["cls_w1"][HIDDEN:].astype(jnp.bfloat16)
    prep["w2"] = p["cls_w2"].astype(jnp.bfloat16)
    biases.append(p["cls_b1"])                                 # HIDDEN // 2
    b2_pad = jnp.zeros((1, 128), f32).at[:, :NUM_CLASSES].set(p["cls_b2"])
    biases.append(b2_pad)                                      # padded to 128
    prep["bias"] = jnp.concatenate(biases, axis=1).astype(f32)  # [1, 1536]
    return prep


def _im2col_packed(images):
    """[N, C, H, W] -> [N*H*W/2, 2*9*C] (two consecutive pixels per row)."""
    n, c, h, w = images.shape
    x = jnp.transpose(images, (0, 2, 3, 1))                       # NCHW -> NHWC
    xp = jnp.pad(x, ((0, 0), (1, 1), (1, 1), (0, 0)))
    pats = [xp[:, di:di + h, dj:dj + w, :] for di in range(3) for dj in range(3)]
    patches = jnp.concatenate(pats, axis=-1)                      # [N,H,W,9C]
    return patches.reshape(n * h * w // 2, 2 * 9 * c)


@jax.jit
def cnn_gnn_forward(images, prep):
    """images: [B, C, H, W] (one graph) or [G, B, C, H, W] (G independent graphs,
    iterated by the kernel grid with VMEM-resident weights)."""
    squeeze = images.ndim == 4
    if squeeze:
        images = images[None]
    g, b, c, h, w = images.shape
    hw = h * w
    adaptive_k = min(max(3, KNN_K), b - 1)        # static (from shapes)

    rows = b * hw // 2
    kpack = 2 * 9 * c
    patches = _im2col_packed(images.reshape(g * b, c, h, w))
    patches = patches.reshape(g, rows, kpack).astype(jnp.bfloat16)

    kernel = functools.partial(fused_model_kernel, adaptive_k=adaptive_k)

    def fixed(shape):  # weights: same block every grid step -> VMEM resident
        return pl.BlockSpec(tuple(shape), lambda gi: (0,) * len(shape))

    out = pl.pallas_call(
        kernel,
        out_shape=jax.ShapeDtypeStruct((g, b, NUM_CLASSES), jnp.float32),
        grid=(g,),
        in_specs=[
            pl.BlockSpec((None, rows, kpack), lambda gi: (gi, 0, 0)),  # patches
            fixed(prep["conv_w"].shape),
            fixed(prep["g1w"].shape),
            fixed(prep["g2w"].shape),
            fixed(prep["g3w"].shape),
            fixed(prep["w1a"].shape),
            fixed(prep["w1b"].shape),
            fixed(prep["w2"].shape),
            fixed(prep["bias"].shape),
        ],
        out_specs=pl.BlockSpec((None, b, NUM_CLASSES), lambda gi: (gi, 0, 0)),
        compiler_params=pltpu.CompilerParams(
            dimension_semantics=("parallel",)),
    )(patches, prep["conv_w"], prep["g1w"], prep["g2w"], prep["g3w"],
      prep["w1a"], prep["w1b"], prep["w2"], prep["bias"])

    return out[0] if squeeze else out


if __name__ == "__main__":
    key = jax.random.PRNGKey(0)
    k_img, k_par = jax.random.split(key)

    G = 2   # two independent graphs per call (amortized over the kernel grid)
    images = jax.random.normal(k_img, (G, B, C_IN, H, W), jnp.float32)  # NCHW
    params = init_params(k_par)
    prep = prepare_params(params)

    out = cnn_gnn_forward(images, prep)
    out = jax.block_until_ready(out)
    assert out.shape == (G, B, NUM_CLASSES), out.shape
    assert bool(jnp.all(jnp.isfinite(out)))
    print("KERNEL_OK")
</pallas_src>

<mosaic_0001>
module attributes {stable_mosaic.version = 11 : i64} {
  func.func @fused_model_kernel(%arg0: i32, %arg1: memref<1x1024x54xbf16, #tpu.memory_space<vmem>>, %arg2: memref<54x256xbf16, #tpu.memory_space<vmem>>, %arg3: memref<128x256xbf16, #tpu.memory_space<vmem>>, %arg4: memref<256x256xbf16, #tpu.memory_space<vmem>>, %arg5: memref<256x256xbf16, #tpu.memory_space<vmem>>, %arg6: memref<256x128xbf16, #tpu.memory_space<vmem>>, %arg7: memref<128x128xbf16, #tpu.memory_space<vmem>>, %arg8: memref<128x8xbf16, #tpu.memory_space<vmem>>, %arg9: memref<1x1536xf32, #tpu.memory_space<vmem>>, %arg10: memref<1x8x8xf32, #tpu.memory_space<vmem>>) attributes {dimension_semantics = [#tpu.dimension_semantics<parallel>], iteration_bounds = array<i64: 2>, scalar_prefetch = 0 : i64, scratch_operands = 0 : i64, tpu.core_type = #tpu.core_type<tc>, window_params = [{transform_indices = @transform_0, window_bounds = array<i64: 1, 1024, 54>}, {pipeline_mode = #tpu.pipeline_mode<synchronous>, transform_indices = @transform_1, window_bounds = array<i64: 54, 256>}, {pipeline_mode = #tpu.pipeline_mode<synchronous>, transform_indices = @transform_2, window_bounds = array<i64: 128, 256>}, {pipeline_mode = #tpu.pipeline_mode<synchronous>, transform_indices = @transform_3, window_bounds = array<i64: 256, 256>}, {pipeline_mode = #tpu.pipeline_mode<synchronous>, transform_indices = @transform_4, window_bounds = array<i64: 256, 256>}, {pipeline_mode = #tpu.pipeline_mode<synchronous>, transform_indices = @transform_5, window_bounds = array<i64: 256, 128>}, {pipeline_mode = #tpu.pipeline_mode<synchronous>, transform_indices = @transform_6, window_bounds = array<i64: 128, 128>}, {pipeline_mode = #tpu.pipeline_mode<synchronous>, transform_indices = @transform_7, window_bounds = array<i64: 128, 8>}, {pipeline_mode = #tpu.pipeline_mode<synchronous>, transform_indices = @transform_8, window_bounds = array<i64: 1, 1536>}, {transform_indices = @transform_9, window_bounds = array<i64: 1, 8, 8>}]} {
    %c0 = arith.constant 0 : index
    %c0_0 = arith.constant 0 : index
    %0 = vector.load %arg9[%c0, %c0_0] : memref<1x1536xf32, #tpu.memory_space<vmem>>, vector<1x256xf32>
    %c0_1 = arith.constant 0 : index
    %c256 = arith.constant 256 : index
    %1 = vector.load %arg9[%c0_1, %c256] : memref<1x1536xf32, #tpu.memory_space<vmem>>, vector<1x128xf32>
    %c0_2 = arith.constant 0 : index
    %c384 = arith.constant 384 : index
    %2 = vector.load %arg9[%c0_2, %c384] : memref<1x1536xf32, #tpu.memory_space<vmem>>, vector<1x128xf32>
    %c0_3 = arith.constant 0 : index
    %c512 = arith.constant 512 : index
    %3 = vector.load %arg9[%c0_3, %c512] : memref<1x1536xf32, #tpu.memory_space<vmem>>, vector<1x256xf32>
    %c0_4 = arith.constant 0 : index
    %c768 = arith.constant 768 : index
    %4 = vector.load %arg9[%c0_4, %c768] : memref<1x1536xf32, #tpu.memory_space<vmem>>, vector<1x256xf32>
    %c0_5 = arith.constant 0 : index
    %c1024 = arith.constant 1024 : index
    %5 = vector.load %arg9[%c0_5, %c1024] : memref<1x1536xf32, #tpu.memory_space<vmem>>, vector<1x256xf32>
    %c0_6 = arith.constant 0 : index
    %c1280 = arith.constant 1280 : index
    %6 = vector.load %arg9[%c0_6, %c1280] : memref<1x1536xf32, #tpu.memory_space<vmem>>, vector<1x128xf32>
    %c0_7 = arith.constant 0 : index
    %c1408 = arith.constant 1408 : index
    %7 = vector.load %arg9[%c0_7, %c1408] : memref<1x1536xf32, #tpu.memory_space<vmem>>, vector<1x8xf32>
    %c0_8 = arith.constant 0 : index
    %c0_9 = arith.constant 0 : index
    %c0_10 = arith.constant 0 : index
    %8 = vector.load %arg1[%c0_8, %c0_9, %c0_10] : memref<1x1024x54xbf16, #tpu.memory_space<vmem>>, vector<1x1024x54xbf16>
    %9 = vector.shape_cast %8 : vector<1x1024x54xbf16> to vector<1024x54xbf16>
    %c0_11 = arith.constant 0 : index
    %c0_12 = arith.constant 0 : index
    %10 = vector.load %arg2[%c0_11, %c0_12] : memref<54x256xbf16, #tpu.memory_space<vmem>>, vector<54x256xbf16>
    %cst = arith.constant dense<0.000000e+00> : vector<1024x256xf32>
    %11 = tpu.matmul %9, %10, %cst {dimension_numbers = #tpu.dot_dimension_numbers<[1], [0], [0], [1], [0, 0, 1, 1], [], []>} : vector<1024x54xbf16>, vector<54x256xbf16>, vector<1024x256xf32> -> vector<1024x256xf32>
    %12 = vector.broadcast %0 : vector<1x256xf32> to vector<1024x256xf32>
    %13 = arith.addf %11, %12 : vector<1024x256xf32>
    %cst_13 = arith.constant 0.000000e+00 : f32
    %14 = vector.broadcast %cst_13 : f32 to vector<1024x256xf32>
    %15 = arith.maximumf %13, %14 : vector<1024x256xf32>
    %16 = vector.shape_cast %15 : vector<1024x256xf32> to vector<8x128x256xf32>
    %cst_14 = arith.constant dense<0.000000e+00> : vector<8x256xf32>
    %17 = vector.multi_reduction <add>, %16, %cst_14 [1] : vector<8x128x256xf32> to vector<8x256xf32>
    %18 = vector.extract_strided_slice %17 {offsets = [0, 0], sizes = [8, 128], strides = [1, 1]} : vector<8x256xf32> to vector<8x128xf32>
    %19 = vector.extract_strided_slice %17 {offsets = [0, 128], sizes = [8, 128], strides = [1, 1]} : vector<8x256xf32> to vector<8x128xf32>
    %20 = arith.addf %18, %19 : vector<8x128xf32>
    %cst_15 = arith.constant 3.906250e-03 : f32
    %21 = vector.broadcast %cst_15 : f32 to vector<8x128xf32>
    %22 = arith.mulf %20, %21 : vector<8x128xf32>
    %23 = vector.broadcast %1 : vector<1x128xf32> to vector<8x128xf32>
    %24 = arith.mulf %22, %23 : vector<8x128xf32>
    %25 = vector.broadcast %2 : vector<1x128xf32> to vector<8x128xf32>
    %26 = arith.addf %24, %25 : vector<8x128xf32>
    %cst_16 = arith.constant 1.250000e-01 : f32
    %27 = vector.broadcast %cst_16 : f32 to vector<8x8xf32>
    %28 = arith.truncf %27 : vector<8x8xf32> to vector<8x8xbf16>
    %29 = arith.truncf %26 : vector<8x128xf32> to vector<8x128xbf16>
    %c0_17 = arith.constant 0 : index
    %c0_18 = arith.constant 0 : index
    %30 = vector.load %arg3[%c0_17, %c0_18] : memref<128x256xbf16, #tpu.memory_space<vmem>>, vector<128x256xbf16>
    %cst_19 = arith.constant dense<0.000000e+00> : vector<8x256xf32>
    %31 = tpu.matmul %29, %30, %cst_19 {dimension_numbers = #tpu.dot_dimension_numbers<[1], [0], [0], [1], [0, 0, 1, 1], [], []>} : vector<8x128xbf16>, vector<128x256xbf16>, vector<8x256xf32> -> vector<8x256xf32>
    %32 = arith.truncf %31 : vector<8x256xf32> to vector<8x256xbf16>
    %cst_20 = arith.constant dense<0.000000e+00> : vector<8x256xf32>
    %33 = tpu.matmul %28, %32, %cst_20 {dimension_numbers = #tpu.dot_dimension_numbers<[1], [0], [0], [1], [0, 0, 1, 1], [], []>} : vector<8x8xbf16>, vector<8x256xbf16>, vector<8x256xf32> -> vector<8x256xf32>
    %34 = vector.broadcast %3 : vector<1x256xf32> to vector<8x256xf32>
    %35 = arith.addf %33, %34 : vector<8x256xf32>
    %cst_21 = arith.constant 0.000000e+00 : f32
    %36 = vector.broadcast %cst_21 : f32 to vector<8x256xf32>
    %37 = arith.maximumf %35, %36 : vector<8x256xf32>
    %38 = arith.truncf %37 : vector<8x256xf32> to vector<8x256xbf16>
    %c0_22 = arith.constant 0 : index
    %c0_23 = arith.constant 0 : index
    %39 = vector.load %arg4[%c0_22, %c0_23] : memref<256x256xbf16, #tpu.memory_space<vmem>>, vector<256x256xbf16>
    %cst_24 = arith.constant dense<0.000000e+00> : vector<8x256xf32>
    %40 = tpu.matmul %38, %39, %cst_24 {dimension_numbers = #tpu.dot_dimension_numbers<[1], [0], [0], [1], [0, 0, 1, 1], [], []>} : vector<8x256xbf16>, vector<256x256xbf16>, vector<8x256xf32> -> vector<8x256xf32>
    %41 = arith.truncf %40 : vector<8x256xf32> to vector<8x256xbf16>
    %cst_25 = arith.constant dense<0.000000e+00> : vector<8x256xf32>
    %42 = tpu.matmul %28, %41, %cst_25 {dimension_numbers = #tpu.dot_dimension_numbers<[1], [0], [0], [1], [0, 0, 1, 1], [], []>} : vector<8x8xbf16>, vector<8x256xbf16>, vector<8x256xf32> -> vector<8x256xf32>
    %43 = vector.broadcast %4 : vector<1x256xf32> to vector<8x256xf32>
    %44 = arith.addf %42, %43 : vector<8x256xf32>
    %cst_26 = arith.constant 0.000000e+00 : f32
    %45 = vector.broadcast %cst_26 : f32 to vector<8x256xf32>
    %46 = arith.maximumf %44, %45 : vector<8x256xf32>
    %47 = arith.truncf %46 : vector<8x256xf32> to vector<8x256xbf16>
    %c0_27 = arith.constant 0 : index
    %c0_28 = arith.constant 0 : index
    %48 = vector.load %arg5[%c0_27, %c0_28] : memref<256x256xbf16, #tpu.memory_space<vmem>>, vector<256x256xbf16>
    %cst_29 = arith.constant dense<0.000000e+00> : vector<8x256xf32>
    %49 = tpu.matmul %47, %48, %cst_29 {dimension_numbers = #tpu.dot_dimension_numbers<[1], [0], [0], [1], [0, 0, 1, 1], [], []>} : vector<8x256xbf16>, vector<256x256xbf16>, vector<8x256xf32> -> vector<8x256xf32>
    %50 = arith.truncf %49 : vector<8x256xf32> to vector<8x256xbf16>
    %cst_30 = arith.constant dense<0.000000e+00> : vector<8x256xf32>
    %51 = tpu.matmul %28, %50, %cst_30 {dimension_numbers = #tpu.dot_dimension_numbers<[1], [0], [0], [1], [0, 0, 1, 1], [], []>} : vector<8x8xbf16>, vector<8x256xbf16>, vector<8x256xf32> -> vector<8x256xf32>
    %52 = vector.broadcast %5 : vector<1x256xf32> to vector<8x256xf32>
    %53 = arith.addf %51, %52 : vector<8x256xf32>
    %54 = arith.truncf %53 : vector<8x256xf32> to vector<8x256xbf16>
    %c0_31 = arith.constant 0 : index
    %c0_32 = arith.constant 0 : index
    %55 = vector.load %arg6[%c0_31, %c0_32] : memref<256x128xbf16, #tpu.memory_space<vmem>>, vector<256x128xbf16>
    %cst_33 = arith.constant dense<0.000000e+00> : vector<8x128xf32>
    %56 = tpu.matmul %54, %55, %cst_33 {dimension_numbers = #tpu.dot_dimension_numbers<[1], [0], [0], [1], [0, 0, 1, 1], [], []>} : vector<8x256xbf16>, vector<256x128xbf16>, vector<8x128xf32> -> vector<8x128xf32>
    %57 = arith.truncf %26 : vector<8x128xf32> to vector<8x128xbf16>
    %c0_34 = arith.constant 0 : index
    %c0_35 = arith.constant 0 : index
    %58 = vector.load %arg7[%c0_34, %c0_35] : memref<128x128xbf16, #tpu.memory_space<vmem>>, vector<128x128xbf16>
    %cst_36 = arith.constant dense<0.000000e+00> : vector<8x128xf32>
    %59 = tpu.matmul %57, %58, %cst_36 {dimension_numbers = #tpu.dot_dimension_numbers<[1], [0], [0], [1], [0, 0, 1, 1], [], []>} : vector<8x128xbf16>, vector<128x128xbf16>, vector<8x128xf32> -> vector<8x128xf32>
    %60 = arith.addf %56, %59 : vector<8x128xf32>
    %61 = vector.broadcast %6 : vector<1x128xf32> to vector<8x128xf32>
    %62 = arith.addf %60, %61 : vector<8x128xf32>
    %cst_37 = arith.constant 0.000000e+00 : f32
    %63 = vector.broadcast %cst_37 : f32 to vector<8x128xf32>
    %64 = arith.maximumf %62, %63 : vector<8x128xf32>
    %65 = arith.truncf %64 : vector<8x128xf32> to vector<8x128xbf16>
    %c0_38 = arith.constant 0 : index
    %c0_39 = arith.constant 0 : index
    %66 = vector.load %arg8[%c0_38, %c0_39] : memref<128x8xbf16, #tpu.memory_space<vmem>>, vector<128x8xbf16>
    %cst_40 = arith.constant dense<0.000000e+00> : vector<8x8xf32>
    %67 = tpu.matmul %65, %66, %cst_40 {dimension_numbers = #tpu.dot_dimension_numbers<[1], [0], [0], [1], [0, 0, 1, 1], [], []>} : vector<8x128xbf16>, vector<128x8xbf16>, vector<8x8xf32> -> vector<8x8xf32>
    %68 = vector.broadcast %7 : vector<1x8xf32> to vector<8x8xf32>
    %69 = arith.addf %67, %68 : vector<8x8xf32>
    %c0_41 = arith.constant 0 : index
    %c0_42 = arith.constant 0 : index
    %c0_43 = arith.constant 0 : index
    %70 = vector.load %arg10[%c0_41, %c0_42, %c0_43] : memref<1x8x8xf32, #tpu.memory_space<vmem>>, vector<1x8x8xf32>
    %71 = vector.shape_cast %70 : vector<1x8x8xf32> to vector<8x8xf32>
    %72 = vector.shape_cast %69 : vector<8x8xf32> to vector<1x8x8xf32>
    tpu.vector_store %arg10[%c0_41, %c0_42, %c0_43], %72 {strides = array<i32>} : memref<1x8x8xf32, #tpu.memory_space<vmem>>, vector<1x8x8xf32>,
    return
  }
  func.func @transform_0(%arg0: i32) -> (i32, i32, i32) {
    %c0_i32 = arith.constant 0 : i32
    %c0_i32_0 = arith.constant 0 : i32
    %c0_i32_1 = arith.constant 0 : i32
    return %arg0, %c0_i32, %c0_i32_0 : i32, i32, i32
  }
  func.func @transform_1(%arg0: i32) -> (i32, i32) {
    %c0_i32 = arith.constant 0 : i32
    %c0_i32_0 = arith.constant 0 : i32
    %c0_i32_1 = arith.constant 0 : i32
    return %c0_i32, %c0_i32_0 : i32, i32
  }
  func.func @transform_2(%arg0: i32) -> (i32, i32) {
    %c0_i32 = arith.constant 0 : i32
    %c0_i32_0 = arith.constant 0 : i32
    %c0_i32_1 = arith.constant 0 : i32
    return %c0_i32, %c0_i32_0 : i32, i32
  }
  func.func @transform_3(%arg0: i32) -> (i32, i32) {
    %c0_i32 = arith.constant 0 : i32
    %c0_i32_0 = arith.constant 0 : i32
    %c0_i32_1 = arith.constant 0 : i32
    return %c0_i32, %c0_i32_0 : i32, i32
  }
  func.func @transform_4(%arg0: i32) -> (i32, i32) {
    %c0_i32 = arith.constant 0 : i32
    %c0_i32_0 = arith.constant 0 : i32
    %c0_i32_1 = arith.constant 0 : i32
    return %c0_i32, %c0_i32_0 : i32, i32
  }
  func.func @transform_5(%arg0: i32) -> (i32, i32) {
    %c0_i32 = arith.constant 0 : i32
    %c0_i32_0 = arith.constant 0 : i32
    %c0_i32_1 = arith.constant 0 : i32
    return %c0_i32, %c0_i32_0 : i32, i32
  }
  func.func @transform_6(%arg0: i32) -> (i32, i32) {
    %c0_i32 = arith.constant 0 : i32
    %c0_i32_0 = arith.constant 0 : i32
    %c0_i32_1 = arith.constant 0 : i32
    return %c0_i32, %c0_i32_0 : i32, i32
  }
  func.func @transform_7(%arg0: i32) -> (i32, i32) {
    %c0_i32 = arith.constant 0 : i32
    %c0_i32_0 = arith.constant 0 : i32
    %c0_i32_1 = arith.constant 0 : i32
    return %c0_i32, %c0_i32_0 : i32, i32
  }
  func.func @transform_8(%arg0: i32) -> (i32, i32) {
    %c0_i32 = arith.constant 0 : i32
    %c0_i32_0 = arith.constant 0 : i32
    %c0_i32_1 = arith.constant 0 : i32
    return %c0_i32, %c0_i32_0 : i32, i32
  }
  func.func @transform_9(%arg0: i32) -> (i32, i32, i32) {
    %c0_i32 = arith.constant 0 : i32
    %c0_i32_0 = arith.constant 0 : i32
    %c0_i32_1 = arith.constant 0 : i32
    return %arg0, %c0_i32, %c0_i32_0 : i32, i32, i32
  }
}

</mosaic_0001>

<bundles_post_ra>
// kernel: cnn_gnn_forward.1
= control target key start
LH: loop header
LB: loop body
LE: loop exit
PB: predicated region body
PF: predicated region fallthrough
CT: control target
= control target key end

     0   :  { %14 = vsyncpa [#allocation3], 0  ;;  %s5547_s0 = inlined_call_operand.vmem [shape: bf16[2,1024,54], index: 0, kind: input, shape index: {}]   ;;  %s5548_s1 = inlined_call_operand.vmem [shape: bf16[54,256], index: 1, kind: input, shape index: {}]   ;;  %s5549_s2 = inlined_call_operand.vmem [shape: bf16[128,256], index: 2, kind: input, shape index: {}]   ;;  %s5550_s3 = inlined_call_operand.vmem [shape: bf16[256,256], index: 3, kind: input, shape index: {}]   ;;  %s5551_s4 = inlined_call_operand.vmem [shape: bf16[256,256], index: 4, kind: input, shape index: {}]   ;;  %s5552_s5 = inlined_call_operand.vmem [shape: bf16[256,128], index: 5, kind: input, shape index: {}]   ;;  %s5553_s6 = inlined_call_operand.vmem [shape: bf16[128,128], index: 6, kind: input, shape index: {}]   ;;  %s5554_s7 = inlined_call_operand.vmem [shape: bf16[128,8], index: 7, kind: input, shape index: {}]   ;;  %s5555_s8 = inlined_call_operand.vmem [shape: f32[1,1536], index: 8, kind: input, shape index: {}]   ;;  %s5556_s9 = inlined_call_operand.hbm [shape: f32[2,8,8], index: 9, kind: output, shape index: {}]  }
   0x1   :  { %16 = vsyncpa [#allocation3 + $0x1], 0  ;;  %s4409_s30 = smov 0   ;;  %s4411_s10 = smov 0  }
   0x2   :  { %s4413_s11 = smov 0   ;;  %s4415_s12 = smov 0  }
   0x3 LB: > { %s4430_s13 = sadd.s32 4294967295, %s4352_s12   ;;  %s3661_s14 = sadd.s32 4294967294, %s4352_s12   ;;  %s4352_s12 = sphi %s4415_s12, %s5562_s12   ;;  %s4348_s11 = sphi %s4413_s11, %s5561_s11   ;;  %s4344_s10 = sphi %s4411_s10, %s5560_s10   ;;  %s4340_s30 = sphi %s4409_s30, %s5559_s30  }
   0x4   : > { %s4434_s15 = sadd.s32 1, %s4352_s12   ;;  %s223_s16 = sadd.s32 1, %s4348_s11 }
   0x5   : > { %s220_s17 = ssub.s32 %s4352_s12, %s4434_s15  ;;  %p233_p0 = scmp.ne.s32.totalorder %s4348_s11, %s4344_s10 }
   0x6   : > { %p221_p1 = scmp.eq.s32.totalorder %s220_s17, 0  ;;  %p234_p2 = scmp.eq.s32.totalorder %s4430_s13, 1 }
   0x7   : > { %p239_p3 = scmp.ne.s32.totalorder %s4344_s10, %s4340_s30  ;;  %p240_p4 = scmp.eq.s32.totalorder %s3661_s14, 1 }
   0x8   : > { %s4445_s18 = scalar_select %p221_p1, %s4348_s11, %s223_s16  }
   0x9   : > { %p4447_p5 = por %p234_p2, %p233_p0  ;;  %p4451_p6 = por %p240_p4, %p239_p3 }
   0xa   : > { %p3664_p7 = scmp.ge.s32.totalorder %s4352_s12, 1  ;;  %p290_p8 = scmp.lt.s32.totalorder %s4352_s12, 3 }
   0xc   : > { %p291_p9 = pnand %p3664_p7, %p290_p8 }
   0xd   : > { %p326_p10 = scmp.lt.s32.totalorder (!%p291_p9), %s4430_s13, 1  ;;  %s3928_s23 = sshll.u32 (!%p291_p9), %s4430_s13, 7 }
   0xe   : > { %294 = sbr.rel (%p291_p9) target bundleno = 2271 (0x8df), region = 56  ;;  %s4358_s29 = smov (!%p291_p9), [#allocation2]  }
  0x13   : > { %v475_v0 = vld [vmem:[%s5548_s1 + $0x30] sm:$0x77]  ;;  %vm1035_vm0 = vcmask 1042432   ;;  %v4065_v3 = vld [vmem:[%s5548_s1 + $0x24] ss:$8 sps:$4 sm:$0xff]   ;;  %v4354_v4 = vmov 0   ;;  %v477_v46 = vlaneseq }
  0x14   : > { %v3739_v1 = vcombine.high %v475_v0, %v475_v0  ;;  %v3738_v2 = vcombine.low %v475_v0, %v475_v0  ;;  %1074 = vmatprep.mubr.bf16.mxu0 %v4354_v4  ;;  %1554 = vmatprep.mubr.bf16.mxu1 %v4354_v4  ;;  %v4067_v6 = vld [vmem:[%s5548_s1 + $0x20] ss:$8 sps:$4 sm:$0xff]   ;;  %s327_s27 = scalar_select %p326_p10, %s4430_s13, 1  ;;  %v4068_v7 = vld [vmem:[%s5548_s1 + $0x14] ss:$8 sps:$4 sm:$0xff]   ;;  %vm842_vm1 = vcmask 441344  }
  0x15   : > { %v4070_v8 = vld [vmem:[%s5548_s1 + $0x10] ss:$8 sps:$4 sm:$0xff]   ;;  %v4071_v9 = vld [vmem:[%s5548_s1 + $0x4] ss:$8 sps:$4 sm:$0xff]   ;;  %v4073_v10 = vld [vmem:[%s5548_s1] ss:$8 sps:$4 sm:$0xff]  }
  0x16   : > { %3740 = vmatprep.subr.msk.bf16.mxu0 %vm1035_vm0, %v3739_v1  ;;  %v1037_v5 = vsel %vm1035_vm0, %v3738_v2, 0  ;;  %4012 = vmatprep.subr.msk.bf16.mxu1 %vm1035_vm0, %v3739_v1  ;;  %s3931_s14 = sshll.u32 %s327_s27, 9  ;;  %v478_v48 = vshrl.u32 %v477_v46, 7  ;;  %v333_v51 = vld [vmem:[%s5555_s8] sm:$0x3]  ;;  %vm2392_vm2 = vcmask 1041409   ;;  %s5505_s27 = scalar_lea.hbm %s5556_s9, %s3928_s23 }
  0x17   : > { %1051 = vmatpush1.bf16.msra.mxu0 %v1037_v5  ;;  %4016 = vmatpush1.bf16.msra.mxu1 %v1037_v5  ;;  %s4476_s21 = scalar_lea.vmem %s5547_s0, %s3931_s14  ;;  %vm2395_vm3 = vcmask 1042434   ;;  %vm2398_vm4 = vcmask 1043459   ;;  %vm2401_vm5 = vcmask 1044484   ;;  %vm2404_vm6 = vcmask 1045509   ;;  %s323_s14 = sand.u32 1, %s4344_s10  }
  0x18   : > { %1052 = vmatprep.subr.bf16.mxu0 %v4065_v3  ;;  %4013 = vmatprep.subr.bf16.mxu1 %v4065_v3  ;;  %v4074_v11 = vld [vmem:[%s4476_s21] sm:$0xff]   ;;  %v4075_v12 = vld [vmem:[%s4476_s21 + $0x8] sm:$0xff]   ;;  %v4076_v13 = vld [vmem:[%s4476_s21 + $0x10] sm:$0xff]   ;;  %v4596_v50 = vsub.s32 0, %v478_v48  ;;  %v4604_v53 = vsub.s32 1, %v478_v48  ;;  %vm2407_vm7 = vcmask 1046534  }
  0x19   : > { %v4077_v14 = vld [vmem:[%s4476_s21 + $0x18] sm:$0xff]   ;;  %v4078_v15 = vld [vmem:[%s4476_s21 + $0x20] sm:$0xff]   ;;  %v4079_v16 = vld [vmem:[%s4476_s21 + $0x28] sm:$0xff]   ;;  %vm2410_vm8 = vcmask 1047559   ;;  %vm2552_vm9 = vcmask 1043456   ;;  %vm2548_vm10 = vcmask 64512  }
  0x1a   : > { %v4080_v17 = vld [vmem:[%s4476_s21 + $0x30] sm:$0xff]   ;;  %v4081_v18 = vld [vmem:[%s4476_s21 + $0x38] sm:$0xff]   ;;  %v4082_v19 = vld [vmem:[%s4476_s21 + $0x40] sm:$0xff]   ;;  %v4607_v54 = vrot.slane %v333_v51, %v4596_v50  ;;  %v4611_v56 = vrot.slane %v333_v51, %v4604_v53  ;;  %vm4357_vm11 = vmmov 0   ;;  %s3665_s16 = sshll.u32 %s323_s14, 3  ;;  %s3589_s28 = scalar_lea.sflag [#allocation3], %s323_s14 }
  0x1b   : > { %1053 = vmatpush1.bf16.msra.mxu0 %v4067_v6  ;;  %4017 = vmatpush1.bf16.msra.mxu1 %v4067_v6  ;;  %v4083_v20 = vld [vmem:[%s4476_s21 + $0x48] sm:$0xff]   ;;  %v4084_v21 = vld [vmem:[%s4476_s21 + $0x50] sm:$0xff]   ;;  %v4085_v22 = vld [vmem:[%s4476_s21 + $0x58] sm:$0xff]   ;;  %s325_s24 = scalar_lea.vmem [#allocation2], %s3665_s16  ;;  %s4296_s16 = sshll.u32 %s4358_s29, 4  ;;  %s4297_s16 = int_to_ptr.vmem [resolvable:$false] %s4296_s16 }
  0x1c   : > { %1054 = vmatprep.subr.bf16.mxu0 %v4068_v7  ;;  %4014 = vmatprep.subr.bf16.mxu1 %v4068_v7  ;;  %v4102_v23 = vld [vmem:[%s4476_s21 + $0x180] sm:$0xff]   ;;  %v4104_v25 = vld [vmem:[%s4476_s21 + $0x188] sm:$0xff]   ;;  %v4106_v27 = vld [vmem:[%s4476_s21 + $0x190] sm:$0xff]   ;;  %s3602_s25 = sshll.u32 %s325_s24, 4  ;;  %s4298_s17 = scalar_lea.vmem %s4297_s16, 256  ;;  %s5507_s25 = int_to_ptr.vmem [resolvable:$true] %s3602_s25 }
  0x1d   : > { %v4086_v24 = vld [vmem:[%s4476_s21 + $0x60] sm:$0xff]   ;;  %v4087_v26 = vld [vmem:[%s4476_s21 + $0x68] sm:$0xff]   ;;  %v4088_v28 = vld [vmem:[%s4476_s21 + $0x70] sm:$0xff]   ;;  %s4292_s13 = scalar_lea.vmem %s5507_s25, 128  ;;  %p4299_p0 = scmp.lt.s32.totalorder %s5507_s25, %s4297_s16 }
  0x1e   : > { %v4108_v29 = vld [vmem:[%s4476_s21 + $0x198] sm:$0xff]   ;;  %v4110_v31 = vld [vmem:[%s4476_s21 + $0x1a0] sm:$0xff]   ;;  %v4112_v33 = vld [vmem:[%s4476_s21 + $0x1a8] sm:$0xff]   ;;  %p4293_p11 = scmp.ne.s32.totalorder %s5507_s25, %s4292_s13  ;;  %p4300_p1 = scmp.lt.s32.totalorder %s4298_s17, %s4292_s13 }
  0x1f   : > { %1055 = vmatpush1.bf16.msra.mxu0 %v4070_v8  ;;  %4018 = vmatpush1.bf16.msra.mxu1 %v4070_v8  ;;  %v4089_v30 = vld [vmem:[%s4476_s21 + $0x78] sm:$0xff]   ;;  %v4090_v32 = vld [vmem:[%s4476_s21 + $0x80] sm:$0xff]   ;;  %v4091_v34 = vld [vmem:[%s4476_s21 + $0x88] sm:$0xff]  }
  0x20   : > { %1056 = vmatprep.subr.bf16.mxu0 %v4071_v9  ;;  %4015 = vmatprep.subr.bf16.mxu1 %v4071_v9  ;;  %v4114_v35 = vld [vmem:[%s4476_s21 + $0x1b0] sm:$0xff]   ;;  %v4116_v37 = vld [vmem:[%s4476_s21 + $0x1b8] sm:$0xff]   ;;  %v4118_v39 = vld [vmem:[%s4476_s21 + $0x1c0] sm:$0xff]   ;;  %p4294_p12 = pnand %p4293_p11, %p4447_p5  ;;  %p4301_p2 = por %p4300_p1, %p4299_p0 }
  0x21   : > { %v4092_v36 = vld [vmem:[%s4476_s21 + $0x90] sm:$0xff]   ;;  %v4093_v38 = vld [vmem:[%s4476_s21 + $0x98] sm:$0xff]   ;;  %v4094_v40 = vld [vmem:[%s4476_s21 + $0xa0] sm:$0xff]  }
  0x22   : > { %v4120_v41 = vld [vmem:[%s4476_s21 + $0x1c8] sm:$0xff]   ;;  %v4122_v43 = vld [vmem:[%s4476_s21 + $0x1d0] sm:$0xff]   ;;  %v4124_v45 = vld [vmem:[%s4476_s21 + $0x1d8] sm:$0xff]   ;;  %p4295_p13 = pneg %p4294_p12 }
  0x23   : > { %1057 = vmatpush1.bf16.msra.mxu0 %v4073_v10  ;;  %4019 = vmatpush1.bf16.msra.mxu1 %v4073_v10  ;;  %v4095_v42 = vld [vmem:[%s4476_s21 + $0xa8] sm:$0xff]   ;;  %v4096_v44 = vld [vmem:[%s4476_s21 + $0xb0] sm:$0xff]   ;;  %v4097_v47 = vld [vmem:[%s4476_s21 + $0xb8] sm:$0xff]  }
  0x24   : > { %v4126_v49 = vld [vmem:[%s4476_s21 + $0x1e0] sm:$0xff]   ;;  %v4128_v57 = vld [vmem:[%s4476_s21 + $0x1e8] sm:$0xff]   ;;  %v4130_v10 = vld [vmem:[%s4476_s21 + $0x1f0] sm:$0xff]   ;;  %p4302_p3 = pnand %p4301_p2, %p4295_p13 }
  0x25   : > { %v4098_v52 = vld [vmem:[%s4476_s21 + $0xc0] sm:$0xff]   ;;  %v4099_v61 = vld [vmem:[%s4476_s21 + $0xc8] sm:$0xff]  }
  0x26   : > { %3741 = vmatmul.mubr.msk.bf16.vlgmr.msra.gmra.mxu0 %vm842_vm1, %v4074_v11  ;;  %3789 = vmatmul.mubr.msk.bf16.vlgmr.msra.gmra.mxu1 %vm842_vm1, %v4102_v23 }
  0x27   : > { %1084 = vmatprep.mubr.bf16.mxu0 %v4354_v4  ;;  %1564 = vmatprep.mubr.bf16.mxu1 %v4354_v4 }
  0x2e   : > { %3742 = vmatmul.mubr.msk.bf16.gmra.mxu0 %vm842_vm1, %v4075_v12  ;;  %3790 = vmatmul.mubr.msk.bf16.gmra.mxu1 %vm842_vm1, %v4104_v25 }
  0x2f   : > { %1094 = vmatprep.mubr.bf16.mxu0 %v4354_v4  ;;  %1574 = vmatprep.mubr.bf16.mxu1 %v4354_v4 }
  0x36   : > { %3743 = vmatmul.mubr.msk.bf16.gmra.mxu0 %vm842_vm1, %v4076_v13  ;;  %3791 = vmatmul.mubr.msk.bf16.gmra.mxu1 %vm842_vm1, %v4106_v27 }
  0x37   : > { %1104 = vmatprep.mubr.bf16.mxu0 %v4354_v4  ;;  %1584 = vmatprep.mubr.bf16.mxu1 %v4354_v4 }
  0x3e   : > { %3744 = vmatmul.mubr.msk.bf16.gmra.mxu0 %vm842_vm1, %v4077_v14  ;;  %3792 = vmatmul.mubr.msk.bf16.gmra.mxu1 %vm842_vm1, %v4108_v29 }
  0x3f   : > { %1114 = vmatprep.mubr.bf16.mxu0 %v4354_v4  ;;  %1594 = vmatprep.mubr.bf16.mxu1 %v4354_v4 }
  0x46   : > { %3745 = vmatmul.mubr.msk.bf16.gmra.mxu0 %vm842_vm1, %v4078_v15  ;;  %3793 = vmatmul.mubr.msk.bf16.gmra.mxu1 %vm842_vm1, %v4110_v31 }
  0x47   : > { %1124 = vmatprep.mubr.bf16.mxu0 %v4354_v4  ;;  %1604 = vmatprep.mubr.bf16.mxu1 %v4354_v4 }
  0x4e   : > { %3746 = vmatmul.mubr.msk.bf16.gmra.mxu0 %vm842_vm1, %v4079_v16  ;;  %3794 = vmatmul.mubr.msk.bf16.gmra.mxu1 %vm842_vm1, %v4112_v33  ;;  %v4100_v16 = vld [vmem:[%s4476_s21 + $0xd0] sm:$0xff]  }
  0x4f   : > { %1134 = vmatprep.mubr.bf16.mxu0 %v4354_v4  ;;  %1614 = vmatprep.mubr.bf16.mxu1 %v4354_v4 }
  0x56   : > { %3747 = vmatmul.mubr.msk.bf16.gmra.mxu0 %vm842_vm1, %v4080_v17  ;;  %3795 = vmatmul.mubr.msk.bf16.gmra.mxu1 %vm842_vm1, %v4114_v35 }
  0x57   : > { %1144 = vmatprep.mubr.bf16.mxu0 %v4354_v4  ;;  %1624 = vmatprep.mubr.bf16.mxu1 %v4354_v4 }
  0x5e   : > { %3748 = vmatmul.mubr.msk.bf16.gmra.mxu0 %vm842_vm1, %v4081_v18  ;;  %3796 = vmatmul.mubr.msk.bf16.gmra.mxu1 %vm842_vm1, %v4116_v37 }
  0x5f   : > { %1154 = vmatprep.mubr.bf16.mxu0 %v4354_v4  ;;  %1634 = vmatprep.mubr.bf16.mxu1 %v4354_v4 }
  0x66   : > { %3749 = vmatmul.mubr.msk.bf16.gmra.mxu0 %vm842_vm1, %v4082_v19  ;;  %3797 = vmatmul.mubr.msk.bf16.gmra.mxu1 %vm842_vm1, %v4118_v39 }
  0x67   : > { %1164 = vmatprep.mubr.bf16.mxu0 %v4354_v4  ;;  %1644 = vmatprep.mubr.bf16.mxu1 %v4354_v4 }
  0x6e   : > { %3750 = vmatmul.mubr.msk.bf16.gmra.mxu0 %vm842_vm1, %v4083_v20  ;;  %3798 = vmatmul.mubr.msk.bf16.gmra.mxu1 %vm842_vm1, %v4120_v41 }
  0x6f   : > { %1174 = vmatprep.mubr.bf16.mxu0 %v4354_v4  ;;  %1654 = vmatprep.mubr.bf16.mxu1 %v4354_v4 }
  0x76   : > { %3751 = vmatmul.mubr.msk.bf16.gmra.mxu0 %vm842_vm1, %v4084_v21  ;;  %3799 = vmatmul.mubr.msk.bf16.gmra.mxu1 %vm842_vm1, %v4122_v43 }
  0x77   : > { %1184 = vmatprep.mubr.bf16.mxu0 %v4354_v4  ;;  %1664 = vmatprep.mubr.bf16.mxu1 %v4354_v4 }
  0x7e   : > { %3752 = vmatmul.mubr.msk.bf16.gmra.mxu0 %vm842_vm1, %v4085_v22  ;;  %3800 = vmatmul.mubr.msk.bf16.gmra.mxu1 %vm842_vm1, %v4124_v45 }
  0x7f   : > { %1194 = vmatprep.mubr.bf16.mxu0 %v4354_v4  ;;  %1674 = vmatprep.mubr.bf16.mxu1 %v4354_v4 }
  0x86   : > { %3753 = vmatmul.mubr.msk.bf16.gmra.mxu0 %vm842_vm1, %v4086_v24  ;;  %3801 = vmatmul.mubr.msk.bf16.gmra.mxu1 %vm842_vm1, %v4126_v49 }
  0x87   : > { %1204 = vmatprep.mubr.bf16.mxu0 %v4354_v4  ;;  %1684 = vmatprep.mubr.bf16.mxu1 %v4354_v4 }
  0x8e   : > { %3754 = vmatmul.mubr.msk.bf16.gmra.mxu0 %vm842_vm1, %v4087_v26  ;;  %3802 = vmatmul.mubr.msk.bf16.gmra.mxu1 %vm842_vm1, %v4128_v57 }
  0x8f   : > { %1214 = vmatprep.mubr.bf16.mxu0 %v4354_v4  ;;  %1694 = vmatprep.mubr.bf16.mxu1 %v4354_v4 }
  0x96   : > { %3755 = vmatmul.mubr.msk.bf16.gmra.mxu0 %vm842_vm1, %v4088_v28  ;;  %3803 = vmatmul.mubr.msk.bf16.gmra.mxu1 %vm842_vm1, %v4130_v10  ;;  %v4132_v28 = vld [vmem:[%s4476_s21 + $0x1f8] sm:$0xff]  }
  0x97   : > { %1224 = vmatprep.mubr.bf16.mxu0 %v4354_v4  ;;  %1704 = vmatprep.mubr.bf16.mxu1 %v4354_v4 }
  0x9e   : > { %3756 = vmatmul.mubr.msk.bf16.gmra.mxu0 %vm842_vm1, %v4089_v30  ;;  %3804 = vmatmul.mubr.msk.bf16.gmra.mxu1 %vm842_vm1, %v4132_v28 }
  0x9f   : > { %1234 = vmatprep.mubr.bf16.mxu0 %v4354_v4  ;;  %2526 = vmatprep.mubr.bf16.mxu1 %v4354_v4 }
  0xa6   : > { %3757 = vmatmul.mubr.msk.bf16.gmra.mxu0 %vm842_vm1, %v4090_v32 }
  0xa7   : > { %1244 = vmatprep.mubr.bf16.mxu0 %v4354_v4 }
  0xae   : > { %3758 = vmatmul.mubr.msk.bf16.gmra.mxu0 %vm842_vm1, %v4091_v34  ;;  %v4101_v34 = vld [vmem:[%s4476_s21 + $0xd8] sm:$0xff]  }
  0xaf   : > { %1254 = vmatprep.mubr.bf16.mxu0 %v4354_v4 }
  0xb6   : > { %3759 = vmatmul.mubr.msk.bf16.gmra.mxu0 %vm842_vm1, %v4092_v36 }
  0xb7   : > { %1264 = vmatprep.mubr.bf16.mxu0 %v4354_v4 }
  0xbe   : > { %3760 = vmatmul.mubr.msk.bf16.gmra.mxu0 %vm842_vm1, %v4093_v38 }
  0xbf   : > { %1274 = vmatprep.mubr.bf16.mxu0 %v4354_v4 }
  0xc6   : > { %3761 = vmatmul.mubr.msk.bf16.gmra.mxu0 %vm842_vm1, %v4094_v40 }
  0xc7   : > { %1284 = vmatprep.mubr.bf16.mxu0 %v4354_v4 }
  0xce   : > { %3762 = vmatmul.mubr.msk.bf16.gmra.mxu0 %vm842_vm1, %v4095_v42 }
  0xcf   : > { %1294 = vmatprep.mubr.bf16.mxu0 %v4354_v4 }
  0xd6   : > { %3763 = vmatmul.mubr.msk.bf16.gmra.mxu0 %vm842_vm1, %v4096_v44 }
  0xd7   : > { %1304 = vmatprep.mubr.bf16.mxu0 %v4354_v4 }
  0xde   : > { %3764 = vmatmul.mubr.msk.bf16.gmra.mxu0 %vm842_vm1, %v4097_v47 }
  0xdf   : > { %1314 = vmatprep.mubr.bf16.mxu0 %v4354_v4 }
  0xe6   : > { %v1076_v55 = vpop.f32.mrf.mxu0  ;;  %3765 = vmatmul.mubr.msk.bf16.gmra.mxu0 %vm842_vm1, %v4098_v52  ;;  %v4103_v52 = vld [vmem:[%s4476_s21 + $0xe0] sm:$0xff]  }
  0xe7   : > { %1324 = vmatprep.mubr.bf16.mxu0 %v4354_v4  ;;  %v1077_v59 = vadd.f32 %v1076_v55, %v4607_v54 }
  0xe8   : > { %v1078_v58 = vpop.f32.mrf.mxu0 }
  0xe9   : > { %v1079_v62 = vadd.f32 %v1078_v58, %v4611_v56  ;;  %v1715_v1 = vmax.f32 %v1077_v59, 0.0 }
  0xea   : > { %v1080_v60 = vpop.f32.mrf.mxu0 }
  0xeb   : > { %v1081_v63 = vadd.f32 %v1080_v60, %v4607_v54  ;;  %v1716_v6 = vmax.f32 %v1079_v62, 0.0 }
  0xec   : > { %v1082_v0 = vpop.f32.mrf.mxu0 }
  0xed   : > { %v1717_v2 = vmax.f32 %v1081_v63, 0.0  ;;  %v1083_v3 = vadd.f32 %v1082_v0, %v4611_v56 }
  0xee   : > { %v1086_v5 = vpop.f32.mrf.mxu0  ;;  %3766 = vmatmul.mubr.msk.bf16.gmra.mxu0 %vm842_vm1, %v4099_v61 }
  0xef   : > { %v1971_v7 = vadd.f32 %v1717_v2, %v1715_v1  ;;  %v1718_v8 = vmax.f32 %v1083_v3, 0.0  ;;  %v1087_v9 = vadd.f32 %v1086_v5, %v4607_v54  ;;  %1334 = vmatprep.mubr.bf16.mxu0 %v4354_v4 }
  0xf0   : > { %v1088_v11 = vpop.f32.mrf.mxu0 }
  0xf1   : > { %v1992_v12 = vadd.f32 %v1718_v8, %v1716_v6  ;;  %v1719_v13 = vmax.f32 %v1087_v9, 0.0  ;;  %v1089_v14 = vadd.f32 %v1088_v11, %v4611_v56  ;;  %v4105_v9 = vld [vmem:[%s4476_s21 + $0xe8] sm:$0xff]  }
  0xf2   : > { %v1090_v15 = vpop.f32.mrf.mxu0 }
  0xf3   : > { %v1972_v17 = vadd.f32 %v1971_v7, %v1719_v13  ;;  %v1720_v18 = vmax.f32 %v1089_v14, 0.0  ;;  %v1091_v19 = vadd.f32 %v1090_v15, %v4607_v54 }
  0xf4   : > { %v1092_v20 = vpop.f32.mrf.mxu0 }
  0xf5   : > { %v1993_v21 = vadd.f32 %v1992_v12, %v1720_v18  ;;  %v1721_v22 = vmax.f32 %v1091_v19, 0.0  ;;  %v1093_v23 = vadd.f32 %v1092_v20, %v4611_v56 }
  0xf6   : > { %v1096_v24 = vpop.f32.mrf.mxu0  ;;  %3767 = vmatmul.mubr.msk.bf16.gmra.mxu0 %vm842_vm1, %v4100_v16 }
  0xf7   : > { %v1973_v25 = vadd.f32 %v1972_v17, %v1721_v22  ;;  %v1722_v26 = vmax.f32 %v1093_v23, 0.0  ;;  %v1097_v27 = vadd.f32 %v1096_v24, %v4607_v54  ;;  %1344 = vmatprep.mubr.bf16.mxu0 %v4354_v4 }
  0xf8   : > { %v1098_v29 = vpop.f32.mrf.mxu0 }
  0xf9   : > { %v1994_v30 = vadd.f32 %v1993_v21, %v1722_v26  ;;  %v1723_v31 = vmax.f32 %v1097_v27, 0.0  ;;  %v1099_v32 = vadd.f32 %v1098_v29, %v4611_v56  ;;  %v4107_v26 = vld [vmem:[%s4476_s21 + $0xf0] sm:$0xff]  }
  0xfa   : > { %v1100_v33 = vpop.f32.mrf.mxu0 }
  0xfb   : > { %v1974_v35 = vadd.f32 %v1973_v25, %v1723_v31  ;;  %v1724_v36 = vmax.f32 %v1099_v32, 0.0  ;;  %v1101_v37 = vadd.f32 %v1100_v33, %v4607_v54 }
  0xfc   : > { %v1102_v38 = vpop.f32.mrf.mxu0 }
  0xfd   : > { %v1995_v39 = vadd.f32 %v1994_v30, %v1724_v36  ;;  %v1725_v40 = vmax.f32 %v1101_v37, 0.0  ;;  %v1103_v41 = vadd.f32 %v1102_v38, %v4611_v56 }
  0xfe   : > { %v1106_v42 = vpop.f32.mrf.mxu0  ;;  %3768 = vmatmul.mubr.msk.bf16.gmra.mxu0 %vm842_vm1, %v4101_v34 }
  0xff   : > { %v1975_v43 = vadd.f32 %v1974_v35, %v1725_v40  ;;  %v1726_v44 = vmax.f32 %v1103_v41, 0.0  ;;  %v1107_v45 = vadd.f32 %v1106_v42, %v4607_v54  ;;  %1354 = vmatprep.mubr.bf16.mxu0 %v4354_v4 }
 0x100   : > { %v1108_v46 = vpop.f32.mrf.mxu0 }
 0x101   : > { %v1996_v47 = vadd.f32 %v1995_v39, %v1726_v44  ;;  %v1727_v48 = vmax.f32 %v1107_v45, 0.0  ;;  %v1109_v49 = vadd.f32 %v1108_v46, %v4611_v56 }
 0x102   : > { %v1110_v51 = vpop.f32.mrf.mxu0 }
 0x103   : > { %v1976_v55 = vadd.f32 %v1975_v43, %v1727_v48  ;;  %v1728_v57 = vmax.f32 %v1109_v49, 0.0  ;;  %v1111_v58 = vadd.f32 %v1110_v51, %v4607_v54  ;;  %v4109_v43 = vld [vmem:[%s4476_s21 + $0xf8] sm:$0xff]  }
 0x104   : > { %v1112_v59 = vpop.f32.mrf.mxu0 }
 0x105   : > { %v1997_v60 = vadd.f32 %v1996_v47, %v1728_v57  ;;  %v1729_v61 = vmax.f32 %v1111_v58, 0.0  ;;  %v1113_v62 = vadd.f32 %v1112_v59, %v4611_v56 }
 0x106   : > { %v1116_v63 = vpop.f32.mrf.mxu0  ;;  %3769 = vmatmul.mubr.msk.bf16.gmra.mxu0 %vm842_vm1, %v4103_v52 }
 0x107   : > { %v1977_v0 = vadd.f32 %v1976_v55, %v1729_v61  ;;  %v1730_v1 = vmax.f32 %v1113_v62, 0.0  ;;  %v1117_v2 = vadd.f32 %v1116_v63, %v4607_v54  ;;  %1364 = vmatprep.mubr.bf16.mxu0 %v4354_v4 }
 0x108   : > { %v1118_v3 = vpop.f32.mrf.mxu0 }
 0x109   : > { %v1998_v5 = vadd.f32 %v1997_v60, %v1730_v1  ;;  %v1731_v6 = vmax.f32 %v1117_v2, 0.0  ;;  %v1119_v7 = vadd.f32 %v1118_v3, %v4611_v56 }
 0x10a   : > { %v1120_v8 = vpop.f32.mrf.mxu0 }
 0x10b   : > { %v1978_v10 = vadd.f32 %v1977_v0, %v1731_v6  ;;  %v1732_v11 = vmax.f32 %v1119_v7, 0.0  ;;  %v1121_v12 = vadd.f32 %v1120_v8, %v4607_v54  ;;  %v4111_v0 = vld [vmem:[%s4476_s21 + $0x100] sm:$0xff]  }
 0x10c   : > { %v1122_v13 = vpop.f32.mrf.mxu0 }
 0x10d   : > { %v1999_v14 = vadd.f32 %v1998_v5, %v1732_v11  ;;  %v1733_v15 = vmax.f32 %v1121_v12, 0.0  ;;  %v1123_v16 = vadd.f32 %v1122_v13, %v4611_v56 }
 0x10e   : > { %v1126_v17 = vpop.f32.mrf.mxu0  ;;  %3770 = vmatmul.mubr.msk.bf16.gmra.mxu0 %vm842_vm1, %v4105_v9 }
 0x10f   : > { %v1979_v18 = vadd.f32 %v1978_v10, %v1733_v15  ;;  %v1734_v19 = vmax.f32 %v1123_v16, 0.0  ;;  %v1127_v20 = vadd.f32 %v1126_v17, %v4607_v54  ;;  %1374 = vmatprep.mubr.bf16.mxu0 %v4354_v4 }
 0x110   : > { %v1128_v21 = vpop.f32.mrf.mxu0 }
 0x111   : > { %v2000_v22 = vadd.f32 %v1999_v14, %v1734_v19  ;;  %v1735_v23 = vmax.f32 %v1127_v20, 0.0  ;;  %v1129_v24 = vadd.f32 %v1128_v21, %v4611_v56 }
 0x112   : > { %v1130_v25 = vpop.f32.mrf.mxu0 }
 0x113   : > { %v1980_v27 = vadd.f32 %v1979_v18, %v1735_v23  ;;  %v1736_v28 = vmax.f32 %v1129_v24, 0.0  ;;  %v1131_v29 = vadd.f32 %v1130_v25, %v4607_v54  ;;  %v4113_v18 = vld [vmem:[%s4476_s21 + $0x108] sm:$0xff]  }
 0x114   : > { %v1132_v30 = vpop.f32.mrf.mxu0 }
 0x115   : > { %v2001_v31 = vadd.f32 %v2000_v22, %v1736_v28  ;;  %v1737_v32 = vmax.f32 %v1131_v29, 0.0  ;;  %v1133_v33 = vadd.f32 %v1132_v30, %v4611_v56 }
 0x116   : > { %v1136_v34 = vpop.f32.mrf.mxu0  ;;  %3771 = vmatmul.mubr.msk.bf16.gmra.mxu0 %vm842_vm1, %v4107_v26 }
 0x117   : > { %v1981_v35 = vadd.f32 %v1980_v27, %v1737_v32  ;;  %v1738_v36 = vmax.f32 %v1133_v33, 0.0  ;;  %v1137_v37 = vadd.f32 %v1136_v34, %v4607_v54  ;;  %1384 = vmatprep.mubr.bf16.mxu0 %v4354_v4 }
 0x118   : > { %v1138_v38 = vpop.f32.mrf.mxu0 }
 0x119   : > { %v2002_v39 = vadd.f32 %v2001_v31, %v1738_v36  ;;  %v1739_v40 = vmax.f32 %v1137_v37, 0.0  ;;  %v1139_v41 = vadd.f32 %v1138_v38, %v4611_v56 }
 0x11a   : > { %v1140_v42 = vpop.f32.mrf.mxu0 }
 0x11b   : > { %v1982_v44 = vadd.f32 %v1981_v35, %v1739_v40  ;;  %v1740_v45 = vmax.f32 %v1139_v41, 0.0  ;;  %v1141_v46 = vadd.f32 %v1140_v42, %v4607_v54  ;;  %v4115_v42 = vld [vmem:[%s4476_s21 + $0x110] sm:$0xff]  }
 0x11c   : > { %v1142_v47 = vpop.f32.mrf.mxu0 }
 0x11d   : > { %v2003_v48 = vadd.f32 %v2002_v39, %v1740_v45  ;;  %v1741_v49 = vmax.f32 %v1141_v46, 0.0  ;;  %v1143_v51 = vadd.f32 %v1142_v47, %v4611_v56 }
 0x11e   : > { %v1146_v52 = vpop.f32.mrf.mxu0  ;;  %3772 = vmatmul.mubr.msk.bf16.gmra.mxu0 %vm842_vm1, %v4109_v43 }
 0x11f   : > { %v1983_v55 = vadd.f32 %v1982_v44, %v1741_v49  ;;  %v1742_v57 = vmax.f32 %v1143_v51, 0.0  ;;  %v1147_v58 = vadd.f32 %v1146_v52, %v4607_v54  ;;  %1394 = vmatprep.mubr.bf16.mxu0 %v4354_v4 }
 0x120   : > { %v1148_v59 = vpop.f32.mrf.mxu0 }
 0x121   : > { %v2004_v60 = vadd.f32 %v2003_v48, %v1742_v57  ;;  %v1743_v61 = vmax.f32 %v1147_v58, 0.0  ;;  %v1149_v62 = vadd.f32 %v1148_v59, %v4611_v56 }
 0x122   : > { %v1150_v63 = vpop.f32.mrf.mxu0 }
 0x123   : > { %v1984_v1 = vadd.f32 %v1983_v55, %v1743_v61  ;;  %v1744_v2 = vmax.f32 %v1149_v62, 0.0  ;;  %v1151_v3 = vadd.f32 %v1150_v63, %v4607_v54 }
 0x124   : > { %v1152_v5 = vpop.f32.mrf.mxu0 }
 0x125   : > { %v2005_v6 = vadd.f32 %v2004_v60, %v1744_v2  ;;  %v1745_v7 = vmax.f32 %v1151_v3, 0.0  ;;  %v1153_v8 = vadd.f32 %v1152_v5, %v4611_v56  ;;  %v4117_v3 = vld [vmem:[%s4476_s21 + $0x118] sm:$0xff]  }
 0x126   : > { %v1156_v9 = vpop.f32.mrf.mxu0  ;;  %3773 = vmatmul.mubr.msk.bf16.gmra.mxu0 %vm842_vm1, %v4111_v0 }
 0x127   : > { %v1985_v10 = vadd.f32 %v1984_v1, %v1745_v7  ;;  %v1746_v11 = vmax.f32 %v1153_v8, 0.0  ;;  %1404 = vmatprep.mubr.bf16.mxu0 %v4354_v4  ;;  %v1157_v12 = vadd.f32 %v1156_v9, %v4607_v54 }
 0x128   : > { %v1158_v13 = vpop.f32.mrf.mxu0 }
 0x129   : > { %v1986_v14 = vrot.slane %v1985_v10, 4  ;;  %v2006_v15 = vadd.f32 %v2005_v6, %v1746_v11  ;;  %v1159_v16 = vadd.f32 %v1158_v13, %v4611_v56  ;;  %v1747_v22 = vmax.f32 %v1157_v12, 0.0 }
 0x12a   : > { %v1160_v17 = vpop.f32.mrf.mxu0 }
 0x12b   : > { %v1987_v19 = vadd.f32 %v1986_v14, %v1985_v10  ;;  %v2007_v20 = vrot.slane %v2006_v15, 4  ;;  %v1161_v21 = vadd.f32 %v1160_v17, %v4607_v54  ;;  %v1748_v28 = vmax.f32 %v1159_v16, 0.0 }
 0x12c   : > { %v1162_v23 = vpop.f32.mrf.mxu0 }
 0x12d   : > { %v1988_v24 = vrot.slane %v1987_v19, 2  ;;  %v2008_v25 = vadd.f32 %v2007_v20, %v2006_v15  ;;  %v1749_v26 = vmax.f32 %v1161_v21, 0.0  ;;  %v1163_v27 = vadd.f32 %v1162_v23, %v4611_v56  ;;  %v1556_v20 = vpop.f32.mrf.mxu1 }
 0x12e   : > { %v1166_v29 = vpop.f32.mrf.mxu0  ;;  %3774 = vmatmul.mubr.msk.bf16.gmra.mxu0 %vm842_vm1, %v4113_v18 }
 0x12f   : > { %v1989_v30 = vadd.f32 %v1988_v24, %v1987_v19  ;;  %v2009_v31 = vrot.slane %v2008_v25, 2  ;;  %v2013_v32 = vadd.f32 %v1749_v26, %v1747_v22  ;;  %v1750_v33 = vmax.f32 %v1163_v27, 0.0  ;;  %1414 = vmatprep.mubr.bf16.mxu0 %v4354_v4  ;;  %v4119_v22 = vld [vmem:[%s4476_s21 + $0x120] sm:$0xff]   ;;  %v1558_v26 = vpop.f32.mrf.mxu1 }
 0x130   : > { %v1167_v34 = vadd.f32 %v1166_v29, %v4607_v54  ;;  %v1168_v35 = vpop.f32.mrf.mxu0 }
 0x131   : > { %v1990_v36 = vrot.slane %v1989_v30, 1  ;;  %v2010_v37 = vadd.f32 %v2009_v31, %v2008_v25  ;;  %v2034_v38 = vadd.f32 %v1750_v33, %v1748_v28  ;;  %v1169_v39 = vadd.f32 %v1168_v35, %v4611_v56 }
 0x132   : > { %v1751_v40 = vmax.f32 %v1167_v34, 0.0  ;;  %v1170_v41 = vpop.f32.mrf.mxu0  ;;  %v1557_v31 = vadd.f32 %v1556_v20, %v4607_v54  ;;  %v4123_v20 = vld [vmem:[%s4476_s21 + $0x130] sm:$0xff]  }
 0x133   : > { %v2011_v43 = vrot.slane %v2010_v37, 1  ;;  %v1752_v44 = vmax.f32 %v1169_v39, 0.0  ;;  %v1171_v45 = vadd.f32 %v1170_v41, %v4607_v54  ;;  %v1991_v46 = vadd.f32 %v1990_v36, %v1989_v30 }
 0x134   : > { %v2014_v47 = vadd.f32 %v2013_v32, %v1751_v40  ;;  %v1172_v48 = vpop.f32.mrf.mxu0  ;;  %v1560_v32 = vpop.f32.mrf.mxu1  ;;  %v1907_v39 = vmax.f32 %v1557_v31, 0.0  ;;  %v1559_v40 = vadd.f32 %v1558_v26, %v4611_v56 }
 0x135   : > { %v2012_v49 = vadd.f32 %v2011_v43, %v2010_v37  ;;  %v2035_v51 = vadd.f32 %v2034_v38, %v1752_v44  ;;  %v1753_v52 = vmax.f32 %v1171_v45, 0.0  ;;  %v1173_v55 = vadd.f32 %v1172_v48, %v4611_v56 }
 0x136   : > { %v1176_v57 = vpop.f32.mrf.mxu0  ;;  %3775 = vmatmul.mubr.msk.bf16.gmra.mxu0 %vm842_vm1, %v4115_v42  ;;  %v1562_v37 = vpop.f32.mrf.mxu1  ;;  %v1561_v44 = vadd.f32 %v1560_v32, %v4607_v54 }
 0x137   : > { %v4692_v58 = vadd.f32 %v2012_v49, %v1991_v46  ;;  %v2015_v59 = vadd.f32 %v2014_v47, %v1753_v52  ;;  %v1754_v60 = vmax.f32 %v1173_v55, 0.0  ;;  %v1177_v61 = vadd.f32 %v1176_v57, %v4607_v54  ;;  %1424 = vmatprep.mubr.bf16.mxu0 %v4354_v4  ;;  %v4121_v47 = vld [vmem:[%s4476_s21 + $0x128] sm:$0xff]  }
 0x138   : > { %v1178_v62 = vpop.f32.mrf.mxu0  ;;  %v1566_v45 = vpop.f32.mrf.mxu1  ;;  %v1909_v52 = vmax.f32 %v1561_v44, 0.0 }
 0x139   : > { %v2036_v63 = vadd.f32 %v2035_v51, %v1754_v60  ;;  %v1755_v0 = vmax.f32 %v1177_v61, 0.0  ;;  %v1179_v1 = vadd.f32 %v1178_v62, %v4611_v56  ;;  %v1563_v60 = vadd.f32 %v1562_v37, %v4611_v56 }
 0x13a   : > { %v1180_v2 = vpop.f32.mrf.mxu0  ;;  %v1568_v55 = vpop.f32.mrf.mxu1 }
 0x13b   : > { %v2016_v5 = vadd.f32 %v2015_v59, %v1755_v0  ;;  %v1756_v6 = vmax.f32 %v1179_v1, 0.0  ;;  %v1181_v7 = vadd.f32 %v1180_v2, %v4607_v54  ;;  %v1908_v59 = vmax.f32 %v1559_v40, 0.0 }
 0x13c   : > { %v1182_v8 = vpop.f32.mrf.mxu0  ;;  %v2223_v0 = vadd.f32 %v1909_v52, %v1907_v39  ;;  %v1570_v1 = vpop.f32.mrf.mxu1 }
 0x13d   : > { %v2037_v9 = vadd.f32 %v2036_v63, %v1756_v6  ;;  %v1757_v10 = vmax.f32 %v1181_v7, 0.0  ;;  %v1183_v11 = vadd.f32 %v1182_v8, %v4611_v56 }
 0x13e   : > { %v1186_v12 = vpop.f32.mrf.mxu0  ;;  %3776 = vmatmul.mubr.msk.bf16.gmra.mxu0 %vm842_vm1, %v4117_v3  ;;  %v1910_v3 = vmax.f32 %v1563_v60, 0.0 }
 0x13f   : > { %v2017_v13 = vadd.f32 %v2016_v5, %v1757_v10  ;;  %v1758_v14 = vmax.f32 %v1183_v11, 0.0  ;;  %v1187_v15 = vadd.f32 %v1186_v12, %v4607_v54  ;;  %1434 = vmatprep.mubr.bf16.mxu0 %v4354_v4  ;;  %v1567_v5 = vadd.f32 %v1566_v45, %v4607_v54  ;;  %v1572_v10 = vpop.f32.mrf.mxu1 }
 0x140   : > { %v1188_v16 = vpop.f32.mrf.mxu0  ;;  %v2244_v12 = vadd.f32 %v1910_v3, %v1908_v59 }
 0x141   : > { %v2038_v17 = vadd.f32 %v2037_v9, %v1758_v14  ;;  %v1759_v18 = vmax.f32 %v1187_v15, 0.0  ;;  %v1189_v19 = vadd.f32 %v1188_v16, %v4611_v56  ;;  %v1569_v9 = vadd.f32 %v1568_v55, %v4611_v56 }
 0x142   : > { %v1190_v21 = vpop.f32.mrf.mxu0 }
 0x143   : > { %v2018_v23 = vadd.f32 %v2017_v13, %v1759_v18  ;;  %v1760_v24 = vmax.f32 %v1189_v19, 0.0  ;;  %v1191_v25 = vadd.f32 %v1190_v21, %v4607_v54  ;;  %v1911_v13 = vmax.f32 %v1567_v5, 0.0  ;;  %v1576_v18 = vpop.f32.mrf.mxu1 }
 0x144   : > { %v1192_v27 = vpop.f32.mrf.mxu0 }
 0x145   : > { %v2039_v28 = vadd.f32 %v2038_v17, %v1760_v24  ;;  %v1761_v29 = vmax.f32 %v1191_v25, 0.0  ;;  %v1193_v30 = vadd.f32 %v1192_v27, %v4611_v56  ;;  %v1912_v17 = vmax.f32 %v1569_v9, 0.0  ;;  %v1578_v27 = vpop.f32.mrf.mxu1 }
 0x146   : > { %v1196_v33 = vpop.f32.mrf.mxu0  ;;  %3777 = vmatmul.mubr.msk.bf16.gmra.mxu0 %vm842_vm1, %v4119_v22  ;;  %v2224_v21 = vadd.f32 %v2223_v0, %v1911_v13  ;;  %v1571_v22 = vadd.f32 %v1570_v1, %v4607_v54 }
 0x147   : > { %v2019_v34 = vadd.f32 %v2018_v23, %v1761_v29  ;;  %v1762_v35 = vmax.f32 %v1193_v30, 0.0  ;;  %v1197_v36 = vadd.f32 %v1196_v33, %v4607_v54  ;;  %1444 = vmatprep.mubr.bf16.mxu0 %v4354_v4  ;;  %v2245_v26 = vadd.f32 %v2244_v12, %v1912_v17 }
 0x148   : > { %v1198_v38 = vpop.f32.mrf.mxu0  ;;  %v1913_v29 = vmax.f32 %v1571_v22, 0.0  ;;  %v1573_v30 = vadd.f32 %v1572_v10, %v4611_v56 }
 0x149   : > { %v2040_v41 = vadd.f32 %v2039_v28, %v1762_v35  ;;  %v1763_v42 = vmax.f32 %v1197_v36, 0.0  ;;  %v1199_v43 = vadd.f32 %v1198_v38, %v4611_v56  ;;  %v1580_v35 = vpop.f32.mrf.mxu1 }
 0x14a   : > { %v1200_v46 = vpop.f32.mrf.mxu0  ;;  %v2225_v37 = vadd.f32 %v2224_v21, %v1913_v29  ;;  %v1914_v38 = vmax.f32 %v1573_v30, 0.0  ;;  %v1581_v60 = vadd.f32 %v1580_v35, %v4607_v54  ;;  %v4127_v29 = vld [vmem:[%s4476_s21 + $0x140] sm:$0xff]  }
 0x14b   : > { %v2020_v48 = vadd.f32 %v2019_v34, %v1763_v42  ;;  %v1764_v49 = vmax.f32 %v1199_v43, 0.0  ;;  %v1201_v51 = vadd.f32 %v1200_v46, %v4607_v54  ;;  %v1577_v34 = vadd.f32 %v1576_v18, %v4607_v54  ;;  %v1582_v43 = vpop.f32.mrf.mxu1 }
 0x14c   : > { %v1202_v57 = vpop.f32.mrf.mxu0  ;;  %v2246_v45 = vadd.f32 %v2245_v26, %v1914_v38  ;;  %v1579_v46 = vadd.f32 %v1578_v27, %v4611_v56  ;;  %v1583_v0 = vadd.f32 %v1582_v43, %v4611_v56  ;;  %v1917_v5 = vmax.f32 %v1581_v60, 0.0 }
 0x14d   : > { %v2041_v61 = vadd.f32 %v2040_v41, %v1764_v49  ;;  %v1765_v62 = vmax.f32 %v1201_v51, 0.0  ;;  %v1203_v63 = vadd.f32 %v1202_v57, %v4611_v56  ;;  %v1915_v42 = vmax.f32 %v1577_v34, 0.0  ;;  %v1586_v52 = vpop.f32.mrf.mxu1  ;;  %v4125_v57 = vld [vmem:[%s4476_s21 + $0x138] sm:$0xff]  }
 0x14e   : > { %v1206_v2 = vpop.f32.mrf.mxu0  ;;  %3778 = vmatmul.mubr.msk.bf16.gmra.mxu0 %vm842_vm1, %v4121_v47  ;;  %v1916_v59 = vmax.f32 %v1579_v46, 0.0  ;;  %v1918_v9 = vmax.f32 %v1583_v0, 0.0  ;;  %v1587_v13 = vadd.f32 %v1586_v52, %v4607_v54  ;;  %v2315_v27 = vmul.f32 0.00390625, %v4692_v58 }
 0x14f   : > { %v2021_v6 = vadd.f32 %v2020_v48, %v1765_v62  ;;  %v1766_v7 = vmax.f32 %v1203_v63, 0.0  ;;  %v1207_v8 = vadd.f32 %v1206_v2, %v4607_v54  ;;  %1454 = vmatprep.mubr.bf16.mxu0 %v4354_v4  ;;  %v2226_v51 = vadd.f32 %v2225_v37, %v1915_v42  ;;  %v1588_v1 = vpop.f32.mrf.mxu1 }
 0x150   : > { %v1208_v11 = vpop.f32.mrf.mxu0  ;;  %v2247_v3 = vadd.f32 %v2246_v45, %v1916_v59  ;;  %v1589_v21 = vadd.f32 %v1588_v1, %v4611_v56 }
 0x151   : > { %v2042_v14 = vadd.f32 %v2041_v61, %v1766_v7  ;;  %v1767_v15 = vmax.f32 %v1207_v8, 0.0  ;;  %v1209_v16 = vadd.f32 %v1208_v11, %v4611_v56  ;;  %v1590_v10 = vpop.f32.mrf.mxu1  ;;  %v2227_v12 = vadd.f32 %v2226_v51, %v1917_v5  ;;  %v4129_v5 = vld [vmem:[%s4476_s21 + $0x148] sm:$0xff]  }
 0x152   : > { %v1210_v19 = vpop.f32.mrf.mxu0  ;;  %v2248_v17 = vadd.f32 %v2247_v3, %v1918_v9 }
 0x153   : > { %v2022_v23 = vadd.f32 %v2021_v6, %v1767_v15  ;;  %v1768_v24 = vmax.f32 %v1209_v16, 0.0  ;;  %v1211_v25 = vadd.f32 %v1210_v19, %v4607_v54  ;;  %v1592_v18 = vpop.f32.mrf.mxu1 }
 0x154   : > { %v1212_v28 = vpop.f32.mrf.mxu0  ;;  %v1593_v58 = vadd.f32 %v1592_v18, %v4611_v56 }
 0x155   : > { %v2043_v31 = vadd.f32 %v2042_v14, %v1768_v24  ;;  %v1769_v32 = vmax.f32 %v1211_v25, 0.0  ;;  %v1213_v33 = vadd.f32 %v1212_v28, %v4611_v56  ;;  %v1591_v25 = vadd.f32 %v1590_v10, %v4607_v54  ;;  %v1596_v26 = vpop.f32.mrf.mxu1 }
 0x156   : > { %v1216_v36 = vpop.f32.mrf.mxu0  ;;  %3779 = vmatmul.mubr.msk.bf16.gmra.mxu0 %vm842_vm1, %v4123_v20  ;;  %v1919_v20 = vmax.f32 %v1587_v13, 0.0 }
 0x157   : > { %v2023_v39 = vadd.f32 %v2022_v23, %v1769_v32  ;;  %v1770_v40 = vmax.f32 %v1213_v33, 0.0  ;;  %v1217_v41 = vadd.f32 %v1216_v36, %v4607_v54  ;;  %1464 = vmatprep.mubr.bf16.mxu0 %v4354_v4  ;;  %v4752_v32 = vld [vmem:[%s5555_s8 + $0x2] ss:$0 sm:$0xff]  ;;  %v1921_v36 = vmax.f32 %v1591_v25, 0.0  ;;  %v4755_v37 = vpop.f32.mrf.mxu1 }
 0x158   : > { %v1218_v44 = vpop.f32.mrf.mxu0  ;;  %v2228_v30 = vadd.f32 %v2227_v12, %v1919_v20  ;;  %v2329_v45 = vmul.f32 %v4752_v32, %v2315_v27 }
 0x159   : > { %v2044_v47 = vadd.f32 %v2043_v31, %v1770_v40  ;;  %v1771_v48 = vmax.f32 %v1217_v41, 0.0  ;;  %v1219_v49 = vadd.f32 %v1218_v44, %v4611_v56  ;;  %v1920_v31 = vmax.f32 %v1589_v21, 0.0  ;;  %v4759_v44 = vpop.f32.mrf.mxu1 }
 0x15a   : > { %v1220_v55 = vpop.f32.mrf.mxu0  ;;  %v2229_v43 = vadd.f32 %v2228_v30, %v1921_v36 }
 0x15b   : > { %v2024_v61 = vadd.f32 %v2023_v39, %v1771_v48  ;;  %v1772_v62 = vmax.f32 %v1219_v49, 0.0  ;;  %v1221_v63 = vadd.f32 %v1220_v55, %v4607_v54  ;;  %v2249_v39 = vadd.f32 %v2248_v17, %v1920_v31  ;;  %v4767_v49 = vld [vmem:[%s5555_s8 + $0x3] ss:$0 sm:$0xff]  ;;  %v1602_v55 = vpop.f32.mrf.mxu1 }
 0x15c   : > { %v1222_v2 = vpop.f32.mrf.mxu0  ;;  %v1597_v48 = vadd.f32 %v1596_v26, %v4607_v54  ;;  %v2343_v1 = vadd.f32 %v4767_v49, %v2329_v45 }
 0x15d   : > { %v2045_v6 = vadd.f32 %v2044_v47, %v1772_v62  ;;  %v1773_v7 = vmax.f32 %v1221_v63, 0.0  ;;  %v1223_v8 = vadd.f32 %v1222_v2, %v4611_v56  ;;  %v1922_v47 = vmax.f32 %v1593_v58, 0.0  ;;  %v1606_v0 = vpop.f32.mrf.mxu1 }
 0x15e   : > { %v1226_v11 = vpop.f32.mrf.mxu0  ;;  %3780 = vmatmul.mubr.msk.bf16.gmra.mxu0 %vm842_vm1, %v4125_v57  ;;  %v2351_v18 = vpack.c.bf16 %v2343_v1, %v2343_v1 }
 0x15f   : > { %v2025_v14 = vadd.f32 %v2024_v61, %v1773_v7  ;;  %v1774_v15 = vmax.f32 %v1223_v8, 0.0  ;;  %v1227_v16 = vadd.f32 %v1226_v11, %v4607_v54  ;;  %1474 = vmatprep.mubr.bf16.mxu0 %v4354_v4  ;;  %v2250_v60 = vadd.f32 %v2249_v39, %v1922_v47  ;;  %v1608_v10 = vpop.f32.mrf.mxu1 }
 0x160   : > { %v1228_v19 = vpop.f32.mrf.mxu0  ;;  %v1923_v61 = vmax.f32 %v1597_v48, 0.0  ;;  %v1599_v39 = vadd.f32 %v4755_v37, %v4611_v56  ;;  %v1601_v48 = vadd.f32 %v4759_v44, %v4607_v54 }
 0x161   : > { %v2046_v22 = vadd.f32 %v2045_v6, %v1774_v15  ;;  %v1775_v23 = vmax.f32 %v1227_v16, 0.0  ;;  %v1229_v24 = vadd.f32 %v1228_v19, %v4611_v56  ;;  %v4776_v17 = vpop.f32.mrf.mxu1 }
 0x162   : > { %v1230_v28 = vpop.f32.mrf.mxu0  ;;  %v2230_v6 = vadd.f32 %v2229_v43, %v1923_v61  ;;  %v1924_v47 = vmax.f32 %v1599_v39, 0.0  ;;  %v1925_v1 = vmax.f32 %v1601_v48, 0.0 }
 0x163   : > { %v2026_v33 = vadd.f32 %v2025_v14, %v1775_v23  ;;  %v1776_v34 = vmax.f32 %v1229_v24, 0.0  ;;  %v1231_v35 = vadd.f32 %v1230_v28, %v4607_v54  ;;  %v1612_v25 = vpop.f32.mrf.mxu1 }
 0x164   : > { %v1232_v38 = vpop.f32.mrf.mxu0 }
 0x165   : > { %v2047_v40 = vadd.f32 %v2046_v22, %v1776_v34  ;;  %v1777_v41 = vmax.f32 %v1231_v35, 0.0  ;;  %v1233_v42 = vadd.f32 %v1232_v38, %v4611_v56  ;;  %v4782_v34 = vunpack.c.l.b16 %v2351_v18  ;;  %v4131_v38 = vld [vmem:[%s4476_s21 + $0x150] sm:$0xff]  }
 0x166   : > { %v1236_v46 = vpop.f32.mrf.mxu0  ;;  %3781 = vmatmul.mubr.msk.bf16.gmra.mxu0 %vm842_vm1, %v4127_v29 }
 0x167   : > { %v2027_v51 = vadd.f32 %v2026_v33, %v1777_v41  ;;  %v1778_v52 = vmax.f32 %v1233_v42, 0.0  ;;  %1484 = vmatprep.mubr.bf16.mxu0 %v4354_v4  ;;  %v1237_v57 = vadd.f32 %v1236_v46, %v4607_v54  ;;  %v1616_v33 = vpop.f32.mrf.mxu1 }
 0x168   : > { %v1238_v59 = vpop.f32.mrf.mxu0 }
 0x169   : > { %v2028_v62 = vrot.slane %v2027_v51, 4  ;;  %v2048_v63 = vadd.f32 %v2047_v40, %v1778_v52  ;;  %v1239_v2 = vadd.f32 %v1238_v59, %v4611_v56  ;;  %v1779_v11 = vmax.f32 %v1237_v57, 0.0  ;;  %v1618_v43 = vpop.f32.mrf.mxu1 }
 0x16a   : > { %v1240_v3 = vpop.f32.mrf.mxu0 }
 0x16b   : > { %v2029_v7 = vadd.f32 %v2028_v62, %v2027_v51  ;;  %v2049_v8 = vrot.slane %v2048_v63, 4  ;;  %v1241_v9 = vadd.f32 %v1240_v3, %v4607_v54  ;;  %v1780_v19 = vmax.f32 %v1239_v2, 0.0  ;;  %v1620_v37 = vpop.f32.mrf.mxu1 }
 0x16c   : > { %v1242_v12 = vpop.f32.mrf.mxu0  ;;  %v1603_v51 = vadd.f32 %v1602_v55, %v4611_v56  ;;  %v1607_v3 = vadd.f32 %v1606_v0, %v4607_v54 }
 0x16d   : > { %v2030_v13 = vrot.slane %v2029_v7, 2  ;;  %v2050_v14 = vadd.f32 %v2049_v8, %v2048_v63  ;;  %v1781_v15 = vmax.f32 %v1241_v9, 0.0  ;;  %v1243_v16 = vadd.f32 %v1242_v12, %v4611_v56  ;;  %v1622_v55 = vpop.f32.mrf.mxu1 }
 0x16e   : > { %v1246_v20 = vpop.f32.mrf.mxu0  ;;  %3782 = vmatmul.mubr.msk.bf16.gmra.mxu0 %vm842_vm1, %v4129_v5  ;;  %v2251_v63 = vadd.f32 %v2250_v60, %v1924_v47  ;;  %v1926_v2 = vmax.f32 %v1603_v51, 0.0 }
 0x16f   : > { %v2031_v21 = vadd.f32 %v2030_v13, %v2029_v7  ;;  %v2051_v22 = vrot.slane %v2050_v14, 2  ;;  %v2055_v23 = vadd.f32 %v1781_v15, %v1779_v11  ;;  %v1782_v24 = vmax.f32 %v1243_v16, 0.0  ;;  %1494 = vmatprep.mubr.bf16.mxu0 %v4354_v4  ;;  %v1626_v18 = vpop.f32.mrf.mxu1 }
 0x170   : > { %v1247_v26 = vadd.f32 %v1246_v20, %v4607_v54  ;;  %v1248_v27 = vpop.f32.mrf.mxu0  ;;  %v2231_v11 = vadd.f32 %v2230_v6, %v1925_v1  ;;  %v2252_v12 = vadd.f32 %v2251_v63, %v1926_v2  ;;  %v1927_v13 = vmax.f32 %v1607_v3, 0.0  ;;  %v4133_v20 = vld [vmem:[%s4476_s21 + $0x158] sm:$0xff]  }
 0x171   : > { %v2032_v28 = vrot.slane %v2031_v21, 1  ;;  %v2052_v29 = vadd.f32 %v2051_v22, %v2050_v14  ;;  %v2076_v30 = vadd.f32 %v1782_v24, %v1780_v19  ;;  %v1249_v31 = vadd.f32 %v1248_v27, %v4611_v56 }
 0x172   : > { %v1783_v35 = vmax.f32 %v1247_v26, 0.0  ;;  %v1250_v36 = vpop.f32.mrf.mxu0  ;;  %v1609_v14 = vadd.f32 %v1608_v10, %v4611_v56  ;;  %v1613_v6 = vadd.f32 %v1612_v25, %v4611_v56 }
 0x173   : > { %v2033_v58 = vadd.f32 %v2032_v28, %v2031_v21  ;;  %v2053_v40 = vrot.slane %v2052_v29, 1  ;;  %v1784_v41 = vmax.f32 %v1249_v31, 0.0  ;;  %v1251_v42 = vadd.f32 %v1250_v36, %v4607_v54  ;;  %v1628_v28 = vpop.f32.mrf.mxu1 }
 0x174   : > { %v2056_v45 = vadd.f32 %v2055_v23, %v1783_v35  ;;  %v1252_v46 = vpop.f32.mrf.mxu0  ;;  %v2232_v21 = vadd.f32 %v2231_v11, %v1927_v13  ;;  %v1928_v22 = vmax.f32 %v1609_v14, 0.0  ;;  %v1611_v23 = vadd.f32 %v4776_v17, %v4607_v54 }
 0x175   : > { %v2054_v52 = vadd.f32 %v2053_v40, %v2052_v29  ;;  %v2077_v57 = vadd.f32 %v2076_v30, %v1784_v41  ;;  %v1785_v59 = vmax.f32 %v1251_v42, 0.0  ;;  %v1253_v61 = vadd.f32 %v1252_v46, %v4611_v56  ;;  %v1630_v51 = vpop.f32.mrf.mxu1 }
 0x176   : > { %v1256_v62 = vpop.f32.mrf.mxu0  ;;  %3783 = vmatmul.mubr.msk.bf16.gmra.mxu0 %vm842_vm1, %v4131_v38  ;;  %v2253_v30 = vadd.f32 %v2252_v12, %v1928_v22  ;;  %v1929_v31 = vmax.f32 %v1611_v23, 0.0  ;;  %v1930_v35 = vmax.f32 %v1613_v6, 0.0  ;;  %v1617_v36 = vadd.f32 %v1616_v33, %v4607_v54 }
 0x177   : > { %v2308_v5 = vadd.f32 %v2054_v52, %v2033_v58  ;;  %v2057_v7 = vadd.f32 %v2056_v45, %v1785_v59  ;;  %v1786_v8 = vmax.f32 %v1253_v61, 0.0  ;;  %v1257_v44 = vadd.f32 %v1256_v62, %v4607_v54  ;;  %1504 = vmatprep.mubr.bf16.mxu0 %v4354_v4 }
 0x178   : > { %v1258_v9 = vpop.f32.mrf.mxu0  ;;  %v2233_v40 = vadd.f32 %v2232_v21, %v1929_v31  ;;  %v2254_v41 = vadd.f32 %v2253_v30, %v1930_v35  ;;  %v1931_v42 = vmax.f32 %v1617_v36, 0.0  ;;  %v1619_v45 = vadd.f32 %v1618_v43, %v4611_v56 }
 0x179   : > { %v2316_v60 = vmul.f32 0.00390625, %v2308_v5  ;;  %v2078_v15 = vadd.f32 %v2077_v57, %v1786_v8  ;;  %v1787_v16 = vmax.f32 %v1257_v44, 0.0  ;;  %v1259_v0 = vadd.f32 %v1258_v9, %v4611_v56  ;;  %v4134_v5 = vld [vmem:[%s4476_s21 + $0x160] sm:$0xff]  }
 0x17a   : > { %v1260_v19 = vpop.f32.mrf.mxu0  ;;  %v2234_v57 = vadd.f32 %v2233_v40, %v1931_v42  ;;  %v1932_v59 = vmax.f32 %v1619_v45, 0.0  ;;  %v1621_v61 = vadd.f32 %v1620_v37, %v4607_v54  ;;  %v1623_v62 = vadd.f32 %v1622_v55, %v4611_v56  ;;  %v1632_v37 = vpop.f32.mrf.mxu1 }
 0x17b   : > { %v2330_v24 = vmul.f32 %v4752_v32, %v2316_v60  ;;  %v2058_v26 = vadd.f32 %v2057_v7, %v1787_v16  ;;  %v1788_v10 = vmax.f32 %v1259_v0, 0.0  ;;  %v1261_v27 = vadd.f32 %v1260_v19, %v4607_v54 }
 0x17c   : > { %v1262_v29 = vpop.f32.mrf.mxu0  ;;  %v2255_v7 = vadd.f32 %v2254_v41, %v1932_v59  ;;  %v1933_v8 = vmax.f32 %v1621_v61, 0.0  ;;  %v1934_v44 = vmax.f32 %v1623_v62, 0.0  ;;  %v1627_v9 = vadd.f32 %v1626_v18, %v4607_v54 }
 0x17d   : > { %v2344_v38 = vadd.f32 %v4767_v49, %v2330_v24  ;;  %v2079_v39 = vadd.f32 %v2078_v15, %v1788_v10  ;;  %v1789_v58 = vmax.f32 %v1261_v27, 0.0  ;;  %v1263_v17 = vadd.f32 %v1262_v29, %v4611_v56 }
 0x17e   : > { %v1266_v25 = vpop.f32.mrf.mxu0  ;;  %3784 = vmatmul.mubr.msk.bf16.gmra.mxu0 %vm842_vm1, %v4133_v20  ;;  %v2235_v55 = vadd.f32 %v2234_v57, %v1933_v8  ;;  %v2256_v15 = vadd.f32 %v2255_v7, %v1934_v44  ;;  %v1935_v16 = vmax.f32 %v1627_v9, 0.0  ;;  %v1629_v0 = vadd.f32 %v1628_v28, %v4611_v56  ;;  %v4136_v44 = vld [vmem:[%s4476_s21 + $0x170] sm:$0xff]  }
 0x17f   : > { %v2352_v46 = vpack.c.bf16 %v2344_v38, %v2344_v38  ;;  %v2059_v47 = vadd.f32 %v2058_v26, %v1789_v58  ;;  %v1790_v48 = vmax.f32 %v1263_v17, 0.0  ;;  %v1267_v33 = vadd.f32 %v1266_v25, %v4607_v54  ;;  %1514 = vmatprep.mubr.bf16.mxu0 %v4354_v4  ;;  %v4135_v58 = vld [vmem:[%s4476_s21 + $0x168] sm:$0xff]  }
 0x180   : > { %v1268_v52 = vpop.f32.mrf.mxu0  ;;  %v2236_v23 = vadd.f32 %v2235_v55, %v1935_v16  ;;  %v1936_v6 = vmax.f32 %v1629_v0, 0.0  ;;  %v1631_v24 = vadd.f32 %v1630_v51, %v4607_v54  ;;  %v1633_v26 = vadd.f32 %v1632_v37, %v4611_v56  ;;  %v4138_v37 = vld [vmem:[%s5549_s2 + $0x70] ss:$8 sps:$4 sm:$0xff]  }
 0x181   : > { %v2384_v63 = vunpack.c.l.b16 %v2352_v46  ;;  %v2080_v1 = vadd.f32 %v2079_v39, %v1790_v48  ;;  %v1791_v2 = vmax.f32 %v1267_v33, 0.0  ;;  %v1269_v43 = vadd.f32 %v1268_v52, %v4611_v56 }
 0x182   : > { %v1270_v3 = vpop.f32.mrf.mxu0  ;;  %v2257_v29 = vadd.f32 %v2256_v15, %v1936_v6  ;;  %v1937_v30 = vmax.f32 %v1631_v24, 0.0  ;;  %v1938_v31 = vmax.f32 %v1633_v26, 0.0 }
 0x183   : > { %v2391_v11 = vrot.slane %v2384_v63, 7  ;;  %v2060_v12 = vadd.f32 %v2059_v47, %v1791_v2  ;;  %v1792_v13 = vmax.f32 %v1269_v43, 0.0  ;;  %v1271_v14 = vadd.f32 %v1270_v3, %v4607_v54 }
 0x184   : > { %v1272_v60 = vpop.f32.mrf.mxu0  ;;  %v2237_v17 = vadd.f32 %v2236_v23, %v1937_v30  ;;  %v2258_v25 = vadd.f32 %v2257_v29, %v1938_v31  ;;  %v4137_v31 = vld [vmem:[%s4476_s21 + $0x178] sm:$0xff]  }
 0x185   : > { %v4820_v19 = vsel %vm2392_vm2, %v2391_v11, %v4782_v34  ;;  %v2081_v20 = vadd.f32 %v2080_v1, %v1792_v13  ;;  %v1793_v21 = vmax.f32 %v1271_v14, 0.0  ;;  %v1273_v18 = vadd.f32 %v1272_v60, %v4611_v56  ;;  %v4140_v60 = vld [vmem:[%s5549_s2 + $0x74] ss:$8 sps:$4 sm:$0xff]  }
 0x186   : > { %v1276_v22 = vpop.f32.mrf.mxu0  ;;  %3785 = vmatmul.mubr.msk.bf16.gmra.mxu0 %vm842_vm1, %v4134_v5  ;;  %v2238_v46 = vrot.slane %v2237_v17, 4  ;;  %v2259_v47 = vrot.slane %v2258_v25, 4  ;;  %2494 = vmatprep.subr.bf16.mxu1 %v4140_v60 }
 0x187   : > { %v2061_v10 = vadd.f32 %v2060_v12, %v1793_v21  ;;  %v1794_v27 = vmax.f32 %v1273_v18, 0.0  ;;  %v1277_v28 = vadd.f32 %v1276_v22, %v4607_v54  ;;  %1524 = vmatprep.mubr.bf16.mxu0 %v4354_v4  ;;  %2495 = vmatpush1.bf16.msra.mxu1 %v4138_v37 }
 0x188   : > { %v1278_v34 = vpop.f32.mrf.mxu0  ;;  %v2239_v57 = vadd.f32 %v2238_v46, %v2237_v17  ;;  %v2260_v59 = vadd.f32 %v2259_v47, %v2258_v25 }
 0x189   : > { %v2082_v35 = vadd.f32 %v2081_v20, %v1794_v27  ;;  %v1795_v36 = vmax.f32 %v1277_v28, 0.0  ;;  %v1279_v38 = vadd.f32 %v1278_v34, %v4611_v56 }
 0x18a   : > { %v1280_v39 = vpop.f32.mrf.mxu0  ;;  %v2240_v2 = vrot.slane %v2239_v57, 2  ;;  %v2261_v43 = vrot.slane %v2260_v59, 2 }
 0x18b   : > { %v2062_v40 = vadd.f32 %v2061_v10, %v1795_v36  ;;  %v1796_v41 = vmax.f32 %v1279_v38, 0.0  ;;  %v1281_v42 = vadd.f32 %v1280_v39, %v4607_v54 }
 0x18c   : > { %v1282_v45 = vpop.f32.mrf.mxu0  ;;  %v2241_v9 = vadd.f32 %v2240_v2, %v2239_v57  ;;  %v2262_v11 = vadd.f32 %v2261_v43, %v2260_v59 }
 0x18d   : > { %v2083_v48 = vadd.f32 %v2082_v35, %v1796_v41  ;;  %v1797_v33 = vmax.f32 %v1281_v42, 0.0  ;;  %v1283_v51 = vadd.f32 %v1282_v45, %v4611_v56 }
 0x18e   : > { %v1286_v52 = vpop.f32.mrf.mxu0  ;;  %3786 = vmatmul.mubr.msk.bf16.gmra.mxu0 %vm842_vm1, %v4135_v58  ;;  %v2242_v15 = vrot.slane %v2241_v9, 1  ;;  %v2263_v16 = vrot.slane %v2262_v11, 1 }
 0x18f   : > { %v2063_v61 = vadd.f32 %v2062_v40, %v1797_v33  ;;  %v1798_v62 = vmax.f32 %v1283_v51, 0.0  ;;  %v1287_v63 = vadd.f32 %v1286_v52, %v4607_v54  ;;  %1534 = vmatprep.mubr.bf16.mxu0 %v4354_v4 }
 0x190   : > { %v1288_v1 = vpop.f32.mrf.mxu0  ;;  %v2243_v22 = vadd.f32 %v2242_v15, %v2241_v9  ;;  %v2264_v23 = vadd.f32 %v2263_v16, %v2262_v11 }
 0x191   : > { %v2084_v3 = vadd.f32 %v2083_v48, %v1798_v62  ;;  %v1799_v5 = vmax.f32 %v1287_v63, 0.0  ;;  %v1289_v7 = vadd.f32 %v1288_v1, %v4611_v56  ;;  %v4143_v62 = vld [vmem:[%s5549_s2 + $0x64] ss:$8 sps:$4 sm:$0xff]  }
 0x192   : > { %v1290_v8 = vpop.f32.mrf.mxu0  ;;  %v4848_v27 = vadd.f32 %v2264_v23, %v2243_v22  ;;  %2496 = vmatprep.subr.bf16.mxu1 %v4143_v62 }
 0x193   : > { %v2064_v12 = vadd.f32 %v2063_v61, %v1799_v5  ;;  %v1800_v13 = vmax.f32 %v1289_v7, 0.0  ;;  %v1291_v14 = vadd.f32 %v1290_v8, %v4607_v54  ;;  %v4141_v61 = vld [vmem:[%s5549_s2 + $0x60] ss:$8 sps:$4 sm:$0xff]  }
 0x194   : > { %v1292_v55 = vpop.f32.mrf.mxu0  ;;  %2497 = vmatpush1.bf16.msra.mxu1 %v4141_v61 }
 0x195   : > { %v2085_v0 = vadd.f32 %v2084_v3, %v1800_v13  ;;  %v1801_v20 = vmax.f32 %v1291_v14, 0.0  ;;  %v1293_v21 = vadd.f32 %v1292_v55, %v4611_v56 }
 0x196   : > { %v1296_v18 = vpop.f32.mrf.mxu0  ;;  %3787 = vmatmul.mubr.msk.bf16.gmra.mxu0 %vm842_vm1, %v4136_v44 }
 0x197   : > { %v2065_v6 = vadd.f32 %v2064_v12, %v1801_v20  ;;  %v1802_v24 = vmax.f32 %v1293_v21, 0.0  ;;  %v1297_v26 = vadd.f32 %v1296_v18, %v4607_v54  ;;  %1544 = vmatprep.mubr.bf16.mxu0 %v4354_v4 }
 0x198   : > { %v1298_v10 = vpop.f32.mrf.mxu0 }
 0x199   : > { %v2086_v28 = vadd.f32 %v2085_v0, %v1802_v24  ;;  %v1803_v34 = vmax.f32 %v1297_v26, 0.0  ;;  %v1299_v29 = vadd.f32 %v1298_v10, %v4611_v56 }
 0x19a   : > { %v1300_v30 = vpop.f32.mrf.mxu0 }
 0x19b   : > { %v2066_v35 = vadd.f32 %v2065_v6, %v1803_v34  ;;  %v1804_v36 = vmax.f32 %v1299_v29, 0.0  ;;  %v1301_v38 = vadd.f32 %v1300_v30, %v4607_v54 }
 0x19c   : > { %v1302_v39 = vpop.f32.mrf.mxu0 }
 0x19d   : > { %v2087_v58 = vadd.f32 %v2086_v28, %v1804_v36  ;;  %v1805_v17 = vmax.f32 %v1301_v38, 0.0  ;;  %v1303_v25 = vadd.f32 %v1302_v39, %v4611_v56 }
 0x19e   : > { %v1306_v40 = vpop.f32.mrf.mxu0  ;;  %3788 = vmatmul.mubr.msk.bf16.gmra.mxu0 %vm842_vm1, %v4137_v31 }
 0x19f   : > { %v2067_v41 = vadd.f32 %v2066_v35, %v1805_v17  ;;  %v1806_v42 = vmax.f32 %v1303_v25, 0.0  ;;  %v1307_v45 = vadd.f32 %v1306_v40, %v4607_v54 }
 0x1a0   : > { %v1308_v46 = vpop.f32.mrf.mxu0 }
 0x1a1   : > { %v2088_v47 = vadd.f32 %v2087_v58, %v1806_v42  ;;  %v1807_v48 = vmax.f32 %v1307_v45, 0.0  ;;  %v1309_v33 = vadd.f32 %v1308_v46, %v4611_v56 }
 0x1a2   : > { %v1310_v51 = vpop.f32.mrf.mxu0 }
 0x1a3   : > { %v2068_v52 = vadd.f32 %v2067_v41, %v1807_v48  ;;  %v1808_v57 = vmax.f32 %v1309_v33, 0.0  ;;  %v1311_v59 = vadd.f32 %v1310_v51, %v4607_v54 }
 0x1a4   : > { %v1312_v63 = vpop.f32.mrf.mxu0 }
 0x1a5   : > { %v2089_v1 = vadd.f32 %v2088_v47, %v1808_v57  ;;  %v1809_v2 = vmax.f32 %v1311_v59, 0.0  ;;  %v1313_v43 = vadd.f32 %v1312_v63, %v4611_v56 }
 0x1a6   : > { %v1316_v3 = vpop.f32.mrf.mxu0 }
 0x1a7   : > { %v2069_v5 = vadd.f32 %v2068_v52, %v1809_v2  ;;  %v1810_v7 = vmax.f32 %v1313_v43, 0.0  ;;  %v1317_v8 = vadd.f32 %v1316_v3, %v4607_v54 }
 0x1a8   : > { %v1318_v44 = vpop.f32.mrf.mxu0 }
 0x1a9   : > { %v2070_v9 = vrot.slane %v2069_v5, 4  ;;  %v2090_v11 = vadd.f32 %v2089_v1, %v1810_v7  ;;  %v1319_v12 = vadd.f32 %v1318_v44, %v4611_v56  ;;  %v1811_v55 = vmax.f32 %v1317_v8, 0.0 }
 0x1aa   : > { %v1320_v13 = vpop.f32.mrf.mxu0 }
 0x1ab   : > { %v2071_v14 = vadd.f32 %v2070_v9, %v2069_v5  ;;  %v2091_v37 = vrot.slane %v2090_v11, 4  ;;  %v1321_v60 = vadd.f32 %v1320_v13, %v4607_v54  ;;  %v1812_v18 = vmax.f32 %v1319_v12, 0.0 }
 0x1ac   : > { %v1322_v15 = vpop.f32.mrf.mxu0 }
 0x1ad   : > { %v2072_v16 = vrot.slane %v2071_v14, 2  ;;  %v2092_v0 = vadd.f32 %v2091_v37, %v2090_v11  ;;  %v1813_v20 = vmax.f32 %v1321_v60, 0.0  ;;  %v1323_v21 = vadd.f32 %v1322_v15, %v4611_v56 }
 0x1ae   : > { %v1326_v22 = vpop.f32.mrf.mxu0 }
 0x1af   : > { %v2073_v23 = vadd.f32 %v2072_v16, %v2071_v14  ;;  %v2093_v6 = vrot.slane %v2092_v0, 2  ;;  %v2097_v24 = vadd.f32 %v1813_v20, %v1811_v55  ;;  %v1814_v26 = vmax.f32 %v1323_v21, 0.0 }
 0x1b0   : > { %v1327_v10 = vadd.f32 %v1326_v22, %v4607_v54  ;;  %v1328_v28 = vpop.f32.mrf.mxu0 }
 0x1b1   : > { %v2074_v34 = vrot.slane %v2073_v23, 1  ;;  %v2094_v29 = vadd.f32 %v2093_v6, %v2092_v0  ;;  %v2118_v30 = vadd.f32 %v1814_v26, %v1812_v18  ;;  %v1329_v31 = vadd.f32 %v1328_v28, %v4611_v56  ;;  %v4146_v26 = vld [vmem:[%s5549_s2 + $0x54] ss:$8 sps:$4 sm:$0xff]   ;;  %v4149_v28 = vld [vmem:[%s5549_s2 + $0x44] ss:$8 sps:$4 sm:$0xff]  }
 0x1b2   : > { %v1815_v35 = vmax.f32 %v1327_v10, 0.0  ;;  %v1330_v36 = vpop.f32.mrf.mxu0  ;;  %2498 = vmatprep.subr.bf16.mxu1 %v4146_v26 }
 0x1b3   : > { %v2095_v38 = vrot.slane %v2094_v29, 1  ;;  %v1816_v39 = vmax.f32 %v1329_v31, 0.0  ;;  %v1331_v58 = vadd.f32 %v1330_v36, %v4607_v54  ;;  %v2075_v17 = vadd.f32 %v2074_v34, %v2073_v23  ;;  %v4147_v36 = vld [vmem:[%s5549_s2 + $0x40] ss:$8 sps:$4 sm:$0xff]  }
 0x1b4   : > { %v2098_v25 = vadd.f32 %v2097_v24, %v1815_v35  ;;  %v1332_v40 = vpop.f32.mrf.mxu0  ;;  %v4144_v24 = vld [vmem:[%s5549_s2 + $0x50] ss:$8 sps:$4 sm:$0xff]  }
 0x1b5   : > { %v2096_v41 = vadd.f32 %v2095_v38, %v2094_v29  ;;  %v2119_v42 = vadd.f32 %v2118_v30, %v1816_v39  ;;  %v1817_v45 = vmax.f32 %v1331_v58, 0.0  ;;  %v1333_v46 = vadd.f32 %v1332_v40, %v4611_v56  ;;  %2499 = vmatpush1.bf16.msra.mxu1 %v4144_v24 }
 0x1b6   : > { %v1336_v47 = vpop.f32.mrf.mxu0  ;;  %2500 = vmatprep.subr.bf16.mxu1 %v4149_v28 }
 0x1b7   : > { %v2309_v48 = vadd.f32 %v2096_v41, %v2075_v17  ;;  %v2099_v33 = vadd.f32 %v2098_v25, %v1817_v45  ;;  %v1818_v51 = vmax.f32 %v1333_v46, 0.0  ;;  %v1337_v52 = vadd.f32 %v1336_v47, %v4607_v54  ;;  %v4900_v41 = vpop.f32.mrf.mxu1 }
 0x1b8   : > { %v1338_v57 = vpop.f32.mrf.mxu0 }
 0x1b9   : > { %v2317_v59 = vmul.f32 0.00390625, %v2309_v48  ;;  %v2120_v61 = vadd.f32 %v2119_v42, %v1818_v51  ;;  %v1819_v62 = vmax.f32 %v1337_v52, 0.0  ;;  %v1339_v63 = vadd.f32 %v1338_v57, %v4611_v56  ;;  %2501 = vmatpush1.bf16.msra.mxu1 %v4147_v36  ;;  %v4904_v57 = vpop.f32.mrf.mxu1 }
 0x1ba   : > { %v1340_v1 = vpop.f32.mrf.mxu0 }
 0x1bb   : > { %v2331_v2 = vmul.f32 %v4752_v32, %v2317_v59  ;;  %v2100_v43 = vadd.f32 %v2099_v33, %v1819_v62  ;;  %v1820_v3 = vmax.f32 %v1339_v63, 0.0  ;;  %v1341_v5 = vadd.f32 %v1340_v1, %v4607_v54 }
 0x1bc   : > { %v1342_v7 = vpop.f32.mrf.mxu0 }
 0x1bd   : > { %v2345_v8 = vadd.f32 %v4767_v49, %v2331_v2  ;;  %v2121_v44 = vadd.f32 %v2120_v61, %v1820_v3  ;;  %v1821_v9 = vmax.f32 %v1341_v5, 0.0  ;;  %v1343_v11 = vadd.f32 %v1342_v7, %v4611_v56  ;;  %v4908_v5 = vpop.f32.mrf.mxu1 }
 0x1be   : > { %v1346_v12 = vpop.f32.mrf.mxu0 }
 0x1bf   : > { %v2353_v13 = vpack.c.bf16 %v2345_v8, %v2345_v8  ;;  %v2101_v14 = vadd.f32 %v2100_v43, %v1821_v9  ;;  %v1822_v37 = vmax.f32 %v1343_v11, 0.0  ;;  %v1347_v60 = vadd.f32 %v1346_v12, %v4607_v54  ;;  %v4150_v11 = vld [vmem:[%s5549_s2 + $0x30] ss:$8 sps:$4 sm:$0xff]   ;;  %v4152_v12 = vld [vmem:[%s5549_s2 + $0x34] ss:$8 sps:$4 sm:$0xff]  }
 0x1c0   : > { %v1348_v55 = vpop.f32.mrf.mxu0  ;;  %2502 = vmatprep.subr.bf16.mxu1 %v4152_v12 }
 0x1c1   : > { %v2385_v15 = vunpack.c.l.b16 %v2353_v13  ;;  %v2122_v16 = vadd.f32 %v2121_v44, %v1822_v37  ;;  %v1823_v0 = vmax.f32 %v1347_v60, 0.0  ;;  %v1349_v20 = vadd.f32 %v1348_v55, %v4611_v56  ;;  %v4918_v55 = vpop.f32.mrf.mxu1  ;;  %2503 = vmatpush1.bf16.msra.mxu1 %v4150_v11 }
 0x1c2   : > { %v1350_v21 = vpop.f32.mrf.mxu0 }
 0x1c3   : > { %v2394_v18 = vrot.slane %v2385_v15, 6  ;;  %v2102_v22 = vadd.f32 %v2101_v14, %v1823_v0  ;;  %v1824_v23 = vmax.f32 %v1349_v20, 0.0  ;;  %v1351_v6 = vadd.f32 %v1350_v21, %v4607_v54 }
 0x1c4   : > { %v1352_v10 = vpop.f32.mrf.mxu0 }
 0x1c5   : > { %v4892_v34 = vsel %vm2395_vm3, %v2394_v18, %v4820_v19  ;;  %v2123_v29 = vadd.f32 %v2122_v16, %v1824_v23  ;;  %v1825_v30 = vmax.f32 %v1351_v6, 0.0  ;;  %v1353_v31 = vadd.f32 %v1352_v10, %v4611_v56  ;;  %v4922_v6 = vpop.f32.mrf.mxu1 }
 0x1c6   : > { %v1356_v35 = vpop.f32.mrf.mxu0 }
 0x1c7   : > { %v2103_v38 = vadd.f32 %v2102_v22, %v1825_v30  ;;  %v1826_v39 = vmax.f32 %v1353_v31, 0.0  ;;  %v1357_v58 = vadd.f32 %v1356_v35, %v4607_v54  ;;  %v4926_v36 = vpop.f32.mrf.mxu1 }
 0x1c8   : > { %v1358_v17 = vpop.f32.mrf.mxu0 }
 0x1c9   : > { %v2124_v25 = vadd.f32 %v2123_v29, %v1826_v39  ;;  %v1827_v19 = vmax.f32 %v1357_v58, 0.0  ;;  %v1359_v40 = vadd.f32 %v1358_v17, %v4611_v56 }
 0x1ca   : > { %v1360_v42 = vpop.f32.mrf.mxu0 }
 0x1cb   : > { %v2104_v45 = vadd.f32 %v2103_v38, %v1827_v19  ;;  %v1828_v46 = vmax.f32 %v1359_v40, 0.0  ;;  %v1361_v47 = vadd.f32 %v1360_v42, %v4607_v54 }
 0x1cc   : > { %v1362_v48 = vpop.f32.mrf.mxu0 }
 0x1cd   : > { %v2125_v33 = vadd.f32 %v2124_v25, %v1828_v46  ;;  %v1829_v51 = vmax.f32 %v1361_v47, 0.0  ;;  %v1363_v52 = vadd.f32 %v1362_v48, %v4611_v56 }
 0x1ce   : > { %v1366_v59 = vpop.f32.mrf.mxu0 }
 0x1cf   : > { %v2105_v61 = vadd.f32 %v2104_v45, %v1829_v51  ;;  %v1830_v62 = vmax.f32 %v1363_v52, 0.0  ;;  %v1367_v63 = vadd.f32 %v1366_v59, %v4607_v54  ;;  %v4930_v45 = vpop.f32.mrf.mxu1  ;;  %v4153_v51 = vld [vmem:[%s5549_s2 + $0x20] ss:$8 sps:$4 sm:$0xff]   ;;  %v4155_v52 = vld [vmem:[%s5549_s2 + $0x24] ss:$8 sps:$4 sm:$0xff]  }
 0x1d0   : > { %v1368_v1 = vpop.f32.mrf.mxu0  ;;  %2504 = vmatprep.subr.bf16.mxu1 %v4155_v52 }
 0x1d1   : > { %v2126_v2 = vadd.f32 %v2125_v33, %v1830_v62  ;;  %v1831_v43 = vmax.f32 %v1367_v63, 0.0  ;;  %v1369_v3 = vadd.f32 %v1368_v1, %v4611_v56  ;;  %v4940_v1 = vpop.f32.mrf.mxu1  ;;  %2505 = vmatpush1.bf16.msra.mxu1 %v4153_v51 }
 0x1d2   : > { %v1370_v7 = vpop.f32.mrf.mxu0 }
 0x1d3   : > { %v2106_v8 = vadd.f32 %v2105_v61, %v1831_v43  ;;  %v1832_v44 = vmax.f32 %v1369_v3, 0.0  ;;  %v1371_v9 = vadd.f32 %v1370_v7, %v4607_v54  ;;  %v4943_v11 = vpop.f32.mrf.mxu1 }
 0x1d4   : > { %v1372_v13 = vpop.f32.mrf.mxu0 }
 0x1d5   : > { %v2127_v14 = vadd.f32 %v2126_v2, %v1832_v44  ;;  %v1833_v37 = vmax.f32 %v1371_v9, 0.0  ;;  %v1373_v60 = vadd.f32 %v1372_v13, %v4611_v56 }
 0x1d6   : > { %v1376_v15 = vpop.f32.mrf.mxu0 }
 0x1d7   : > { %v2107_v16 = vadd.f32 %v2106_v8, %v1833_v37  ;;  %v1834_v0 = vmax.f32 %v1373_v60, 0.0  ;;  %v1377_v20 = vadd.f32 %v1376_v15, %v4607_v54 }
 0x1d8   : > { %v1378_v21 = vpop.f32.mrf.mxu0 }
 0x1d9   : > { %v2128_v18 = vadd.f32 %v2127_v14, %v1834_v0  ;;  %v1835_v22 = vmax.f32 %v1377_v20, 0.0  ;;  %v1379_v23 = vadd.f32 %v1378_v21, %v4611_v56 }
 0x1da   : > { %v1380_v24 = vpop.f32.mrf.mxu0 }
 0x1db   : > { %v2108_v26 = vadd.f32 %v2107_v16, %v1835_v22  ;;  %v1836_v10 = vmax.f32 %v1379_v23, 0.0  ;;  %v1381_v28 = vadd.f32 %v1380_v24, %v4607_v54  ;;  %v4948_v22 = vpop.f32.mrf.mxu1 }
 0x1dc   : > { %v1382_v29 = vpop.f32.mrf.mxu0 }
 0x1dd   : > { %v2129_v30 = vadd.f32 %v2128_v18, %v1836_v10  ;;  %v1837_v31 = vmax.f32 %v1381_v28, 0.0  ;;  %v1383_v35 = vadd.f32 %v1382_v29, %v4611_v56 }
 0x1de   : > { %v1386_v38 = vpop.f32.mrf.mxu0 }
 0x1df   : > { %v2109_v39 = vadd.f32 %v2108_v26, %v1837_v31  ;;  %v1838_v58 = vmax.f32 %v1383_v35, 0.0  ;;  %v1387_v17 = vadd.f32 %v1386_v38, %v4607_v54 }
 0x1e0   : > { %v1388_v25 = vpop.f32.mrf.mxu0 }
 0x1e1   : > { %v2130_v19 = vadd.f32 %v2129_v30, %v1838_v58  ;;  %v1839_v40 = vmax.f32 %v1387_v17, 0.0  ;;  %v1389_v42 = vadd.f32 %v1388_v25, %v4611_v56  ;;  %v4952_v17 = vpop.f32.mrf.mxu1 }
 0x1e2   : > { %v1390_v46 = vpop.f32.mrf.mxu0 }
 0x1e3   : > { %v2110_v47 = vadd.f32 %v2109_v39, %v1839_v40  ;;  %v1840_v48 = vmax.f32 %v1389_v42, 0.0  ;;  %v1391_v33 = vadd.f32 %v1390_v46, %v4607_v54 }
 0x1e4   : > { %v1392_v59 = vpop.f32.mrf.mxu0 }
 0x1e5   : > { %v2131_v61 = vadd.f32 %v2130_v19, %v1840_v48  ;;  %v1841_v62 = vmax.f32 %v1391_v33, 0.0  ;;  %v1393_v63 = vadd.f32 %v1392_v59, %v4611_v56 }
 0x1e6   : > { %v1396_v2 = vpop.f32.mrf.mxu0 }
 0x1e7   : > { %v2111_v43 = vadd.f32 %v2110_v47, %v1841_v62  ;;  %v1842_v3 = vmax.f32 %v1393_v63, 0.0  ;;  %v1397_v7 = vadd.f32 %v1396_v2, %v4607_v54  ;;  %v4956_v62 = vpop.f32.mrf.mxu1 }
 0x1e8   : > { %v1398_v8 = vpop.f32.mrf.mxu0 }
 0x1e9   : > { %v2112_v44 = vrot.slane %v2111_v43, 4  ;;  %v2132_v9 = vadd.f32 %v2131_v61, %v1842_v3  ;;  %v1399_v12 = vadd.f32 %v1398_v8, %v4611_v56  ;;  %v1843_v15 = vmax.f32 %v1397_v7, 0.0 }
 0x1ea   : > { %v1400_v13 = vpop.f32.mrf.mxu0 }
 0x1eb   : > { %v2113_v14 = vadd.f32 %v2112_v44, %v2111_v43  ;;  %v2133_v37 = vrot.slane %v2132_v9, 4  ;;  %v1401_v60 = vadd.f32 %v1400_v13, %v4607_v54  ;;  %v1844_v23 = vmax.f32 %v1399_v12, 0.0 }
 0x1ec   : > { %v1402_v16 = vpop.f32.mrf.mxu0 }
 0x1ed   : > { %v2114_v0 = vrot.slane %v2113_v14, 2  ;;  %v2134_v20 = vadd.f32 %v2133_v37, %v2132_v9  ;;  %v1845_v21 = vmax.f32 %v1401_v60, 0.0  ;;  %v1403_v18 = vadd.f32 %v1402_v16, %v4611_v56 }
 0x1ee   : > { %v1406_v24 = vpop.f32.mrf.mxu0 }
 0x1ef   : > { %v2115_v26 = vadd.f32 %v2114_v0, %v2113_v14  ;;  %v2135_v10 = vrot.slane %v2134_v20, 2  ;;  %v2139_v28 = vadd.f32 %v1845_v21, %v1843_v15  ;;  %v1846_v29 = vmax.f32 %v1403_v18, 0.0  ;;  %v4960_v14 = vpop.f32.mrf.mxu1 }
 0x1f0   : > { %v1407_v30 = vadd.f32 %v1406_v24, %v4607_v54  ;;  %v1408_v31 = vpop.f32.mrf.mxu0 }
 0x1f1   : > { %v2116_v35 = vrot.slane %v2115_v26, 1  ;;  %v2136_v38 = vadd.f32 %v2135_v10, %v2134_v20  ;;  %v2160_v39 = vadd.f32 %v1846_v29, %v1844_v23  ;;  %v1409_v58 = vadd.f32 %v1408_v31, %v4611_v56 }
 0x1f2   : > { %v1847_v25 = vmax.f32 %v1407_v30, 0.0  ;;  %v1410_v19 = vpop.f32.mrf.mxu0 }
 0x1f3   : > { %v2137_v40 = vrot.slane %v2136_v38, 1  ;;  %v1848_v42 = vmax.f32 %v1409_v58, 0.0  ;;  %v1411_v46 = vadd.f32 %v1410_v19, %v4607_v54  ;;  %v2117_v47 = vadd.f32 %v2116_v35, %v2115_v26  ;;  %v4966_v26 = vpop.f32.mrf.mxu1 }
 0x1f4   : > { %v2140_v48 = vadd.f32 %v2139_v28, %v1847_v25  ;;  %v1412_v33 = vpop.f32.mrf.mxu0 }
 0x1f5   : > { %v2138_v51 = vadd.f32 %v2137_v40, %v2136_v38  ;;  %v2161_v52 = vadd.f32 %v2160_v39, %v1848_v42  ;;  %v1849_v59 = vmax.f32 %v1411_v46, 0.0  ;;  %v1413_v61 = vadd.f32 %v1412_v33, %v4611_v56  ;;  %v4970_v25 = vpop.f32.mrf.mxu1  ;;  %v4156_v40 = vld [vmem:[%s5549_s2 + $0x10] ss:$8 sps:$4 sm:$0xff]   ;;  %v4161_v33 = vld [vmem:[%s5549_s2 + $0x4] ss:$8 sps:$4 sm:$0xff]  }
 0x1f6   : > { %v1416_v63 = vpop.f32.mrf.mxu0 }
 0x1f7   : > { %v2310_v2 = vadd.f32 %v2138_v51, %v2117_v47  ;;  %v2141_v43 = vadd.f32 %v2140_v48, %v1849_v59  ;;  %v1850_v3 = vmax.f32 %v1413_v61, 0.0  ;;  %v1417_v7 = vadd.f32 %v1416_v63, %v4607_v54 }
 0x1f8   : > { %v1418_v8 = vpop.f32.mrf.mxu0 }
 0x1f9   : > { %v2318_v44 = vmul.f32 0.00390625, %v2310_v2  ;;  %v2162_v9 = vadd.f32 %v2161_v52, %v1850_v3  ;;  %v1851_v12 = vmax.f32 %v1417_v7, 0.0  ;;  %v1419_v13 = vadd.f32 %v1418_v8, %v4611_v56  ;;  %v4159_v52 = vld [vmem:[%s5549_s2] ss:$8 sps:$4 sm:$0xff]   ;;  %v4986_v2 = vpop.f32.mrf.mxu1 }
 0x1fa   : > { %v1420_v37 = vpop.f32.mrf.mxu0 }
 0x1fb   : > { %v2332_v60 = vmul.f32 %v4752_v32, %v2318_v44  ;;  %v2142_v15 = vadd.f32 %v2141_v43, %v1851_v12  ;;  %v1852_v16 = vmax.f32 %v1419_v13, 0.0  ;;  %v1421_v0 = vadd.f32 %v1420_v37, %v4607_v54 }
 0x1fc   : > { %v1422_v20 = vpop.f32.mrf.mxu0 }
 0x1fd   : > { %v2346_v21 = vadd.f32 %v4767_v49, %v2332_v60  ;;  %v2163_v18 = vadd.f32 %v2162_v9, %v1852_v16  ;;  %v1853_v23 = vmax.f32 %v1421_v0, 0.0  ;;  %v1423_v24 = vadd.f32 %v1422_v20, %v4611_v56  ;;  %v4158_v49 = vld [vmem:[%s5549_s2 + $0x14] ss:$8 sps:$4 sm:$0xff]   ;;  %v4993_v60 = vpop.f32.mrf.mxu1 }
 0x1fe   : > { %v1426_v10 = vpop.f32.mrf.mxu0  ;;  %2506 = vmatprep.subr.bf16.mxu1 %v4158_v49 }
 0x1ff   : > { %v2354_v28 = vpack.c.bf16 %v2346_v21, %v2346_v21  ;;  %v2143_v29 = vadd.f32 %v2142_v15, %v1853_v23  ;;  %v1854_v30 = vmax.f32 %v1423_v24, 0.0  ;;  %v1427_v31 = vadd.f32 %v1426_v10, %v4607_v54  ;;  %2507 = vmatpush1.bf16.msra.mxu1 %v4156_v40 }
 0x200   : > { %v1428_v32 = vpop.f32.mrf.mxu0  ;;  %2508 = vmatprep.subr.bf16.mxu1 %v4161_v33  ;;  %v1641_v21 = vadd.f32 %v4908_v5, %v4607_v54 }
 0x201   : > { %v2386_v35 = vunpack.c.l.b16 %v2354_v28  ;;  %v2164_v38 = vadd.f32 %v2163_v18, %v1854_v30  ;;  %v1855_v39 = vmax.f32 %v1427_v31, 0.0  ;;  %v1429_v58 = vadd.f32 %v1428_v32, %v4611_v56  ;;  %v5001_v28 = vpop.f32.mrf.mxu1 }
 0x202   : > { %v1430_v19 = vpop.f32.mrf.mxu0  ;;  %v1643_v30 = vadd.f32 %v4918_v55, %v4611_v56  ;;  %v1941_v5 = vmax.f32 %v1641_v21, 0.0  ;;  %v1649_v55 = vadd.f32 %v4926_v36, %v4611_v56  ;;  %v1653_v36 = vadd.f32 %v4940_v1, %v4611_v56 }
 0x203   : > { %v2397_v42 = vrot.slane %v2386_v35, 5  ;;  %v2144_v46 = vadd.f32 %v2143_v29, %v1855_v39  ;;  %v1856_v47 = vmax.f32 %v1429_v58, 0.0  ;;  %v1431_v48 = vadd.f32 %v1430_v19, %v4607_v54  ;;  %2509 = vmatpush1.bf16.msra.mxu1 %v4159_v52 }
 0x204   : > { %v1432_v51 = vpop.f32.mrf.mxu0  ;;  %v1639_v29 = vadd.f32 %v4904_v57, %v4611_v56  ;;  %v1647_v39 = vadd.f32 %v4922_v6, %v4607_v54  ;;  %v1651_v6 = vadd.f32 %v4930_v45, %v4607_v54  ;;  %v1657_v45 = vadd.f32 %v4943_v11, %v4607_v54 }
 0x205   : > { %v2165_v59 = vadd.f32 %v2164_v38, %v1856_v47  ;;  %v1857_v61 = vmax.f32 %v1431_v48, 0.0  ;;  %v1433_v63 = vadd.f32 %v1432_v51, %v4611_v56  ;;  %v4989_v43 = vsel %vm2398_vm4, %v2397_v42, %v4892_v34  ;;  %v5011_v42 = vpop.f32.mrf.mxu1 }
 0x206   : > { %v1436_v3 = vpop.f32.mrf.mxu0  ;;  %v1637_v34 = vadd.f32 %v4900_v41, %v4607_v54  ;;  %v1940_v57 = vmax.f32 %v1639_v29, 0.0  ;;  %v1659_v1 = vadd.f32 %v4948_v22, %v4611_v56  ;;  %v1661_v11 = vadd.f32 %v4952_v17, %v4607_v54 }
 0x207   : > { %v2145_v7 = vadd.f32 %v2144_v46, %v1857_v61  ;;  %v1858_v8 = vmax.f32 %v1433_v63, 0.0  ;;  %v1437_v44 = vadd.f32 %v1436_v3, %v4607_v54  ;;  %v1942_v46 = vmax.f32 %v1643_v30, 0.0 }
 0x208   : > { %v1438_v9 = vpop.f32.mrf.mxu0  ;;  %v1939_v38 = vmax.f32 %v1637_v34, 0.0  ;;  %v1663_v22 = vadd.f32 %v4956_v62, %v4611_v56  ;;  %v1667_v17 = vadd.f32 %v4960_v14, %v4607_v54  ;;  %v1669_v62 = vadd.f32 %v4966_v26, %v4611_v56 }
 0x209   : > { %v2166_v12 = vadd.f32 %v2165_v59, %v1858_v8  ;;  %v1859_v13 = vmax.f32 %v1437_v44, 0.0  ;;  %v1439_v37 = vadd.f32 %v1438_v9, %v4611_v56  ;;  %v1943_v59 = vmax.f32 %v1647_v39, 0.0  ;;  %v5019_v8 = vpop.f32.mrf.mxu1 }
 0x20a   : > { %v1440_v15 = vpop.f32.mrf.mxu0  ;;  %v2265_v52 = vadd.f32 %v1941_v5, %v1939_v38  ;;  %v2286_v44 = vadd.f32 %v1942_v46, %v1940_v57  ;;  %v1944_v9 = vmax.f32 %v1649_v55, 0.0  ;;  %v1671_v14 = vadd.f32 %v4970_v25, %v4607_v54 }
 0x20b   : > { %v2146_v16 = vadd.f32 %v2145_v7, %v1859_v13  ;;  %v1860_v0 = vmax.f32 %v1439_v37, 0.0  ;;  %v1441_v20 = vadd.f32 %v1440_v15, %v4607_v54  ;;  %v1673_v26 = vadd.f32 %v4986_v2, %v4611_v56 }
 0x20c   : > { %v1442_v18 = vpop.f32.mrf.mxu0  ;;  %v1677_v25 = vadd.f32 %v4993_v60, %v4607_v54 }
 0x20d   : > { %v2167_v23 = vadd.f32 %v2166_v12, %v1860_v0  ;;  %v1861_v24 = vmax.f32 %v1441_v20, 0.0  ;;  %v1443_v10 = vadd.f32 %v1442_v18, %v4611_v56  ;;  %v1945_v0 = vmax.f32 %v1651_v6, 0.0 }
 0x20e   : > { %v1446_v31 = vpop.f32.mrf.mxu0 }
 0x20f   : > { %v2147_v32 = vadd.f32 %v2146_v16, %v1861_v24  ;;  %v1862_v35 = vmax.f32 %v1443_v10, 0.0  ;;  %v1447_v41 = vadd.f32 %v1446_v31, %v4607_v54  ;;  %v2266_v16 = vadd.f32 %v2265_v52, %v1943_v59 }
 0x210   : > { %v1448_v58 = vpop.f32.mrf.mxu0  ;;  %v2287_v24 = vadd.f32 %v2286_v44, %v1944_v9  ;;  %v1946_v10 = vmax.f32 %v1653_v36, 0.0 }
 0x211   : > { %v2168_v49 = vadd.f32 %v2167_v23, %v1862_v35  ;;  %v1863_v19 = vmax.f32 %v1447_v41, 0.0  ;;  %v1449_v40 = vadd.f32 %v1448_v58, %v4611_v56  ;;  %v5027_v23 = vpop.f32.mrf.mxu1  ;;  %v2267_v35 = vadd.f32 %v2266_v16, %v1945_v0 }
 0x212   : > { %v1450_v47 = vpop.f32.mrf.mxu0  ;;  %v1947_v41 = vmax.f32 %v1657_v45, 0.0 }
 0x213   : > { %v2148_v48 = vadd.f32 %v2147_v32, %v1863_v19  ;;  %v1864_v33 = vmax.f32 %v1449_v40, 0.0  ;;  %v1451_v51 = vadd.f32 %v1450_v47, %v4607_v54  ;;  %v2288_v19 = vadd.f32 %v2287_v24, %v1946_v10 }
 0x214   : > { %v1452_v61 = vpop.f32.mrf.mxu0  ;;  %v1948_v40 = vmax.f32 %v1659_v1, 0.0  ;;  %v1953_v1 = vmax.f32 %v1671_v14, 0.0 }
 0x215   : > { %v2169_v63 = vadd.f32 %v2168_v49, %v1864_v33  ;;  %v1865_v3 = vmax.f32 %v1451_v51, 0.0  ;;  %v1453_v7 = vadd.f32 %v1452_v61, %v4611_v56  ;;  %v5035_v49 = vpop.f32.mrf.mxu1  ;;  %v1949_v33 = vmax.f32 %v1661_v11, 0.0 }
 0x216   : > { %v1456_v12 = vpop.f32.mrf.mxu0  ;;  %v1679_v11 = vadd.f32 %v5001_v28, %v4611_v56 }
 0x217   : > { %v2149_v13 = vadd.f32 %v2148_v48, %v1865_v3  ;;  %v1866_v37 = vmax.f32 %v1453_v7, 0.0  ;;  %v1457_v15 = vadd.f32 %v1456_v12, %v4607_v54  ;;  %v2268_v48 = vadd.f32 %v2267_v35, %v1947_v41  ;;  %v1690_v61 = vpop.f32.mrf.mxu1 }
 0x218   : > { %v1458_v20 = vpop.f32.mrf.mxu0  ;;  %v1950_v3 = vmax.f32 %v1663_v22, 0.0  ;;  %v1954_v41 = vmax.f32 %v1673_v26, 0.0 }
 0x219   : > { %v2170_v34 = vadd.f32 %v2169_v63, %v1866_v37  ;;  %v1867_v21 = vmax.f32 %v1457_v15, 0.0  ;;  %v1459_v18 = vadd.f32 %v1458_v20, %v4611_v56  ;;  %v2289_v63 = vadd.f32 %v2288_v19, %v1948_v40  ;;  %v1692_v45 = vpop.f32.mrf.mxu1 }
 0x21a   : > { %v1460_v29 = vpop.f32.mrf.mxu0  ;;  %v2269_v12 = vadd.f32 %v2268_v48, %v1949_v33  ;;  %v1681_v19 = vadd.f32 %v5011_v42, %v4607_v54 }
 0x21b   : > { %v2150_v30 = vadd.f32 %v2149_v13, %v1867_v21  ;;  %v1868_v31 = vmax.f32 %v1459_v18, 0.0  ;;  %v1461_v32 = vadd.f32 %v1460_v29, %v4607_v54  ;;  %v1951_v13 = vmax.f32 %v1667_v17, 0.0 }
 0x21c   : > { %v1462_v38 = vpop.f32.mrf.mxu0  ;;  %v2290_v20 = vadd.f32 %v2289_v63, %v1950_v3 }
 0x21d   : > { %v2171_v5 = vadd.f32 %v2170_v34, %v1868_v31  ;;  %v1869_v39 = vmax.f32 %v1461_v32, 0.0  ;;  %v1463_v58 = vadd.f32 %v1462_v38, %v4611_v56  ;;  %v1952_v34 = vmax.f32 %v1669_v62, 0.0  ;;  %v1696_v32 = vpop.f32.mrf.mxu1 }
 0x21e   : > { %v1466_v57 = vpop.f32.mrf.mxu0  ;;  %v2270_v10 = vadd.f32 %v2269_v12, %v1951_v13  ;;  %v1691_v12 = vadd.f32 %v1690_v61, %v4607_v54 }
 0x21f   : > { %v2151_v46 = vadd.f32 %v2150_v30, %v1869_v39  ;;  %v1870_v55 = vmax.f32 %v1463_v58, 0.0  ;;  %v1467_v47 = vadd.f32 %v1466_v57, %v4607_v54  ;;  %v2291_v35 = vadd.f32 %v2290_v20, %v1952_v34  ;;  %v1698_v57 = vpop.f32.mrf.mxu1 }
 0x220   : > { %v1468_v51 = vpop.f32.mrf.mxu0  ;;  %v2271_v39 = vadd.f32 %v2270_v10, %v1953_v1  ;;  %v1955_v58 = vmax.f32 %v1677_v25, 0.0 }
 0x221   : > { %v2172_v52 = vadd.f32 %v2171_v5, %v1870_v55  ;;  %v1871_v59 = vmax.f32 %v1467_v47, 0.0  ;;  %v1469_v6 = vadd.f32 %v1468_v51, %v4611_v56  ;;  %v1956_v55 = vmax.f32 %v1679_v11, 0.0  ;;  %v1700_v63 = vpop.f32.mrf.mxu1 }
 0x222   : > { %v1470_v7 = vpop.f32.mrf.mxu0  ;;  %v1683_v47 = vadd.f32 %v5019_v8, %v4611_v56  ;;  %v2272_v17 = vadd.f32 %v2271_v39, %v1955_v58  ;;  %v1957_v51 = vmax.f32 %v1681_v19, 0.0 }
 0x223   : > { %v2152_v44 = vadd.f32 %v2151_v46, %v1871_v59  ;;  %v1872_v9 = vmax.f32 %v1469_v6, 0.0  ;;  %v1471_v36 = vadd.f32 %v1470_v7, %v4607_v54  ;;  %v2292_v46 = vadd.f32 %v2291_v35, %v1954_v41  ;;  %v5086_v35 = vld [vmem:[%s5555_s8 + $0x2] ss:$0 sm:$0xff] }
 0x224   : > { %v1472_v37 = vpop.f32.mrf.mxu0  ;;  %v1958_v62 = vmax.f32 %v1683_v47, 0.0  ;;  %v1689_v7 = vadd.f32 %v5035_v49, %v4611_v56  ;;  %v1961_v49 = vmax.f32 %v1691_v12, 0.0 }
 0x225   : > { %v2173_v15 = vadd.f32 %v2172_v52, %v1872_v9  ;;  %v1873_v16 = vmax.f32 %v1471_v36, 0.0  ;;  %v1473_v0 = vadd.f32 %v1472_v37, %v4611_v56  ;;  %v1687_v52 = vadd.f32 %v5027_v23, %v4607_v54  ;;  %v1702_v37 = vpop.f32.mrf.mxu1 }
 0x226   : > { %v5051_v21 = vpop.f32.mrf.mxu0  ;;  %v2293_v3 = vadd.f32 %v2292_v46, %v1956_v55  ;;  %v2273_v9 = vadd.f32 %v2272_v17, %v1957_v51 }
 0x227   : > { %v2153_v18 = vadd.f32 %v2152_v44, %v1873_v16  ;;  %v1874_v24 = vmax.f32 %v1473_v0, 0.0  ;;  %v1959_v36 = vmax.f32 %v1687_v52, 0.0  ;;  %v1960_v16 = vmax.f32 %v1689_v7, 0.0  ;;  %v1706_v1 = vpop.f32.mrf.mxu1 }
 0x228   : > { %v5055_v29 = vpop.f32.mrf.mxu0  ;;  %v1693_v0 = vadd.f32 %v1692_v45, %v4611_v56  ;;  %v1707_v17 = vadd.f32 %v1706_v1, %v4607_v54 }
 0x229   : > { %v2154_v30 = vrot.slane %v2153_v18, 4  ;;  %v2174_v31 = vadd.f32 %v2173_v15, %v1874_v24  ;;  %v2294_v15 = vadd.f32 %v2293_v3, %v1958_v62  ;;  %v2274_v26 = vadd.f32 %v2273_v9, %v1959_v36  ;;  %v1708_v58 = vpop.f32.mrf.mxu1 }
 0x22a   : > { %v5059_v2 = vpop.f32.mrf.mxu0  ;;  %v1962_v61 = vmax.f32 %v1693_v0, 0.0  ;;  %v1477_v36 = vadd.f32 %v5051_v21, %v4607_v54 }
 0x22b   : > { %v2155_v38 = vadd.f32 %v2154_v30, %v2153_v18  ;;  %v2175_v5 = vrot.slane %v2174_v31, 4  ;;  %v1697_v18 = vadd.f32 %v1696_v32, %v4607_v54  ;;  %v2295_v25 = vadd.f32 %v2294_v15, %v1960_v16  ;;  %v1710_v51 = vpop.f32.mrf.mxu1 }
 0x22c   : > { %v5063_v60 = vpop.f32.mrf.mxu0  ;;  %v1699_v30 = vadd.f32 %v1698_v57, %v4611_v56  ;;  %v2275_v41 = vadd.f32 %v2274_v26, %v1961_v49  ;;  %v1481_v62 = vadd.f32 %v5059_v2, %v4607_v54  ;;  %v1479_v15 = vadd.f32 %v5055_v29, %v4611_v56 }
 0x22d   : > { %v2156_v40 = vrot.slane %v2155_v38, 2  ;;  %v2176_v22 = vadd.f32 %v2175_v5, %v2174_v31  ;;  %v1963_v11 = vmax.f32 %v1697_v18, 0.0  ;;  %v5093_v5 = vld [vmem:[%s5555_s8 + $0x3] ss:$0 sm:$0xff]  ;;  %v2296_v19 = vadd.f32 %v2295_v25, %v1962_v61 }
 0x22e   : > { %v5067_v28 = vpop.f32.mrf.mxu0  ;;  %v1483_v7 = vadd.f32 %v5063_v60, %v4611_v56  ;;  %v1875_v29 = vmax.f32 %v1477_v36, 0.0  ;;  %v1876_v25 = vmax.f32 %v1479_v15, 0.0 }
 0x22f   : > { %v2157_v48 = vadd.f32 %v2156_v40, %v2155_v38  ;;  %v2177_v33 = vrot.slane %v2176_v22, 2  ;;  %v1701_v38 = vadd.f32 %v1700_v63, %v4607_v54  ;;  %v1964_v40 = vmax.f32 %v1699_v30, 0.0 }
 0x230   : > { %v5071_v42 = vpop.f32.mrf.mxu0  ;;  %v2276_v55 = vadd.f32 %v2275_v41, %v1963_v11  ;;  %v1487_v12 = vadd.f32 %v5067_v28, %v4607_v54  ;;  %v1711_v28 = vadd.f32 %v1710_v51, %v4607_v54  ;;  %v1878_v26 = vmax.f32 %v1483_v7, 0.0 }
 0x231   : > { %v2158_v59 = vrot.slane %v2157_v48, 1  ;;  %v2178_v6 = vadd.f32 %v2177_v33, %v2176_v22  ;;  %v1703_v22 = vadd.f32 %v1702_v37, %v4611_v56  ;;  %v1965_v47 = vmax.f32 %v1701_v38, 0.0 }
 0x232   : > { %v5075_v8 = vpop.f32.mrf.mxu0  ;;  %v2297_v52 = vadd.f32 %v2296_v19, %v1964_v40  ;;  %v1489_v2 = vadd.f32 %v5071_v42, %v4611_v56 }
 0x233   : > { %v2179_v44 = vrot.slane %v2178_v6, 1  ;;  %v2159_v23 = vadd.f32 %v2158_v59, %v2157_v48  ;;  %v1966_v59 = vmax.f32 %v1703_v22, 0.0  ;;  %v1491_v21 = vadd.f32 %v5075_v8, %v4607_v54 }
 0x234   : > { %v5078_v13 = vpop.f32.mrf.mxu0  ;;  %v1880_v61 = vmax.f32 %v1489_v2, 0.0 }
 0x235   : > { %v2180_v14 = vadd.f32 %v2179_v44, %v2178_v6  ;;  %v1709_v6 = vadd.f32 %v1708_v58, %v4611_v56  ;;  %v2277_v44 = vadd.f32 %v2276_v55, %v1965_v47  ;;  %v2298_v60 = vadd.f32 %v2297_v52, %v1966_v59 }
 0x236   : > { %v1496_v20 = vpop.f32.mrf.mxu0  ;;  %v1881_v11 = vmax.f32 %v1491_v21, 0.0 }
 0x237   : > { %v2311_v34 = vadd.f32 %v2180_v14, %v2159_v23  ;;  %v1967_v23 = vmax.f32 %v1707_v17, 0.0  ;;  %v1712_v14 = vpop.f32.mrf.mxu1  ;;  %v1968_v16 = vmax.f32 %v1709_v6, 0.0  ;;  %v1497_v42 = vadd.f32 %v1496_v20, %v4607_v54 }
 0x238   : > { %v1498_v24 = vpop.f32.mrf.mxu0  ;;  %v1713_v49 = vadd.f32 %v1712_v14, %v4611_v56 }
 0x239   : > { %v2319_v10 = vmul.f32 0.00390625, %v2311_v34  ;;  %v1877_v34 = vmax.f32 %v1481_v62, 0.0  ;;  %v2278_v1 = vadd.f32 %v2277_v44, %v1967_v23  ;;  %v1499_v30 = vadd.f32 %v1498_v24, %v4611_v56 }
 0x23a   : > { %v1500_v31 = vpop.f32.mrf.mxu0  ;;  %v1970_v40 = vmax.f32 %v1713_v49, 0.0  ;;  %v1883_v20 = vmax.f32 %v1497_v42, 0.0 }
 0x23b   : > { %v2333_v45 = vmul.f32 %v5086_v35, %v2319_v10  ;;  %v1879_v10 = vmax.f32 %v1487_v12, 0.0  ;;  %v2181_v41 = vadd.f32 %v1877_v34, %v1875_v29  ;;  %v1501_v38 = vadd.f32 %v1500_v31, %v4607_v54 }
 0x23c   : > { %v1502_v32 = vpop.f32.mrf.mxu0 }
 0x23d   : > { %v2347_v39 = vadd.f32 %v5093_v5, %v2333_v45  ;;  %v2299_v45 = vadd.f32 %v2298_v60, %v1968_v16  ;;  %v1503_v19 = vadd.f32 %v1502_v32, %v4611_v56  ;;  %v1885_v52 = vmax.f32 %v1501_v38, 0.0 }
 0x23e   : > { %v1506_v57 = vpop.f32.mrf.mxu0 }
 0x23f   : > { %v2355_v46 = vpack.c.bf16 %v2347_v39, %v2347_v39  ;;  %v1969_v39 = vmax.f32 %v1711_v28, 0.0  ;;  %v1507_v55 = vadd.f32 %v1506_v57, %v4607_v54  ;;  %v2300_v62 = vadd.f32 %v2299_v45, %v1970_v40 }
 0x240   : > { %v1508_v48 = vpop.f32.mrf.mxu0 }
 0x241   : > { %v2387_v33 = vunpack.c.l.b16 %v2355_v46  ;;  %v2182_v46 = vadd.f32 %v2181_v41, %v1879_v10  ;;  %v1509_v24 = vadd.f32 %v1508_v48, %v4611_v56  ;;  %v2279_v59 = vadd.f32 %v2278_v1, %v1969_v39 }
 0x242   : > { %v1510_v63 = vpop.f32.mrf.mxu0  ;;  %v1887_v36 = vmax.f32 %v1507_v55, 0.0  ;;  %v2301_v34 = vrot.slane %v2300_v62, 4 }
 0x243   : > { %v2400_v3 = vrot.slane %v2387_v33, 4  ;;  %v1884_v33 = vmax.f32 %v1499_v30, 0.0  ;;  %v2183_v51 = vadd.f32 %v2182_v46, %v1881_v11  ;;  %v1511_v31 = vadd.f32 %v1510_v63, %v4607_v54 }
 0x244   : > { %v1512_v9 = vpop.f32.mrf.mxu0  ;;  %v1888_v23 = vmax.f32 %v1509_v24, 0.0  ;;  %v2280_v2 = vrot.slane %v2279_v59, 4  ;;  %v2302_v30 = vadd.f32 %v2301_v34, %v2300_v62 }
 0x245   : > { %v5108_v37 = vsel %vm2401_vm5, %v2400_v3, %v4989_v43  ;;  %v1493_v43 = vadd.f32 %v5078_v13, %v4611_v56  ;;  %v2202_v13 = vadd.f32 %v1878_v26, %v1876_v25  ;;  %v1886_v3 = vmax.f32 %v1503_v19, 0.0 }
 0x246   : > { %v1516_v0 = vpop.f32.mrf.mxu0  ;;  %v1513_v32 = vadd.f32 %v1512_v9, %v4611_v56  ;;  %v2184_v44 = vadd.f32 %v2183_v51, %v1883_v20  ;;  %v1889_v60 = vmax.f32 %v1511_v31, 0.0  ;;  %v2281_v42 = vadd.f32 %v2280_v2, %v2279_v59 }
 0x247   : > { %v1882_v58 = vmax.f32 %v1493_v43, 0.0  ;;  %v2203_v47 = vadd.f32 %v2202_v13, %v1880_v61  ;;  %v1517_v57 = vadd.f32 %v1516_v0, %v4607_v54 }
 0x248   : > { %v1518_v18 = vpop.f32.mrf.mxu0  ;;  %v2185_v15 = vadd.f32 %v2184_v44, %v1885_v52  ;;  %v1890_v21 = vmax.f32 %v1513_v32, 0.0 }
 0x249   : > { %v2204_v6 = vadd.f32 %v2203_v47, %v1882_v58  ;;  %v1519_v48 = vadd.f32 %v1518_v18, %v4611_v56  ;;  %v1891_v43 = vmax.f32 %v1517_v57, 0.0  ;;  %v2282_v47 = vrot.slane %v2281_v42, 2 }
 0x24a   : > { %v1520_v8 = vpop.f32.mrf.mxu0  ;;  %v2186_v26 = vadd.f32 %v2185_v15, %v1887_v36 }
 0x24b   : > { %v2205_v12 = vadd.f32 %v2204_v6, %v1884_v33  ;;  %v1521_v63 = vadd.f32 %v1520_v8, %v4607_v54  ;;  %v1892_v29 = vmax.f32 %v1519_v48, 0.0  ;;  %v2303_v33 = vrot.slane %v2302_v30, 2 }
 0x24c   : > { %v1522_v22 = vpop.f32.mrf.mxu0  ;;  %v2187_v1 = vadd.f32 %v2186_v26, %v1889_v60  ;;  %v2283_v36 = vadd.f32 %v2282_v47, %v2281_v42 }
 0x24d   : > { %v2206_v16 = vadd.f32 %v2205_v12, %v1886_v3  ;;  %v1523_v9 = vadd.f32 %v1522_v22, %v4611_v56  ;;  %v1893_v25 = vmax.f32 %v1521_v63, 0.0  ;;  %v2304_v57 = vadd.f32 %v2303_v33, %v2302_v30 }
 0x24e   : > { %v1526_v17 = vpop.f32.mrf.mxu0  ;;  %v2188_v38 = vadd.f32 %v2187_v1, %v1891_v43 }
 0x24f   : > { %v1527_v0 = vadd.f32 %v1526_v17, %v4607_v54  ;;  %v2207_v49 = vadd.f32 %v2206_v16, %v1888_v23  ;;  %v1894_v8 = vmax.f32 %v1523_v9, 0.0  ;;  %v2284_v9 = vrot.slane %v2283_v36, 1 }
 0x250   : > { %v1528_v7 = vpop.f32.mrf.mxu0  ;;  %v2189_v22 = vadd.f32 %v2188_v38, %v1893_v25 }
 0x251   : > { %v1529_v18 = vadd.f32 %v1528_v7, %v4611_v56  ;;  %v2208_v45 = vadd.f32 %v2207_v49, %v1890_v21  ;;  %v1895_v39 = vmax.f32 %v1527_v0, 0.0  ;;  %v2285_v1 = vadd.f32 %v2284_v9, %v2283_v36  ;;  %v4170_v9 = vld [vmem:[%s5550_s3 + $0x54] ss:$8 sps:$4 sm:$0xff]  }
 0x252   : > { %v1530_v14 = vpop.f32.mrf.mxu0 }
 0x253   : > { %v1531_v61 = vadd.f32 %v1530_v14, %v4607_v54  ;;  %v2209_v58 = vadd.f32 %v2208_v45, %v1892_v29  ;;  %v1896_v19 = vmax.f32 %v1529_v18, 0.0  ;;  %v2190_v52 = vadd.f32 %v2189_v22, %v1895_v39 }
 0x254   : > { %v1532_v28 = vpop.f32.mrf.mxu0 }
 0x255   : > { %v1533_v41 = vadd.f32 %v1532_v28, %v4611_v56  ;;  %v1897_v46 = vmax.f32 %v1531_v61, 0.0  ;;  %v2210_v24 = vadd.f32 %v2209_v58, %v1894_v8  ;;  %v2305_v28 = vrot.slane %v2304_v57, 1 }
 0x256   : > { %v1536_v10 = vpop.f32.mrf.mxu0 }
 0x257   : > { %v1537_v13 = vadd.f32 %v1536_v10, %v4607_v54  ;;  %v1898_v17 = vmax.f32 %v1533_v41, 0.0  ;;  %v2211_v6 = vadd.f32 %v2210_v24, %v1896_v19  ;;  %v2191_v62 = vadd.f32 %v2190_v52, %v1897_v46 }
 0x258   : > { %v1538_v11 = vpop.f32.mrf.mxu0  ;;  %v2306_v25 = vadd.f32 %v2305_v28, %v2304_v57  ;;  %v4168_v28 = vld [vmem:[%s5550_s3 + $0x50] ss:$8 sps:$4 sm:$0xff]  }
 0x259   : > { %v1539_v20 = vadd.f32 %v1538_v11, %v4611_v56  ;;  %v1899_v59 = vmax.f32 %v1537_v13, 0.0  ;;  %v2212_v12 = vadd.f32 %v2211_v6, %v1898_v17  ;;  %v2321_v13 = vmul.f32 0.00390625, %v4848_v27 }
 0x25a   : > { %v1540_v40 = vpop.f32.mrf.mxu0  ;;  %v2314_v41 = vadd.f32 %v2306_v25, %v2285_v1  ;;  %v4185_v1 = vld [vmem:[%s5550_s3 + $0x4] ss:$8 sps:$4 sm:$0xff]   ;;  %v4183_v25 = vld [vmem:[%s5550_s3] ss:$8 sps:$4 sm:$0xff]  }
 0x25b   : > { %v1541_v55 = vadd.f32 %v1540_v40, %v4607_v54  ;;  %v1900_v32 = vmax.f32 %v1539_v20, 0.0  ;;  %v2192_v48 = vadd.f32 %v2191_v62, %v1899_v59  ;;  %v2335_v22 = vmul.f32 %v5086_v35, %v2321_v13  ;;  %v4198_v13 = vld [vmem:[%s5550_s3 + $0xb0] ss:$8 sps:$4 sm:$0xff]  }
 0x25c   : > { %v1542_v51 = vpop.f32.mrf.mxu0  ;;  %v2322_v58 = vmul.f32 0.00390625, %v2314_v41  ;;  %v4194_v41 = vld [vmem:[%s5550_s3 + $0xd4] ss:$8 sps:$4 sm:$0xff]  }
 0x25d   : > { %v1543_v31 = vadd.f32 %v1542_v51, %v4611_v56  ;;  %v1901_v7 = vmax.f32 %v1541_v55, 0.0  ;;  %v2213_v63 = vadd.f32 %v2212_v12, %v1900_v32  ;;  %v2349_v33 = vadd.f32 %v5093_v5, %v2335_v22  ;;  %v4209_v22 = vld [vmem:[%s5550_s3 + $0x84] ss:$8 sps:$4 sm:$0xff]  }
 0x25e   : > { %v1546_v3 = vpop.f32.mrf.mxu0  ;;  %v2336_v46 = vmul.f32 %v5086_v35, %v2322_v58  ;;  %v4203_v58 = vld [vmem:[%s5550_s3 + $0xa4] ss:$8 sps:$4 sm:$0xff]  }
 0x25f   : > { %v1547_v44 = vadd.f32 %v1546_v3, %v4607_v54  ;;  %v1902_v14 = vmax.f32 %v1543_v31, 0.0  ;;  %v2193_v16 = vadd.f32 %v2192_v48, %v1901_v7  ;;  %v2357_v52 = vpack.c.bf16 %v2349_v33, %v2349_v33 }
 0x260   : > { %v1548_v23 = vpop.f32.mrf.mxu0  ;;  %v2350_v24 = vadd.f32 %v5093_v5, %v2336_v46  ;;  %v4207_v46 = vld [vmem:[%s5550_s3 + $0x80] ss:$8 sps:$4 sm:$0xff]  }
 0x261   : > { %v1903_v15 = vmax.f32 %v1547_v44, 0.0  ;;  %v1549_v2 = vadd.f32 %v1548_v23, %v4611_v56  ;;  %v2214_v43 = vadd.f32 %v2213_v63, %v1902_v14  ;;  %v2389_v6 = vunpack.c.l.b16 %v2357_v52  ;;  %v4162_v63 = vld [vmem:[%s5550_s3 + $0x70] ss:$8 sps:$4 sm:$0xff]  }
 0x262   : > { %v1550_v60 = vpop.f32.mrf.mxu0  ;;  %v2358_v27 = vpack.c.bf16 %v2350_v24, %v2350_v24 }
 0x263   : > { %v1904_v34 = vmax.f32 %v1549_v2, 0.0  ;;  %v1551_v21 = vadd.f32 %v1550_v60, %v4607_v54  ;;  %v2194_v0 = vadd.f32 %v2193_v16, %v1903_v15  ;;  %v2406_v7 = vrot.slane %v2389_v6, 2  ;;  %v4164_v15 = vld [vmem:[%s5550_s3 + $0x74] ss:$8 sps:$4 sm:$0xff]   ;;  %v4167_v16 = vld [vmem:[%s5550_s3 + $0x64] ss:$8 sps:$4 sm:$0xff]  }
 0x264   : > { %v1552_v26 = vpop.f32.mrf.mxu0  ;;  %v2390_v3 = vunpack.c.l.b16 %v2358_v27 }
 0x265   : > { %v1905_v49 = vmax.f32 %v1551_v21, 0.0  ;;  %v1553_v29 = vadd.f32 %v1552_v26, %v4611_v56  ;;  %v2215_v18 = vadd.f32 %v2214_v43, %v1904_v34  ;;  %v4355_v34 = vmov 1040203264   ;;  %v4165_v21 = vld [vmem:[%s5550_s3 + $0x60] ss:$8 sps:$4 sm:$0xff]  }
 0x266   : > { %v2409_v36 = vrot.slane %v2390_v3, 1  ;;  %v4173_v26 = vld [vmem:[%s5550_s3 + $0x44] ss:$8 sps:$4 sm:$0xff]   ;;  %v4171_v43 = vld [vmem:[%s5550_s3 + $0x40] ss:$8 sps:$4 sm:$0xff]  }
 0x267   : > { %v2195_v10 = vadd.f32 %v2194_v0, %v1905_v49  ;;  %v1906_v42 = vmax.f32 %v1553_v29, 0.0  ;;  %v4176_v0 = vld [vmem:[%s5550_s3 + $0x34] ss:$8 sps:$4 sm:$0xff]   ;;  %v4174_v49 = vld [vmem:[%s5550_s3 + $0x30] ss:$8 sps:$4 sm:$0xff]  }
 0x268   : > { %v4179_v29 = vld [vmem:[%s5550_s3 + $0x24] ss:$8 sps:$4 sm:$0xff]  }
 0x269   : > { %v2196_v61 = vrot.slane %v2195_v10, 4  ;;  %v2216_v30 = vadd.f32 %v2215_v18, %v1906_v42  ;;  %v4177_v18 = vld [vmem:[%s5550_s3 + $0x20] ss:$8 sps:$4 sm:$0xff]   ;;  %v4180_v42 = vld [vmem:[%s5550_s3 + $0x10] ss:$8 sps:$4 sm:$0xff]  }
 0x26b   : > { %v2197_v45 = vadd.f32 %v2196_v61, %v2195_v10  ;;  %v2217_v8 = vrot.slane %v2216_v30, 4  ;;  %v4182_v10 = vld [vmem:[%s5550_s3 + $0x14] ss:$8 sps:$4 sm:$0xff]  }
 0x26c   : > { %v4188_v61 = vld [vmem:[%s5550_s3 + $0xf4] ss:$8 sps:$4 sm:$0xff]  }
 0x26d   : > { %v2198_v11 = vrot.slane %v2197_v45, 2  ;;  %v2218_v54 = vadd.f32 %v2217_v8, %v2216_v30  ;;  %v4186_v30 = vld [vmem:[%s5550_s3 + $0xf0] ss:$8 sps:$4 sm:$0xff]   ;;  %v4189_v8 = vld [vmem:[%s5550_s3 + $0xe0] ss:$8 sps:$4 sm:$0xff]  }
 0x26f   : > { %v2199_v38 = vadd.f32 %v2198_v11, %v2197_v45  ;;  %v2219_v39 = vrot.slane %v2218_v54, 2  ;;  %v4191_v45 = vld [vmem:[%s5550_s3 + $0xe4] ss:$8 sps:$4 sm:$0xff]   ;;  %v4192_v11 = vld [vmem:[%s5550_s3 + $0xd0] ss:$8 sps:$4 sm:$0xff]  }
 0x271   : > { %v2200_v19 = vrot.slane %v2199_v38, 1  ;;  %v2220_v40 = vadd.f32 %v2219_v39, %v2218_v54  ;;  %v4197_v54 = vld [vmem:[%s5550_s3 + $0xc4] ss:$8 sps:$4 sm:$0xff]   ;;  %v4200_v39 = vld [vmem:[%s5550_s3 + $0xb4] ss:$8 sps:$4 sm:$0xff]  }
 0x273   : > { %v2221_v56 = vrot.slane %v2220_v40, 1  ;;  %v2201_v20 = vadd.f32 %v2200_v19, %v2199_v38  ;;  %v4195_v38 = vld [vmem:[%s5550_s3 + $0xc0] ss:$8 sps:$4 sm:$0xff]  }
 0x274   : > { %v4201_v19 = vld [vmem:[%s5550_s3 + $0xa0] ss:$8 sps:$4 sm:$0xff]  }
 0x275   : > { %v2222_v55 = vadd.f32 %v2221_v56, %v2220_v40  ;;  %v4206_v40 = vld [vmem:[%s5550_s3 + $0x94] ss:$8 sps:$4 sm:$0xff]   ;;  %v4204_v56 = vld [vmem:[%s5550_s3 + $0x90] ss:$8 sps:$4 sm:$0xff]  }
 0x277   : > { %v2312_v47 = vadd.f32 %v2222_v55, %v2201_v20  ;;  %v336_v20 = vld [vmem:[%s5555_s8 + $0x4] sm:$0x3] }
 0x278   : > { %v2541_v55 = vrot.slane %v336_v20, %v4596_v50 }
 0x279   : > { %v2320_v17 = vmul.f32 0.00390625, %v2312_v47  ;;  %v2545_v47 = vrot.slane %v336_v20, %v4604_v53 }
 0x27b   : > { %v2334_v51 = vmul.f32 %v5086_v35, %v2320_v17 }
 0x27d   : > { %v2348_v59 = vadd.f32 %v5093_v5, %v2334_v51 }
 0x27f   : > { %v2356_v31 = vpack.c.bf16 %v2348_v59, %v2348_v59 }
 0x281   : > { %v2388_v62 = vunpack.c.l.b16 %v2356_v31 }
 0x283   : > { %v2403_v32 = vrot.slane %v2388_v62, 3 }
 0x285   : > { %v2405_v44 = vsel %vm2404_vm6, %v2403_v32, %v5108_v37 }
 0x286   : > { %v2408_v57 = vsel %vm2407_vm7, %v2406_v7, %v2405_v44 }
 0x287   : > { %v2411_v12 = vsel %vm2410_vm8, %v2409_v36, %v2408_v57  ;;  %v4212_v36 = vld [vmem:[%s5551_s4 + $0x74] ss:$8 sps:$4 sm:$0xff]  }
 0x288   : > { %v5152_v23 = vpack.c.b16 %v2411_v12, %v2411_v12 }
 0x28a   : > { %2527 = vmatmul.mubr.bf16.vlgmr.msra.gmra.mxu1 %v5152_v23 }
 0x28b   : > { %2591 = vmatprep.mubr.bf16.mxu1 %v4354_v4 }
 0x34a   : > { %v2528_v35 = vpop.f32.mrf.mxu1 }
 0x34b   : > { %v2535_v5 = vpack.c.bf16 %v2528_v35, %v2528_v35 }
 0x34c   : > { %v2530_v48 = vpop.f32.mrf.mxu1 }
 0x34d   : > { %v2536_v14 = vpack.c.bf16 %v2530_v48, %v2530_v48  ;;  %v2554_v37 = vsel %vm2552_vm9, %v2535_v5, 0  ;;  %v4210_v5 = vld [vmem:[%s5551_s4 + $0x70] ss:$8 sps:$4 sm:$0xff]   ;;  %v4215_v48 = vld [vmem:[%s5551_s4 + $0x64] ss:$8 sps:$4 sm:$0xff]  }
 0x34e   : > { %v2532_v2 = vpop.f32.mrf.mxu1 }
 0x34f   : > { %3823 = vmatprep.subr.msk.bf16.mxu1 %vm2552_vm9, %v2536_v14  ;;  %v4213_v14 = vld [vmem:[%s5551_s4 + $0x60] ss:$8 sps:$4 sm:$0xff]   ;;  %v4216_v2 = vld [vmem:[%s5551_s4 + $0x50] ss:$8 sps:$4 sm:$0xff]  }
 0x350   : > { %v2533_v60 = vpop.f32.mrf.mxu1  ;;  %2574 = vmatpush1.bf16.msra.mxu1 %v2554_v37  ;;  %v4221_v37 = vld [vmem:[%s5551_s4 + $0x44] ss:$8 sps:$4 sm:$0xff]  }
 0x351   : > { %2796 = vmatprep.subr.bf16.mxu1 %v4164_v15  ;;  %v4218_v15 = vld [vmem:[%s5551_s4 + $0x54] ss:$8 sps:$4 sm:$0xff]   ;;  %v4219_v60 = vld [vmem:[%s5551_s4 + $0x40] ss:$8 sps:$4 sm:$0xff]  }
 0x353   : > { %3824 = vmatmul.mubr.msk.bf16.vlgmr.msra.gmra.mxu1 %vm2548_vm10, %v4355_v34 }
 0x354   : > { %2797 = vmatpush1.bf16.msra.mxu1 %v4162_v63  ;;  %v4224_v63 = vld [vmem:[%s5551_s4 + $0x34] ss:$8 sps:$4 sm:$0xff]  }
 0x355   : > { %2798 = vmatprep.subr.bf16.mxu1 %v4167_v16  ;;  %v4222_v16 = vld [vmem:[%s5551_s4 + $0x30] ss:$8 sps:$4 sm:$0xff]  }
 0x358   : > { %2799 = vmatpush1.bf16.msra.mxu1 %v4165_v21  ;;  %v4227_v21 = vld [vmem:[%s5551_s4 + $0x24] ss:$8 sps:$4 sm:$0xff]  }
 0x359   : > { %2800 = vmatprep.subr.bf16.mxu1 %v4170_v9  ;;  %v4225_v9 = vld [vmem:[%s5551_s4 + $0x20] ss:$8 sps:$4 sm:$0xff]  }
 0x35c   : > { %2801 = vmatpush1.bf16.msra.mxu1 %v4168_v28  ;;  %v4230_v28 = vld [vmem:[%s5551_s4 + $0x14] ss:$8 sps:$4 sm:$0xff]  }
 0x35d   : > { %2802 = vmatprep.subr.bf16.mxu1 %v4173_v26  ;;  %v4228_v26 = vld [vmem:[%s5551_s4 + $0x10] ss:$8 sps:$4 sm:$0xff]  }
 0x360   : > { %2803 = vmatpush1.bf16.msra.mxu1 %v4171_v43  ;;  %v4233_v43 = vld [vmem:[%s5551_s4 + $0x4] ss:$8 sps:$4 sm:$0xff]  }
 0x361   : > { %2804 = vmatprep.subr.bf16.mxu1 %v4176_v0  ;;  %v4231_v0 = vld [vmem:[%s5551_s4] ss:$8 sps:$4 sm:$0xff]  }
 0x364   : > { %2805 = vmatpush1.bf16.msra.mxu1 %v4174_v49  ;;  %v4236_v49 = vld [vmem:[%s5551_s4 + $0xf4] ss:$8 sps:$4 sm:$0xff]  }
 0x365   : > { %2806 = vmatprep.subr.bf16.mxu1 %v4179_v29  ;;  %v4234_v29 = vld [vmem:[%s5551_s4 + $0xf0] ss:$8 sps:$4 sm:$0xff]  }
 0x368   : > { %2807 = vmatpush1.bf16.msra.mxu1 %v4177_v18  ;;  %v4239_v18 = vld [vmem:[%s5551_s4 + $0xe4] ss:$8 sps:$4 sm:$0xff]  }
 0x369   : > { %2808 = vmatprep.subr.bf16.mxu1 %v4182_v10  ;;  %v4237_v10 = vld [vmem:[%s5551_s4 + $0xe0] ss:$8 sps:$4 sm:$0xff]  }
 0x36c   : > { %2809 = vmatpush1.bf16.msra.mxu1 %v4180_v42  ;;  %v4242_v42 = vld [vmem:[%s5551_s4 + $0xd4] ss:$8 sps:$4 sm:$0xff]  }
 0x36d   : > { %2810 = vmatprep.subr.bf16.mxu1 %v4185_v1  ;;  %v4240_v1 = vld [vmem:[%s5551_s4 + $0xd0] ss:$8 sps:$4 sm:$0xff]  }
 0x370   : > { %2811 = vmatpush1.bf16.msra.mxu1 %v4183_v25  ;;  %v4245_v25 = vld [vmem:[%s5551_s4 + $0xc4] ss:$8 sps:$4 sm:$0xff]  }
 0x371   : > { %2812 = vmatprep.subr.bf16.mxu1 %v4188_v61  ;;  %v4243_v61 = vld [vmem:[%s5551_s4 + $0xc0] ss:$8 sps:$4 sm:$0xff]  }
 0x374   : > { %2813 = vmatpush2.bf16.msra.mxu1 %v4186_v30  ;;  %v4248_v30 = vld [vmem:[%s5551_s4 + $0xb4] ss:$8 sps:$4 sm:$0xff]  }
 0x375   : > { %2814 = vmatprep.subr.bf16.mxu1 %v4191_v45  ;;  %v4246_v45 = vld [vmem:[%s5551_s4 + $0xb0] ss:$8 sps:$4 sm:$0xff]  }
 0x378   : > { %2815 = vmatpush2.bf16.msra.mxu1 %v4189_v8  ;;  %v4251_v8 = vld [vmem:[%s5551_s4 + $0xa4] ss:$8 sps:$4 sm:$0xff]  }
 0x379   : > { %2816 = vmatprep.subr.bf16.mxu1 %v4194_v41  ;;  %v4249_v41 = vld [vmem:[%s5551_s4 + $0xa0] ss:$8 sps:$4 sm:$0xff]  }
 0x37c   : > { %2817 = vmatpush2.bf16.msra.mxu1 %v4192_v11  ;;  %v4254_v11 = vld [vmem:[%s5551_s4 + $0x94] ss:$8 sps:$4 sm:$0xff]  }
 0x37d   : > { %2818 = vmatprep.subr.bf16.mxu1 %v4197_v54  ;;  %v4252_v54 = vld [vmem:[%s5551_s4 + $0x90] ss:$8 sps:$4 sm:$0xff]  }
 0x380   : > { %2819 = vmatpush2.bf16.msra.mxu1 %v4195_v38  ;;  %v4257_v38 = vld [vmem:[%s5551_s4 + $0x84] ss:$8 sps:$4 sm:$0xff]  }
 0x381   : > { %2820 = vmatprep.subr.bf16.mxu1 %v4200_v39  ;;  %v4255_v39 = vld [vmem:[%s5551_s4 + $0x80] ss:$8 sps:$4 sm:$0xff]  }
 0x384   : > { %2821 = vmatpush2.bf16.msra.mxu1 %v4198_v13  ;;  %v337_v13 = vld [vmem:[%s5555_s8 + $0x6] sm:$0x3] }
 0x385   : > { %2822 = vmatprep.subr.bf16.mxu1 %v4203_v58  ;;  %v2843_v58 = vrot.slane %v337_v13, %v4596_v50 }
 0x388   : > { %2823 = vmatpush2.bf16.msra.mxu1 %v4201_v19  ;;  %v2847_v19 = vrot.slane %v337_v13, %v4604_v53 }
 0x389   : > { %2824 = vmatprep.subr.bf16.mxu1 %v4206_v40 }
 0x38c   : > { %2825 = vmatpush2.bf16.msra.mxu1 %v4204_v56 }
 0x38d   : > { %2826 = vmatprep.subr.bf16.mxu1 %v4209_v22 }
 0x390   : > { %2827 = vmatpush2.bf16.msra.mxu1 %v4207_v46 }
 0x413   : > { %v2593_v33 = vpop.f32.mrf.mxu1 }
 0x414   : > { %v2594_v24 = vadd.f32 %v2593_v33, %v2541_v55 }
 0x415   : > { %v2595_v17 = vpop.f32.mrf.mxu1 }
 0x416   : > { %v2596_v51 = vadd.f32 %v2595_v17, %v2545_v47  ;;  %v2600_v52 = vmax.f32 %v2594_v24, 0.0 }
 0x417   : > { %v2597_v27 = vpop.f32.mrf.mxu1 }
 0x418   : > { %v2601_v59 = vmax.f32 %v2596_v51, 0.0  ;;  %v2602_v3 = vpack.c.bf16 %v2600_v52, %v2600_v52 }
 0x419   : > { %v2598_v31 = vpop.f32.mrf.mxu1 }
 0x41a   : > { %v2603_v6 = vpack.c.bf16 %v2601_v59, %v2601_v59 }
 0x41c   : > { %2828 = vmatprep.mubr.bf16.mxu1 %v2603_v6 }
 0x41d   : > { %2829 = vmatmul.mubr.bf16.vlgmr.msra.gmra.mxu1 %v2602_v3 }
 0x41e   : > { %2888 = vmatprep.mubr.bf16.mxu1 %v4354_v4 }
 0x4dd   : > { %v2830_v62 = vpop.f32.mrf.mxu1 }
 0x4de   : > { %v2837_v32 = vpack.c.bf16 %v2830_v62, %v2830_v62  ;;  %v4258_v62 = vld [vmem:[%s5553_s6 + $0x38] sm:$0xff]  }
 0x4df   : > { %v2832_v7 = vpop.f32.mrf.mxu1 }
 0x4e0   : > { %v2838_v44 = vpack.c.bf16 %v2832_v7, %v2832_v7  ;;  %v2851_v12 = vsel %vm2552_vm9, %v2837_v32, 0  ;;  %v4356_v32 = vmov 0.0   ;;  %v4260_v7 = vld [vmem:[%s5553_s6 + $0x28] sm:$0xff]  }
 0x4e1   : > { %v2834_v57 = vpop.f32.mrf.mxu1 }
 0x4e2   : > { %3857 = vmatprep.subr.msk.bf16.mxu1 %vm2552_vm9, %v2838_v44  ;;  %v4262_v44 = vld [vmem:[%s5553_s6 + $0x18] sm:$0xff]   ;;  %v4264_v57 = vld [vmem:[%s5553_s6 + $0x8] sm:$0xff]  }
 0x4e3   : > { %v2835_v35 = vpop.f32.mrf.mxu1  ;;  %2871 = vmatpush1.bf16.msra.mxu1 %v2851_v12  ;;  %v4265_v12 = vld [vmem:[%s5553_s6] sm:$0xff]  }
 0x4e4   : > { %3093 = vmatprep.subr.bf16.mxu1 %v4212_v36  ;;  %v4263_v36 = vld [vmem:[%s5553_s6 + $0x10] sm:$0xff]   ;;  %v4266_v35 = vld [vmem:[%s5552_s5 + $0x78] sm:$0xff]  }
 0x4e6   : > { %3858 = vmatmul.mubr.msk.bf16.vlgmr.msra.gmra.mxu1 %vm2548_vm10, %v4355_v34 }
 0x4e7   : > { %3094 = vmatpush1.bf16.msra.mxu1 %v4210_v5  ;;  %v4267_v5 = vld [vmem:[%s5552_s5 + $0x38] sm:$0xff]  }
 0x4e8   : > { %3095 = vmatprep.subr.bf16.mxu1 %v4215_v48  ;;  %v4268_v48 = vld [vmem:[%s5552_s5 + $0x70] sm:$0xff]  }
 0x4eb   : > { %3096 = vmatpush1.bf16.msra.mxu1 %v4213_v14  ;;  %v4269_v14 = vld [vmem:[%s5552_s5 + $0x30] sm:$0xff]  }
 0x4ec   : > { %3097 = vmatprep.subr.bf16.mxu1 %v4218_v15  ;;  %v4270_v15 = vld [vmem:[%s5552_s5 + $0x68] sm:$0xff]  }
 0x4ef   : > { %3098 = vmatpush1.bf16.msra.mxu1 %v4216_v2  ;;  %v4271_v2 = vld [vmem:[%s5552_s5 + $0x28] sm:$0xff]  }
 0x4f0   : > { %3099 = vmatprep.subr.bf16.mxu1 %v4221_v37  ;;  %v4273_v37 = vld [vmem:[%s5552_s5 + $0x20] sm:$0xff]  }
 0x4f3   : > { %3100 = vmatpush1.bf16.msra.mxu1 %v4219_v60  ;;  %v4274_v60 = vld [vmem:[%s5552_s5 + $0x58] sm:$0xff]  }
 0x4f4   : > { %3101 = vmatprep.subr.bf16.mxu1 %v4224_v63  ;;  %v4275_v63 = vld [vmem:[%s5552_s5 + $0x18] sm:$0xff]  }
 0x4f7   : > { %3102 = vmatpush1.bf16.msra.mxu1 %v4222_v16  ;;  %v4276_v16 = vld [vmem:[%s5552_s5 + $0x50] sm:$0xff]  }
 0x4f8   : > { %3103 = vmatprep.subr.bf16.mxu1 %v4227_v21  ;;  %v4277_v21 = vld [vmem:[%s5552_s5 + $0x10] sm:$0xff]  }
 0x4fb   : > { %3104 = vmatpush1.bf16.msra.mxu1 %v4225_v9  ;;  %v4278_v9 = vld [vmem:[%s5552_s5 + $0x48] sm:$0xff]  }
 0x4fc   : > { %3105 = vmatprep.subr.bf16.mxu1 %v4230_v28  ;;  %v4279_v28 = vld [vmem:[%s5552_s5 + $0x8] sm:$0xff]  }
 0x4ff   : > { %3106 = vmatpush1.bf16.msra.mxu1 %v4228_v26  ;;  %v4280_v26 = vld [vmem:[%s5552_s5 + $0x40] sm:$0xff]  }
 0x500   : > { %3107 = vmatprep.subr.bf16.mxu1 %v4233_v43  ;;  %v4281_v43 = vld [vmem:[%s5552_s5] sm:$0xff]  }
 0x503   : > { %3108 = vmatpush1.bf16.msra.mxu1 %v4231_v0  ;;  %v338_v0 = vld [vmem:[%s5555_s8 + $0x8] sm:$0x3] }
 0x504   : > { %3109 = vmatprep.subr.bf16.mxu1 %v4236_v49  ;;  %v3140_v49 = vrot.slane %v338_v0, %v4596_v50  ;;  %v4283_v50 = vld [vmem:[%s5554_s7 + $0x30] sm:$0xff]  }
 0x507   : > { %3110 = vmatpush2.bf16.msra.mxu1 %v4234_v29  ;;  %v3144_v29 = vrot.slane %v338_v0, %v4604_v53  ;;  %v4284_v53 = vld [vmem:[%s5554_s7 + $0x28] sm:$0xff]  }
 0x508   : > { %3111 = vmatprep.subr.bf16.mxu1 %v4239_v18 }
 0x50b   : > { %3112 = vmatpush2.bf16.msra.mxu1 %v4237_v10 }
 0x50c   : > { %3113 = vmatprep.subr.bf16.mxu1 %v4242_v42 }
 0x50f   : > { %3114 = vmatpush2.bf16.msra.mxu1 %v4240_v1 }
 0x510   : > { %3115 = vmatprep.subr.bf16.mxu1 %v4245_v25 }
 0x513   : > { %3116 = vmatpush2.bf16.msra.mxu1 %v4243_v61 }
 0x514   : > { %3117 = vmatprep.subr.bf16.mxu1 %v4248_v30  ;;  %v4282_v30 = vld [vmem:[%s5554_s7 + $0x38] sm:$0xff]  }
 0x517   : > { %3118 = vmatpush2.bf16.msra.mxu1 %v4246_v45 }
 0x518   : > { %3119 = vmatprep.subr.bf16.mxu1 %v4251_v8 }
 0x51b   : > { %3120 = vmatpush2.bf16.msra.mxu1 %v4249_v41  ;;  %v4285_v41 = vld [vmem:[%s5554_s7 + $0x20] sm:$0xff]  }
 0x51c   : > { %3121 = vmatprep.subr.bf16.mxu1 %v4254_v11  ;;  %v4286_v11 = vld [vmem:[%s5554_s7 + $0x18] sm:$0xff]  }
 0x51f   : > { %3122 = vmatpush2.bf16.msra.mxu1 %v4252_v54 }
 0x520   : > { %3123 = vmatprep.subr.bf16.mxu1 %v4257_v38 }
 0x523   : > { %3124 = vmatpush2.bf16.msra.mxu1 %v4255_v39 }
 0x5a6   : > { %v2890_v40 = vpop.f32.mrf.mxu1 }
 0x5a7   : > { %v2891_v56 = vadd.f32 %v2890_v40, %v2843_v58  ;;  %v4287_v58 = vld [vmem:[%s5554_s7 + $0x10] sm:$0xff]   ;;  %v4289_v40 = vld [vmem:[%s5554_s7] sm:$0xff]  }
 0x5a8   : > { %v2892_v22 = vpop.f32.mrf.mxu1 }
 0x5a9   : > { %v2893_v46 = vadd.f32 %v2892_v22, %v2847_v19  ;;  %v2897_v20 = vmax.f32 %v2891_v56, 0.0  ;;  %v4288_v19 = vld [vmem:[%s5554_s7 + $0x8] sm:$0xff]  }
 0x5aa   : > { %v2894_v55 = vpop.f32.mrf.mxu1 }
 0x5ab   : > { %v2898_v47 = vmax.f32 %v2893_v46, 0.0  ;;  %v2899_v17 = vpack.c.bf16 %v2897_v20, %v2897_v20  ;;  %v3917_v20 = vld [vmem:[%s5555_s8 + $0xa] ss:$0 sm:$0xff] }
 0x5ac   : > { %v2895_v33 = vpop.f32.mrf.mxu1 }
 0x5ad   : > { %v2900_v24 = vpack.c.bf16 %v2898_v47, %v2898_v47 }
 0x5af   : > { %3125 = vmatprep.mubr.bf16.mxu1 %v2900_v24 }
 0x5b0   : > { %3126 = vmatmul.mubr.bf16.vlgmr.msra.gmra.mxu1 %v2899_v17 }
 0x5b1   : > { %3185 = vmatprep.mubr.bf16.mxu1 %v4354_v4  ;;  %v4259_v4 = vld [vmem:[%s5553_s6 + $0x30] sm:$0xff]  }
 0x670   : > { %v3127_v51 = vpop.f32.mrf.mxu1 }
 0x671   : > { %v3134_v52 = vpack.c.bf16 %v3127_v51, %v3127_v51 }
 0x672   : > { %v3129_v27 = vpop.f32.mrf.mxu1 }
 0x673   : > { %v3135_v59 = vpack.c.bf16 %v3129_v27, %v3129_v27  ;;  %v3148_v6 = vsel %vm2552_vm9, %v3134_v52, 0  ;;  %v3918_v52 = vld [vmem:[%s5555_s8 + $0xb] ss:$0 sm:$0xff] }
 0x674   : > { %v3131_v31 = vpop.f32.mrf.mxu1 }
 0x675   : > { %3891 = vmatprep.subr.msk.bf16.mxu1 %vm2552_vm9, %v3135_v59 }
 0x676   : > { %v3132_v3 = vpop.f32.mrf.mxu1  ;;  %3168 = vmatpush1.bf16.msra.mxu1 %v3148_v6 }
 0x677   : > { %3972 = vmatprep.subr.bf16.mxu1 %v4356_v32 }
 0x679   : > { %3892 = vmatmul.mubr.msk.bf16.vlgmr.msra.gmra.mxu1 %vm2548_vm10, %v4355_v34  ;;  %v4261_v34 = vld [vmem:[%s5553_s6 + $0x20] sm:$0xff]  }
 0x67a   : > { %3973 = vmatpush3.bf16.msra.mxu1 %v4258_v62  ;;  %3988 = vmatprep.mubr.msk.bf16.mxu1 %vm4357_vm11, %v4356_v32 }
 0x67b   : > { %3974 = vmatprep.subr.bf16.mxu1 %v4356_v32 }
 0x67e   : > { %3975 = vmatpush3.bf16.msra.mxu1 %v4259_v4 }
 0x67f   : > { %3976 = vmatprep.subr.bf16.mxu1 %v4356_v32 }
 0x682   : > { %3977 = vmatpush3.bf16.msra.mxu1 %v4260_v7 }
 0x683   : > { %3978 = vmatprep.subr.bf16.mxu1 %v4356_v32 }
 0x686   : > { %3979 = vmatpush3.bf16.msra.mxu1 %v4261_v34 }
 0x687   : > { %3980 = vmatprep.subr.bf16.mxu1 %v4356_v32 }
 0x68a   : > { %3981 = vmatpush3.bf16.msra.mxu1 %v4262_v44 }
 0x68b   : > { %3982 = vmatprep.subr.bf16.mxu1 %v4356_v32 }
 0x68e   : > { %3983 = vmatpush3.bf16.msra.mxu1 %v4263_v36 }
 0x68f   : > { %3984 = vmatprep.subr.bf16.mxu1 %v4356_v32 }
 0x692   : > { %3985 = vmatpush3.bf16.msra.mxu1 %v4264_v57 }
 0x693   : > { %3986 = vmatprep.subr.bf16.mxu1 %v4356_v32 }
 0x696   : > { %3987 = vmatpush3.bf16.msra.mxu1 %v4265_v12 }
 0x697   : > { %3941 = vmatprep.subr.bf16.mxu1 %v4266_v35 }
 0x699   : > { %3989 = vmatmul.mubr.bf16.vlgmr.msra.gmra.mxu1 %v5152_v23  ;;  %v4272_v23 = vld [vmem:[%s5552_s5 + $0x60] sm:$0xff]  }
 0x69a   : > { %3942 = vmatpush3.bf16.msra.mxu1 %v4267_v5 }
 0x69b   : > { %3943 = vmatprep.subr.bf16.mxu1 %v4268_v48 }
 0x69e   : > { %3944 = vmatpush3.bf16.msra.mxu1 %v4269_v14 }
 0x69f   : > { %3945 = vmatprep.subr.bf16.mxu1 %v4270_v15 }
 0x6a2   : > { %3946 = vmatpush3.bf16.msra.mxu1 %v4271_v2 }
 0x6a3   : > { %3947 = vmatprep.subr.bf16.mxu1 %v4272_v23 }
 0x6a6   : > { %3948 = vmatpush3.bf16.msra.mxu1 %v4273_v37 }
 0x6a7   : > { %3949 = vmatprep.subr.bf16.mxu1 %v4274_v60 }
 0x6aa   : > { %3950 = vmatpush3.bf16.msra.mxu1 %v4275_v63 }
 0x6ab   : > { %3951 = vmatprep.subr.bf16.mxu1 %v4276_v16 }
 0x6ae   : > { %3952 = vmatpush3.bf16.msra.mxu1 %v4277_v21 }
 0x6af   : > { %3953 = vmatprep.subr.bf16.mxu1 %v4278_v9 }
 0x6b2   : > { %3954 = vmatpush3.bf16.msra.mxu1 %v4279_v28 }
 0x6b3   : > { %3955 = vmatprep.subr.bf16.mxu1 %v4280_v26 }
 0x6b6   : > { %3956 = vmatpush3.bf16.msra.mxu1 %v4281_v43 }
 0x6b7   : > { %3992 = vmatprep.subr.bf16.mxu1 %v4356_v32 }
 0x739   : > { %v3187_v18 = vpop.f32.mrf.mxu1 }
 0x73a   : > { %v3188_v10 = vadd.f32 %v3187_v18, %v3140_v49 }
 0x73b   : > { %v3189_v42 = vpop.f32.mrf.mxu1 }
 0x73c   : > { %v3190_v1 = vadd.f32 %v3189_v42, %v3144_v29  ;;  %v3194_v45 = vpack.c.bf16 %v3188_v10, %v3188_v10 }
 0x73d   : > { %v3191_v25 = vpop.f32.mrf.mxu1 }
 0x73e   : > { %v3195_v61 = vpack.c.bf16 %v3190_v1, %v3190_v1 }
 0x73f   : > { %v3192_v8 = vpop.f32.mrf.mxu1 }
 0x740   : > { %3460 = vmatprep.mubr.bf16.mxu1 %v3195_v61 }
 0x741   : > { %3461 = vmatmul.mubr.bf16.vlgmr.msra.gmra.mxu1 %v3194_v45 }
 0x742   : > { %3993 = vmatpush3.bf16.msra.mxu1 %v4282_v30  ;;  %4008 = vmatprep.mubr.msk.bf16.mxu1 %vm4357_vm11, %v4356_v32 }
 0x743   : > { %3994 = vmatprep.subr.bf16.mxu1 %v4356_v32 }
 0x746   : > { %3995 = vmatpush3.bf16.msra.mxu1 %v4283_v50 }
 0x747   : > { %3996 = vmatprep.subr.bf16.mxu1 %v4356_v32 }
 0x74a   : > { %3997 = vmatpush3.bf16.msra.mxu1 %v4284_v53 }
 0x74b   : > { %3998 = vmatprep.subr.bf16.mxu1 %v4356_v32 }
 0x74e   : > { %3999 = vmatpush3.bf16.msra.mxu1 %v4285_v41 }
 0x74f   : > { %4000 = vmatprep.subr.bf16.mxu1 %v4356_v32 }
 0x752   : > { %4001 = vmatpush3.bf16.msra.mxu1 %v4286_v11 }
 0x753   : > { %4002 = vmatprep.subr.bf16.mxu1 %v4356_v32 }
 0x756   : > { %4003 = vmatpush3.bf16.msra.mxu1 %v4287_v58 }
 0x757   : > { %4004 = vmatprep.subr.bf16.mxu1 %v4356_v32 }
 0x759   : > { %v3326_v54 = vpop.f32.mrf.mxu1 }
 0x75a   : > { %4005 = vmatpush3.bf16.msra.mxu1 %v4288_v19 }
 0x75b   : > { %v3990_v38 = vpop.f32.mrf.mxu1  ;;  %4006 = vmatprep.subr.bf16.mxu1 %v4356_v32 }
 0x75d   : > { %v3329_v39 = vpop.f32.mrf.mxu1 }
 0x75e   : > { %4007 = vmatpush3.bf16.msra.mxu1 %v4289_v40 }
 0x75f   : > { %v3991_v13 = vpop.f32.mrf.mxu1 }
 0x801   : > { %v3957_v56 = vpop.f32.mrf.mxu1 }
 0x803   : > { %v3958_v22 = vpop.f32.mrf.mxu1 }
 0x804   : > { %v3959_v46 = vadd.f32 %v3958_v22, %v3957_v56 }
 0x805   : > { %v3960_v55 = vpop.f32.mrf.mxu1 }
 0x806   : > { %v3463_v47 = vadd.f32 %v3959_v46, %v3326_v54 }
 0x807   : > { %v3961_v33 = vpop.f32.mrf.mxu1 }
 0x808   : > { %v3474_v24 = vadd.f32 %v3917_v20, %v3463_v47 }
 0x80a   : > { %v3475_v17 = vmax.f32 %v3474_v24, 0.0 }
 0x80c   : > { %v3476_v51 = vpack.c.bf16 %v3475_v17, %v3475_v17 }
 0x80e   : > { %4009 = vmatmul.mubr.bf16.vlgmr.msra.gmra.mxu1 %v3476_v51 }
 0x8ce   : > { %v3581_v27 = vpop.f32.mrf.mxu1 }
 0x8cf   : > { %v3582_v59 = vadd.f32 %v3918_v52, %v3581_v27 }
 0x8d0   : > { %v4010_v31 = vpop.f32.mrf.mxu1 }
 0x8d1   : > { %3587 = vst.msk [vmem:[%s325_s24] sm:$0xff] %vm2548_vm10, %v3582_v59 }
 0x8d2   : > { %v3584_v6 = vpop.f32.mrf.mxu1 }
 0x8d3   : > { %4305 = shalt.err (!%p4302_p3)
}
 0x8d4   : > { %s4306_s22 = scalar_lea.hbm %s5505_s27, 128  ;;  %s4310_s24 = scalar_lea.hbm %s5556_s9, 256 }
 0x8d5   : > { %p4307_p4 = scmp.ne.s32.totalorder %s5505_s27, %s4306_s22  ;;  %p4311_p9 = scmp.lt.s32.totalorder %s5505_s27, %s5556_s9 }
 0x8d6   : > { %p4312_p10 = scmp.lt.s32.totalorder %s4310_s24, %s4306_s22 }
 0x8d7   : > { %p4308_p7 = pnand %p4307_p4, %p4447_p5 }
 0x8d8   : > { %p4313_p11 = por %p4312_p10, %p4311_p9 }
 0x8d9   : > { %p4309_p8 = pneg %p4308_p7 }
 0x8db   : > { %p4314_p12 = pnand %p4313_p11, %p4309_p8 }
 0x8dd   : > { %4317 = shalt.err (!%p4314_p12)
}
 0x8de   : > { %4020 = dma.vmem_to_hbm [thread:$0]  (%p4447_p5), %s5507_s25, 128, %s5505_s27, %s3589_s28   ;;  %v4011_v3 = vpop.f32.mrf.mxu1 }
 0x8df PF: > { %p4026_p13 = scmp.ge.s32.totalorder %s4352_s12, 2  ;;  %s3614_s13 = sand.u32 1, %s4340_s30  }
 0x8e0   : > { %s3615_s29 = scalar_lea.sflag [#allocation3], %s3614_s13 }
 0x8e1   : > { %p4023_p0 = pnand %p4026_p13, %p4451_p6 }
 0x8e3   : > { %p4024_p1 = pneg %p4023_p0 }
 0x8e5   : > { %4335 = dma.done.wait (%p4024_p1), %s3615_s29, 128  }
 0x8e6   : > { %4337 = vsyncadd (%p4024_p1), %s3615_s29, 4294967168  ;;  %p19_p2 = scmp.ge.s32.totalorder %s4434_s15, 4   ;;  %s5559_s30 = smov %s4344_s10 }
 0x8e7   : > { %s5560_s10 = smov %s4348_s11  ;;  %s5561_s11 = smov %s4445_s18 }
 0x8e8   : > { %s5562_s12 = smov %s4434_s15  ;;  %21 = sbr.rel (!%p19_p2) target bundleno = 3 (0x3), region = 91 }
 0x8ed   :  { %3620 = vsyncpa [#allocation3], 1 }
 0x8ee   :  { %3622 = vsyncpa [#allocation3 + $0x1], 1 }

</bundles_post_ra>
